<compile_context>
chip_gen: v7x
topology: tpu7x:2x2x1
jax: 0.10.0
libtpu: 0.0.40
codegen_flags: <defaults>
</compile_context>

<pallas_src>
import functools

import jax
import jax.numpy as jnp
from jax.experimental import pallas as pl
from jax.experimental.pallas import tpu as pltpu

LANE = 128      # hidden / embed / vocab padded to this (lane-dense outputs)
SUBLANE = 8     # f32 sublane width (batch padding)


def _round_up(x, m):
    return (x + m - 1) // m * m


def _compiler_params(dimension_semantics, vmem_bytes):
    # Scoped-VMEM limit computed from the actual (double-buffered) block
    # footprints plus generous headroom, instead of a blanket 48 MiB
    # (v7x only has 64 MiB/TC; v5e/v6e have 128 MiB).
    limit = int(max(2 * vmem_bytes + (8 << 20), 16 << 20))
    return pltpu.CompilerParams(dimension_semantics=dimension_semantics,
                                vmem_limit_bytes=limit)


# ----------------------------------------------------------------------------
# Tiled matmul + bias (+ optional ReLU):  out = act(x @ w + b)
# ----------------------------------------------------------------------------
def _matmul_bias_kernel(x_ref, w_ref, b_ref, o_ref, acc_ref, *, activation):
    @pl.when(pl.program_id(2) == 0)
    def _():
        acc_ref[...] = jnp.zeros_like(acc_ref)

    acc_ref[...] += jnp.dot(x_ref[...], w_ref[...],
                            preferred_element_type=jnp.float32)

    @pl.when(pl.program_id(2) == pl.num_programs(2) - 1)
    def _():
        y = acc_ref[...] + b_ref[...]
        if activation == "relu":
            y = jnp.maximum(y, 0.0)
        o_ref[...] = y.astype(o_ref.dtype)


def matmul_bias(x, w, b, activation=None, *, out_dtype=jnp.float32,
                tm_max=512, tn_max=512, tk_max=1024,
                operand_dtype=jnp.bfloat16):
    """Tiled (M,N parallel; K arbitrary) matmul; bf16 operands, f32 accumulate.

    tk_max >= typical K here, so the K grid usually collapses to one step and
    the (tm, K) x tile stays resident across the whole N sweep.  Inputs are
    zero-padded to tile multiples (exact for the valid region) and sliced back.
    """
    m, k = x.shape
    _, n = w.shape
    tm = min(tm_max, _round_up(m, 2 * SUBLANE))   # 16-row align (bf16 sublanes)
    tn = min(tn_max, _round_up(n, LANE))
    tk = min(tk_max, _round_up(k, LANE))
    mp, np_, kp = _round_up(m, tm), _round_up(n, tn), _round_up(k, tk)

    xp = jnp.pad(x, ((0, mp - m), (0, kp - k))).astype(operand_dtype)
    wp = jnp.pad(w, ((0, kp - k), (0, np_ - n))).astype(operand_dtype)
    bias_p = jnp.pad(b, (0, np_ - n)).reshape(1, np_).astype(jnp.float32)

    vmem = (2 * tm * tk * 2 + 2 * tk * tn * 2 + 2 * tn * 4      # x, w, b (2x buf)
            + 2 * tm * tn * jnp.dtype(out_dtype).itemsize       # output (2x buf)
            + tm * tn * 4)                                       # f32 accumulator

    out = pl.pallas_call(
        functools.partial(_matmul_bias_kernel, activation=activation),
        out_shape=jax.ShapeDtypeStruct((mp, np_), out_dtype),
        grid_spec=pltpu.PrefetchScalarGridSpec(
            num_scalar_prefetch=0,
            grid=(mp // tm, np_ // tn, kp // tk),
            in_specs=[
                pl.BlockSpec((tm, tk), lambda i, j, kk: (i, kk)),
                pl.BlockSpec((tk, tn), lambda i, j, kk: (kk, j)),
                pl.BlockSpec((1, tn), lambda i, j, kk: (0, j)),
            ],
            out_specs=pl.BlockSpec((tm, tn), lambda i, j, kk: (i, j)),
            scratch_shapes=[pltpu.VMEM((tm, tn), jnp.float32)],
        ),
        compiler_params=_compiler_params(
            ("parallel", "parallel", "arbitrary"), vmem),
    )(xp, wp, bias_p)
    return out[:m, :n]


# ----------------------------------------------------------------------------
# Fused encoder head part 1: conv3x3 (im2col matmul) + ReLU -> global-avg-pool.
# IMG_TILE images per "parallel" grid step; the (HW, Cmid) conv activation
# never round-trips HBM.  The FC is done afterwards as ONE batched matmul_bias
# over the pooled (N, Cmid) matrix (avoids M=1 matmuls).
# ----------------------------------------------------------------------------
def _conv_gap_kernel(xc_ref, wc_ref, bc_ref, o_ref, *, img_tile):
    wc = wc_ref[...]                                        # bf16, resident
    bc = bc_ref[...]                                        # (1, Cmid) f32
    for i in range(img_tile):                               # static unroll
        conv = jnp.dot(xc_ref[i], wc, preferred_element_type=jnp.float32)
        conv = jnp.maximum(conv + bc, 0.0)                  # (HW, Cmid) in VMEM
        o_ref[i] = jnp.mean(conv, axis=0, keepdims=True)    # GAP -> (1, Cmid)


def conv_gap(x_col, w_conv, b_conv, *, img_tile=8):
    n, hw, kc = x_col.shape
    cmid = w_conv.shape[1]
    img_tile = min(img_tile, n)
    n_pad = _round_up(n, img_tile)
    x_col = jnp.pad(x_col, ((0, n_pad - n), (0, 0), (0, 0)))

    vmem = (2 * img_tile * hw * kc * 2 + 2 * kc * cmid * 2 + 2 * cmid * 4
            + 2 * img_tile * cmid * 4 + hw * cmid * 4)

    out = pl.pallas_call(
        functools.partial(_conv_gap_kernel, img_tile=img_tile),
        out_shape=jax.ShapeDtypeStruct((n_pad, 1, cmid), jnp.float32),
        grid_spec=pltpu.PrefetchScalarGridSpec(
            num_scalar_prefetch=0,
            grid=(n_pad // img_tile,),
            in_specs=[
                pl.BlockSpec((img_tile, hw, kc), lambda i: (i, 0, 0)),
                pl.BlockSpec((kc, cmid), lambda i: (0, 0)),
                pl.BlockSpec((1, cmid), lambda i: (0, 0)),
            ],
            out_specs=pl.BlockSpec((img_tile, 1, cmid), lambda i: (i, 0, 0)),
        ),
        compiler_params=_compiler_params(("parallel",), vmem),
    )(x_col, w_conv, b_conv)
    return out.reshape(n_pad, cmid)[:n]                     # (N, Cmid) f32


# ----------------------------------------------------------------------------
# LSTM recurrence: input projection already folded into gates_x (bf16), so each
# step only does h(bf16) @ W_hh(bf16) on the MXU + f32 gate pointwise math.
# Fully unrolled inside the kernel body (static, short sequence); batch is
# split over a "parallel" grid axis so both TensorCores are used on v7x when
# the padded batch allows; W_hh stays resident (constant index_map).
# ----------------------------------------------------------------------------
def _lstm_recurrent_kernel(gx_ref, whh_ref, hseq_ref, *, seq_len, hidden):
    bb = gx_ref.shape[1]
    h = jnp.zeros((bb, hidden), jnp.float32)   # h0/c0 are always zeros:
    c = jnp.zeros((bb, hidden), jnp.float32)   # no input refs / DMAs needed.
    whh = whh_ref[...]                         # bf16, resident across all steps
    for t in range(seq_len):                   # full unroll (seq_len static)
        gates = gx_ref[t].astype(jnp.float32) + jnp.dot(
            h.astype(jnp.bfloat16), whh, preferred_element_type=jnp.float32)
        # PyTorch gate order i, f, g, o; hidden is lane-padded to 128 so every
        # slice below starts on a 128-lane boundary (zero-cost view, no XLU).
        i_g = jax.nn.sigmoid(gates[:, 0 * hidden:1 * hidden])
        f_g = jax.nn.sigmoid(gates[:, 1 * hidden:2 * hidden])
        g_g = jnp.tanh(gates[:, 2 * hidden:3 * hidden])
        o_g = jax.nn.sigmoid(gates[:, 3 * hidden:4 * hidden])
        c = f_g * c + i_g * g_g
        h = o_g * jnp.tanh(c)
        hseq_ref[t] = h.astype(hseq_ref.dtype)


def lstm_recurrent(gates_x, w_hh):
    """gates_x: (S, Bp, 4*Hp) bf16 precomputed x@W_ih + b.  Returns (S, Bp, Hp) bf16."""
    s, bp, four_h = gates_x.shape
    hidden = four_h // 4
    # Blocks of 16 batch rows keep bf16 sublane packing aligned; otherwise the
    # whole padded batch is one block (== full dim, always legal).
    block_b = 16 if (bp % 16 == 0 and bp > 16) else bp

    vmem = (2 * s * block_b * four_h * 2       # gates_x blocks (bf16, 2x buf)
            + 2 * hidden * four_h * 2          # resident W_hh (bf16)
            + 2 * s * block_b * hidden * 2     # hseq blocks (bf16, 2x buf)
            + 8 * block_b * four_h * 4)        # live f32 gate temporaries

    return pl.pallas_call(
        functools.partial(_lstm_recurrent_kernel, seq_len=s, hidden=hidden),
        out_shape=jax.ShapeDtypeStruct((s, bp, hidden), jnp.bfloat16),
        grid_spec=pltpu.PrefetchScalarGridSpec(
            num_scalar_prefetch=0,
            grid=(bp // block_b,),
            in_specs=[
                pl.BlockSpec((s, block_b, four_h), lambda i: (0, i, 0)),
                pl.BlockSpec((hidden, four_h), lambda i: (0, 0)),
            ],
            out_specs=pl.BlockSpec((s, block_b, hidden), lambda i: (0, i, 0)),
        ),
        compiler_params=_compiler_params(("parallel",), vmem),
    )(gates_x, w_hh)


# ----------------------------------------------------------------------------
# Gate-aware zero padding (exact): each of the 4 gate blocks is padded to Hp
# lanes; padded columns get 0 pre-activation -> padded c, h stay identically 0.
# ----------------------------------------------------------------------------
def _pad_gates(w, din_p, hidden, hidden_p):
    din = w.shape[0]
    w4 = w.reshape(din, 4, hidden)
    w4 = jnp.pad(w4, ((0, din_p - din), (0, 0), (0, hidden_p - hidden)))
    return w4.reshape(din_p, 4 * hidden_p)


def _pad_gate_bias(b, hidden, hidden_p):
    b4 = jnp.pad(b.reshape(4, hidden), ((0, 0), (0, hidden_p - hidden)))
    return b4.reshape(4 * hidden_p)


# ----------------------------------------------------------------------------
# Parameters (deterministic synthetic init, logical PyTorch-like sizes)
# ----------------------------------------------------------------------------
def _uniform(key, shape, scale):
    return jax.random.uniform(key, shape, jnp.float32, -scale, scale)


def init_params(key, c_in, c_mid, embed_size, hidden_size, vocab_size,
                num_layers):
    ks = iter(jax.random.split(key, 8 + 3 * num_layers))
    p = {"hidden_size": hidden_size, "num_layers": num_layers}
    s_conv = 1.0 / (9 * c_in) ** 0.5
    p["w_conv"] = _uniform(next(ks), (9 * c_in, c_mid), s_conv)
    p["b_conv"] = _uniform(next(ks), (c_mid,), s_conv)
    s_fc = 1.0 / c_mid ** 0.5
    p["w_fc"] = _uniform(next(ks), (c_mid, embed_size), s_fc)
    p["b_fc"] = _uniform(next(ks), (embed_size,), s_fc)
    p["embed"] = _uniform(next(ks), (vocab_size, embed_size), 1.0)
    s_h = 1.0 / hidden_size ** 0.5
    for layer in range(num_layers):
        din = embed_size if layer == 0 else hidden_size
        p[f"w_ih_{layer}"] = _uniform(next(ks), (din, 4 * hidden_size), s_h)
        p[f"w_hh_{layer}"] = _uniform(next(ks), (hidden_size, 4 * hidden_size), s_h)
        p[f"b_{layer}"] = _uniform(next(ks), (4 * hidden_size,), s_h)  # b_ih+b_hh
    p["w_out"] = _uniform(next(ks), (hidden_size, vocab_size), s_h)
    p["b_out"] = _uniform(next(ks), (vocab_size,), s_h)
    return p


def prepare_params(params):
    """Pad + cast every weight ONCE (gate-aware exact zero padding, bf16 MXU
    operands) so the per-call forward path carries no weight pads / casts."""
    hidden = params["hidden_size"]
    num_layers = params["num_layers"]
    vocab, embed = params["embed"].shape
    cmid = params["w_conv"].shape[1]
    ep = _round_up(embed, LANE)
    hp = _round_up(hidden, LANE)
    vp = _round_up(vocab, LANE)

    prep = {}
    prep["w_conv"] = params["w_conv"].astype(jnp.bfloat16)
    prep["b_conv"] = params["b_conv"].reshape(1, cmid).astype(jnp.float32)
    prep["w_fc"] = jnp.pad(params["w_fc"],
                           ((0, 0), (0, ep - embed))).astype(jnp.bfloat16)
    prep["b_fc"] = jnp.pad(params["b_fc"], (0, ep - embed))
    prep["embed"] = jnp.pad(params["embed"],
                            ((0, 0), (0, ep - embed))).astype(jnp.bfloat16)
    for layer in range(num_layers):
        din_p = ep if layer == 0 else hp
        prep[f"w_ih_{layer}"] = _pad_gates(
            params[f"w_ih_{layer}"], din_p, hidden, hp).astype(jnp.bfloat16)
        prep[f"w_hh_{layer}"] = _pad_gates(
            params[f"w_hh_{layer}"], hp, hidden, hp).astype(jnp.bfloat16)
        prep[f"b_{layer}"] = _pad_gate_bias(params[f"b_{layer}"], hidden, hp)
    prep["w_out"] = jnp.pad(params["w_out"],
                            ((0, hp - hidden), (0, vp - vocab))).astype(jnp.bfloat16)
    prep["b_out"] = jnp.pad(params["b_out"], (0, vp - vocab))

    cfg = {"num_layers": num_layers, "hidden_p": hp, "vocab": vocab}
    return prep, cfg


# ----------------------------------------------------------------------------
# Forward pass (EncodertoDecoder.forward)
# ----------------------------------------------------------------------------
def encoder_forward(prep, images_nchw):
    """Encoder stand-in: conv3x3+ReLU -> GAP (fused kernel) -> FC+ReLU (matmul)."""
    x = jnp.transpose(images_nchw, (0, 2, 3, 1))                # NCHW -> NHWC
    n, h, w, c = x.shape
    xpad = jnp.pad(x, ((0, 0), (1, 1), (1, 1), (0, 0)))
    # TODO(synk): host-side im2col; at Inception-scale inputs replace with
    # BlockSpec-driven patch gathering / shifted accumulation inside the kernel.
    patches = [xpad[:, dy:dy + h, dx:dx + w, :]
               for dy in range(3) for dx in range(3)]
    x_col = jnp.concatenate(patches, axis=-1).reshape(n, h * w, 9 * c)
    pooled = conv_gap(x_col.astype(jnp.bfloat16),
                      prep["w_conv"], prep["b_conv"])           # (N, Cmid) f32
    # Batched FC over all pooled images (no M=1 matmuls inside the kernel).
    return matmul_bias(pooled, prep["w_fc"], prep["b_fc"], activation="relu",
                       out_dtype=jnp.bfloat16)                  # (N, Ep) bf16


def decoder_forward(prep, cfg, features_p, captions):
    """DecoderLSTM: embed captions, prepend features, hoisted-proj LSTM, FC."""
    hp = cfg["hidden_p"]
    emb = jnp.take(prep["embed"], captions, axis=0)             # (T, B, Ep) bf16
    x = jnp.concatenate([features_p[None], emb], axis=0)        # (T+1, B, Ep)
    s, b, _ = x.shape
    bp = _round_up(b, SUBLANE)                                  # batch -> 8 sublanes
    x = jnp.pad(x, ((0, 0), (0, bp - b), (0, 0)))               # (S, Bp, Ep)

    for layer in range(cfg["num_layers"]):
        din_p = x.shape[-1]
        # Hoisted input projection: one big tiled MXU matmul over all
        # timesteps, emitted in bf16 (halved HBM writeback + re-read).
        gates_x = matmul_bias(x.reshape(s * bp, din_p),
                              prep[f"w_ih_{layer}"], prep[f"b_{layer}"],
                              out_dtype=jnp.bfloat16)           # (S*Bp, 4Hp)
        x = lstm_recurrent(gates_x.reshape(s, bp, 4 * hp),
                           prep[f"w_hh_{layer}"])               # (S, Bp, Hp) bf16

    logits = matmul_bias(x.reshape(s * bp, hp), prep["w_out"], prep["b_out"],
                         out_dtype=jnp.float32)                 # (S*Bp, Vp) f32
    return logits.reshape(s, bp, -1)[:, :b, :cfg["vocab"]]      # (T+1, B, V)


def encoder_to_decoder_forward(prep, images, captions, *, cfg):
    features_p = encoder_forward(prep, images)                  # (N, Ep) bf16
    return decoder_forward(prep, cfg, features_p, captions)


# ----------------------------------------------------------------------------
if __name__ == "__main__":
    embed_size, hidden_size, vocab_size, num_layers = 32, 32, 64, 2
    c_in, c_mid, spatial = 4, 16, 16
    batch, seq = 2, 8

    key = jax.random.PRNGKey(0)
    kp, ki, kc = jax.random.split(key, 3)
    params = init_params(kp, c_in, c_mid, embed_size, hidden_size,
                         vocab_size, num_layers)
    prep, cfg = prepare_params(params)
    images = jax.random.normal(ki, (batch, c_in, spatial, spatial), jnp.float32)
    captions = jax.random.randint(kc, (seq, batch), 0, vocab_size, jnp.int32)

    fwd = jax.jit(functools.partial(encoder_to_decoder_forward, cfg=cfg))
    out = jax.block_until_ready(fwd(prep, images, captions))
    assert out.shape == (seq + 1, batch, vocab_size)
    assert bool(jnp.all(jnp.isfinite(out)))
    print("KERNEL_OK")
</pallas_src>

<mosaic_0001>
module attributes {stable_mosaic.version = 11 : i64} {
  func.func @_conv_gap_kernel(%arg0: i32, %arg1: memref<2x256x36xbf16, #tpu.memory_space<vmem>>, %arg2: memref<36x16xbf16, #tpu.memory_space<vmem>>, %arg3: memref<1x16xf32, #tpu.memory_space<vmem>>, %arg4: memref<2x1x16xf32, #tpu.memory_space<vmem>>) attributes {dimension_semantics = [#tpu.dimension_semantics<parallel>], iteration_bounds = array<i64: 1>, scalar_prefetch = 0 : i64, scratch_operands = 0 : i64, tpu.core_type = #tpu.core_type<tc>, window_params = [{transform_indices = @transform_0, window_bounds = array<i64: 2, 256, 36>}, {pipeline_mode = #tpu.pipeline_mode<synchronous>, transform_indices = @transform_1, window_bounds = array<i64: 36, 16>}, {pipeline_mode = #tpu.pipeline_mode<synchronous>, transform_indices = @transform_2, window_bounds = array<i64: 1, 16>}, {transform_indices = @transform_3, window_bounds = array<i64: 2, 1, 16>}]} {
    %c0 = arith.constant 0 : index
    %c0_0 = arith.constant 0 : index
    %0 = vector.load %arg2[%c0, %c0_0] : memref<36x16xbf16, #tpu.memory_space<vmem>>, vector<36x16xbf16>
    %c0_1 = arith.constant 0 : index
    %c0_2 = arith.constant 0 : index
    %1 = vector.load %arg3[%c0_1, %c0_2] : memref<1x16xf32, #tpu.memory_space<vmem>>, vector<1x16xf32>
    %c0_3 = arith.constant 0 : index
    %c0_4 = arith.constant 0 : index
    %c0_5 = arith.constant 0 : index
    %2 = vector.load %arg1[%c0_3, %c0_4, %c0_5] : memref<2x256x36xbf16, #tpu.memory_space<vmem>>, vector<1x256x36xbf16>
    %3 = vector.shape_cast %2 : vector<1x256x36xbf16> to vector<256x36xbf16>
    %cst = arith.constant dense<0.000000e+00> : vector<256x16xf32>
    %4 = tpu.matmul %3, %0, %cst {dimension_numbers = #tpu.dot_dimension_numbers<[1], [0], [0], [1], [0, 0, 1, 1], [], []>} : vector<256x36xbf16>, vector<36x16xbf16>, vector<256x16xf32> -> vector<256x16xf32>
    %5 = vector.broadcast %1 : vector<1x16xf32> to vector<256x16xf32>
    %6 = arith.addf %4, %5 : vector<256x16xf32>
    %cst_6 = arith.constant 0.000000e+00 : f32
    %7 = vector.broadcast %cst_6 : f32 to vector<256x16xf32>
    %8 = arith.maximumf %6, %7 : vector<256x16xf32>
    %cst_7 = arith.constant dense<0.000000e+00> : vector<16xf32>
    %9 = vector.multi_reduction <add>, %8, %cst_7 [0] : vector<256x16xf32> to vector<16xf32>
    %10 = vector.shape_cast %9 : vector<16xf32> to vector<1x16xf32>
    %cst_8 = arith.constant 2.560000e+02 : f32
    %11 = vector.broadcast %cst_8 : f32 to vector<1x16xf32>
    %12 = arith.divf %10, %11 : vector<1x16xf32>
    %c0_9 = arith.constant 0 : index
    %c0_10 = arith.constant 0 : index
    %c0_11 = arith.constant 0 : index
    %13 = vector.load %arg4[%c0_9, %c0_10, %c0_11] : memref<2x1x16xf32, #tpu.memory_space<vmem>>, vector<1x1x16xf32>
    %14 = vector.shape_cast %13 : vector<1x1x16xf32> to vector<1x16xf32>
    %15 = vector.shape_cast %12 : vector<1x16xf32> to vector<1x1x16xf32>
    tpu.vector_store %arg4[%c0_9, %c0_10, %c0_11], %15 {strides = array<i32>} : memref<2x1x16xf32, #tpu.memory_space<vmem>>, vector<1x1x16xf32>,
    %c1 = arith.constant 1 : index
    %c0_12 = arith.constant 0 : index
    %c0_13 = arith.constant 0 : index
    %16 = vector.load %arg1[%c1, %c0_12, %c0_13] : memref<2x256x36xbf16, #tpu.memory_space<vmem>>, vector<1x256x36xbf16>
    %17 = vector.shape_cast %16 : vector<1x256x36xbf16> to vector<256x36xbf16>
    %cst_14 = arith.constant dense<0.000000e+00> : vector<256x16xf32>
    %18 = tpu.matmul %17, %0, %cst_14 {dimension_numbers = #tpu.dot_dimension_numbers<[1], [0], [0], [1], [0, 0, 1, 1], [], []>} : vector<256x36xbf16>, vector<36x16xbf16>, vector<256x16xf32> -> vector<256x16xf32>
    %19 = vector.broadcast %1 : vector<1x16xf32> to vector<256x16xf32>
    %20 = arith.addf %18, %19 : vector<256x16xf32>
    %cst_15 = arith.constant 0.000000e+00 : f32
    %21 = vector.broadcast %cst_15 : f32 to vector<256x16xf32>
    %22 = arith.maximumf %20, %21 : vector<256x16xf32>
    %cst_16 = arith.constant dense<0.000000e+00> : vector<16xf32>
    %23 = vector.multi_reduction <add>, %22, %cst_16 [0] : vector<256x16xf32> to vector<16xf32>
    %24 = vector.shape_cast %23 : vector<16xf32> to vector<1x16xf32>
    %cst_17 = arith.constant 2.560000e+02 : f32
    %25 = vector.broadcast %cst_17 : f32 to vector<1x16xf32>
    %26 = arith.divf %24, %25 : vector<1x16xf32>
    %c1_18 = arith.constant 1 : index
    %c0_19 = arith.constant 0 : index
    %c0_20 = arith.constant 0 : index
    %27 = vector.load %arg4[%c1_18, %c0_19, %c0_20] : memref<2x1x16xf32, #tpu.memory_space<vmem>>, vector<1x1x16xf32>
    %28 = vector.shape_cast %27 : vector<1x1x16xf32> to vector<1x16xf32>
    %29 = vector.shape_cast %26 : vector<1x16xf32> to vector<1x1x16xf32>
    tpu.vector_store %arg4[%c1_18, %c0_19, %c0_20], %29 {strides = array<i32>} : memref<2x1x16xf32, #tpu.memory_space<vmem>>, vector<1x1x16xf32>,
    return
  }
  func.func @transform_0(%arg0: i32) -> (i32, i32, i32) {
    %c0_i32 = arith.constant 0 : i32
    %c0_i32_0 = arith.constant 0 : i32
    %c0_i32_1 = arith.constant 0 : i32
    return %arg0, %c0_i32, %c0_i32_0 : i32, i32, i32
  }
  func.func @transform_1(%arg0: i32) -> (i32, i32) {
    %c0_i32 = arith.constant 0 : i32
    %c0_i32_0 = arith.constant 0 : i32
    %c0_i32_1 = arith.constant 0 : i32
    return %c0_i32, %c0_i32_0 : i32, i32
  }
  func.func @transform_2(%arg0: i32) -> (i32, i32) {
    %c0_i32 = arith.constant 0 : i32
    %c0_i32_0 = arith.constant 0 : i32
    %c0_i32_1 = arith.constant 0 : i32
    return %c0_i32, %c0_i32_0 : i32, i32
  }
  func.func @transform_3(%arg0: i32) -> (i32, i32, i32) {
    %c0_i32 = arith.constant 0 : i32
    %c0_i32_0 = arith.constant 0 : i32
    %c0_i32_1 = arith.constant 0 : i32
    return %arg0, %c0_i32, %c0_i32_0 : i32, i32, i32
  }
}

module attributes {stable_mosaic.version = 11 : i64} {
  func.func @_matmul_bias_kernel(%arg0: i32, %arg1: i32, %arg2: i32, %arg3: memref<16x128xbf16, #tpu.memory_space<vmem>>, %arg4: memref<128x128xbf16, #tpu.memory_space<vmem>>, %arg5: memref<1x128xf32, #tpu.memory_space<vmem>>, %arg6: memref<16x128xbf16, #tpu.memory_space<vmem>>, %arg7: memref<16x128xf32, #tpu.memory_space<vmem>>) attributes {dimension_semantics = [#tpu.dimension_semantics<parallel>, #tpu.dimension_semantics<parallel>, #tpu.dimension_semantics<arbitrary>], iteration_bounds = array<i64: 1, 1, 1>, scalar_prefetch = 0 : i64, scratch_operands = 1 : i64, tpu.core_type = #tpu.core_type<tc>, window_params = [{transform_indices = @transform_0, window_bounds = array<i64: 16, 128>}, {transform_indices = @transform_1, window_bounds = array<i64: 128, 128>}, {transform_indices = @transform_2, window_bounds = array<i64: 1, 128>}, {transform_indices = @transform_3, window_bounds = array<i64: 16, 128>}]} {
    %c0_i32 = arith.constant 0 : i32
    %0 = arith.cmpi eq, %arg2, %c0_i32 : i32
    %1 = arith.extui %0 : i1 to i32
    %c0_i32_0 = arith.constant 0 : i32
    %2 = arith.cmpi ne, %1, %c0_i32_0 : i32
    scf.if %2 {
      %cst_10 = arith.constant 0.000000e+00 : f32
      %12 = vector.broadcast %cst_10 : f32 to vector<16x128xf32>
      %c0_11 = arith.constant 0 : index
      %c0_12 = arith.constant 0 : index
      %13 = vector.load %arg7[%c0_11, %c0_12] : memref<16x128xf32, #tpu.memory_space<vmem>>, vector<16x128xf32>
      tpu.vector_store %arg7[%c0_11, %c0_12], %12 {strides = array<i32>} : memref<16x128xf32, #tpu.memory_space<vmem>>, vector<16x128xf32>,
    } else {
    }
    %c0 = arith.constant 0 : index
    %c0_1 = arith.constant 0 : index
    %3 = vector.load %arg7[%c0, %c0_1] : memref<16x128xf32, #tpu.memory_space<vmem>>, vector<16x128xf32>
    %c0_2 = arith.constant 0 : index
    %c0_3 = arith.constant 0 : index
    %4 = vector.load %arg3[%c0_2, %c0_3] : memref<16x128xbf16, #tpu.memory_space<vmem>>, vector<16x128xbf16>
    %c0_4 = arith.constant 0 : index
    %c0_5 = arith.constant 0 : index
    %5 = vector.load %arg4[%c0_4, %c0_5] : memref<128x128xbf16, #tpu.memory_space<vmem>>, vector<128x128xbf16>
    %cst = arith.constant dense<0.000000e+00> : vector<16x128xf32>
    %6 = tpu.matmul %4, %5, %cst {dimension_numbers = #tpu.dot_dimension_numbers<[1], [0], [0], [1], [0, 0, 1, 1], [], []>} : vector<16x128xbf16>, vector<128x128xbf16>, vector<16x128xf32> -> vector<16x128xf32>
    %7 = arith.addf %3, %6 : vector<16x128xf32>
    %c0_6 = arith.constant 0 : index
    %c0_7 = arith.constant 0 : index
    %8 = vector.load %arg7[%c0_6, %c0_7] : memref<16x128xf32, #tpu.memory_space<vmem>>, vector<16x128xf32>
    tpu.vector_store %arg7[%c0_6, %c0_7], %7 {strides = array<i32>} : memref<16x128xf32, #tpu.memory_space<vmem>>, vector<16x128xf32>,
    %c0_i32_8 = arith.constant 0 : i32
    %9 = arith.cmpi eq, %arg2, %c0_i32_8 : i32
    %10 = arith.extui %9 : i1 to i32
    %c0_i32_9 = arith.constant 0 : i32
    %11 = arith.cmpi ne, %10, %c0_i32_9 : i32
    scf.if %11 {
      %c0_10 = arith.constant 0 : index
      %c0_11 = arith.constant 0 : index
      %12 = vector.load %arg7[%c0_10, %c0_11] : memref<16x128xf32, #tpu.memory_space<vmem>>, vector<16x128xf32>
      %c0_12 = arith.constant 0 : index
      %c0_13 = arith.constant 0 : index
      %13 = vector.load %arg5[%c0_12, %c0_13] : memref<1x128xf32, #tpu.memory_space<vmem>>, vector<1x128xf32>
      %14 = vector.broadcast %13 : vector<1x128xf32> to vector<16x128xf32>
      %15 = arith.addf %12, %14 : vector<16x128xf32>
      %cst_14 = arith.constant 0.000000e+00 : f32
      %16 = vector.broadcast %cst_14 : f32 to vector<16x128xf32>
      %17 = arith.maximumf %15, %16 : vector<16x128xf32>
      %18 = arith.truncf %17 : vector<16x128xf32> to vector<16x128xbf16>
      %c0_15 = arith.constant 0 : index
      %c0_16 = arith.constant 0 : index
      %19 = vector.load %arg6[%c0_15, %c0_16] : memref<16x128xbf16, #tpu.memory_space<vmem>>, vector<16x128xbf16>
      tpu.vector_store %arg6[%c0_15, %c0_16], %18 {strides = array<i32>} : memref<16x128xbf16, #tpu.memory_space<vmem>>, vector<16x128xbf16>,
    } else {
    }
    return
  }
  func.func @transform_0(%arg0: i32, %arg1: i32, %arg2: i32) -> (i32, i32) {
    %c0_i32 = arith.constant 0 : i32
    return %arg0, %arg2 : i32, i32
  }
  func.func @transform_1(%arg0: i32, %arg1: i32, %arg2: i32) -> (i32, i32) {
    %c0_i32 = arith.constant 0 : i32
    return %arg2, %arg1 : i32, i32
  }
  func.func @transform_2(%arg0: i32, %arg1: i32, %arg2: i32) -> (i32, i32) {
    %c0_i32 = arith.constant 0 : i32
    %c0_i32_0 = arith.constant 0 : i32
    return %c0_i32, %arg1 : i32, i32
  }
  func.func @transform_3(%arg0: i32, %arg1: i32, %arg2: i32) -> (i32, i32) {
    %c0_i32 = arith.constant 0 : i32
    return %arg0, %arg1 : i32, i32
  }
}

module attributes {stable_mosaic.version = 11 : i64} {
  func.func @_lstm_recurrent_kernel(%arg0: i32, %arg1: memref<9x8x512xbf16, #tpu.memory_space<vmem>>, %arg2: memref<128x512xbf16, #tpu.memory_space<vmem>>, %arg3: memref<9x8x128xbf16, #tpu.memory_space<vmem>>) attributes {dimension_semantics = [#tpu.dimension_semantics<parallel>], iteration_bounds = array<i64: 1>, scalar_prefetch = 0 : i64, scratch_operands = 0 : i64, tpu.core_type = #tpu.core_type<tc>, window_params = [{transform_indices = @transform_0, window_bounds = array<i64: 9, 8, 512>}, {pipeline_mode = #tpu.pipeline_mode<synchronous>, transform_indices = @transform_1, window_bounds = array<i64: 128, 512>}, {transform_indices = @transform_2, window_bounds = array<i64: 9, 8, 128>}]} {
    %cst = arith.constant 0.000000e+00 : f32
    %0 = vector.broadcast %cst : f32 to vector<8x128xf32>
    %cst_0 = arith.constant 0.000000e+00 : f32
    %1 = vector.broadcast %cst_0 : f32 to vector<8x128xf32>
    %c0 = arith.constant 0 : index
    %c0_1 = arith.constant 0 : index
    %2 = vector.load %arg2[%c0, %c0_1] : memref<128x512xbf16, #tpu.memory_space<vmem>>, vector<128x512xbf16>
    %c0_2 = arith.constant 0 : index
    %c0_3 = arith.constant 0 : index
    %c0_4 = arith.constant 0 : index
    %3 = vector.load %arg1[%c0_2, %c0_3, %c0_4] : memref<9x8x512xbf16, #tpu.memory_space<vmem>>, vector<1x8x512xbf16>
    %4 = vector.shape_cast %3 : vector<1x8x512xbf16> to vector<8x512xbf16>
    %5 = arith.extf %4 : vector<8x512xbf16> to vector<8x512xf32>
    %6 = arith.truncf %0 : vector<8x128xf32> to vector<8x128xbf16>
    %cst_5 = arith.constant dense<0.000000e+00> : vector<8x512xf32>
    %7 = tpu.matmul %6, %2, %cst_5 {dimension_numbers = #tpu.dot_dimension_numbers<[1], [0], [0], [1], [0, 0, 1, 1], [], []>} : vector<8x128xbf16>, vector<128x512xbf16>, vector<8x512xf32> -> vector<8x512xf32>
    %8 = arith.addf %5, %7 : vector<8x512xf32>
    %9 = vector.extract_strided_slice %8 {offsets = [0, 0], sizes = [8, 128], strides = [1, 1]} : vector<8x512xf32> to vector<8x128xf32>
    %10 = arith.negf %9 : vector<8x128xf32>
    %11 = math.exp %10 : vector<8x128xf32>
    %cst_6 = arith.constant 1.000000e+00 : f32
    %12 = vector.broadcast %cst_6 : f32 to vector<8x128xf32>
    %13 = arith.addf %12, %11 : vector<8x128xf32>
    %14 = arith.divf %12, %13 : vector<8x128xf32>
    %15 = vector.extract_strided_slice %8 {offsets = [0, 128], sizes = [8, 128], strides = [1, 1]} : vector<8x512xf32> to vector<8x128xf32>
    %16 = arith.negf %15 : vector<8x128xf32>
    %17 = math.exp %16 : vector<8x128xf32>
    %cst_7 = arith.constant 1.000000e+00 : f32
    %18 = vector.broadcast %cst_7 : f32 to vector<8x128xf32>
    %19 = arith.addf %18, %17 : vector<8x128xf32>
    %20 = arith.divf %18, %19 : vector<8x128xf32>
    %21 = vector.extract_strided_slice %8 {offsets = [0, 256], sizes = [8, 128], strides = [1, 1]} : vector<8x512xf32> to vector<8x128xf32>
    %22 = math.tanh %21 : vector<8x128xf32>
    %23 = vector.extract_strided_slice %8 {offsets = [0, 384], sizes = [8, 128], strides = [1, 1]} : vector<8x512xf32> to vector<8x128xf32>
    %24 = arith.negf %23 : vector<8x128xf32>
    %25 = math.exp %24 : vector<8x128xf32>
    %cst_8 = arith.constant 1.000000e+00 : f32
    %26 = vector.broadcast %cst_8 : f32 to vector<8x128xf32>
    %27 = arith.addf %26, %25 : vector<8x128xf32>
    %28 = arith.divf %26, %27 : vector<8x128xf32>
    %29 = arith.mulf %20, %1 : vector<8x128xf32>
    %30 = arith.mulf %14, %22 : vector<8x128xf32>
    %31 = arith.addf %29, %30 : vector<8x128xf32>
    %32 = math.tanh %31 : vector<8x128xf32>
    %33 = arith.mulf %28, %32 : vector<8x128xf32>
    %34 = arith.truncf %33 : vector<8x128xf32> to vector<8x128xbf16>
    %c0_9 = arith.constant 0 : index
    %c0_10 = arith.constant 0 : index
    %c0_11 = arith.constant 0 : index
    %35 = vector.load %arg3[%c0_9, %c0_10, %c0_11] : memref<9x8x128xbf16, #tpu.memory_space<vmem>>, vector<1x8x128xbf16>
    %36 = vector.shape_cast %35 : vector<1x8x128xbf16> to vector<8x128xbf16>
    %37 = vector.shape_cast %34 : vector<8x128xbf16> to vector<1x8x128xbf16>
    tpu.vector_store %arg3[%c0_9, %c0_10, %c0_11], %37 {strides = array<i32>} : memref<9x8x128xbf16, #tpu.memory_space<vmem>>, vector<1x8x128xbf16>,
    %c1 = arith.constant 1 : index
    %c0_12 = arith.constant 0 : index
    %c0_13 = arith.constant 0 : index
    %38 = vector.load %arg1[%c1, %c0_12, %c0_13] : memref<9x8x512xbf16, #tpu.memory_space<vmem>>, vector<1x8x512xbf16>
    %39 = vector.shape_cast %38 : vector<1x8x512xbf16> to vector<8x512xbf16>
    %40 = arith.extf %39 : vector<8x512xbf16> to vector<8x512xf32>
    %41 = arith.truncf %33 : vector<8x128xf32> to vector<8x128xbf16>
    %cst_14 = arith.constant dense<0.000000e+00> : vector<8x512xf32>
    %42 = tpu.matmul %41, %2, %cst_14 {dimension_numbers = #tpu.dot_dimension_numbers<[1], [0], [0], [1], [0, 0, 1, 1], [], []>} : vector<8x128xbf16>, vector<128x512xbf16>, vector<8x512xf32> -> vector<8x512xf32>
    %43 = arith.addf %40, %42 : vector<8x512xf32>
    %44 = vector.extract_strided_slice %43 {offsets = [0, 0], sizes = [8, 128], strides = [1, 1]} : vector<8x512xf32> to vector<8x128xf32>
    %45 = arith.negf %44 : vector<8x128xf32>
    %46 = math.exp %45 : vector<8x128xf32>
    %cst_15 = arith.constant 1.000000e+00 : f32
    %47 = vector.broadcast %cst_15 : f32 to vector<8x128xf32>
    %48 = arith.addf %47, %46 : vector<8x128xf32>
    %49 = arith.divf %47, %48 : vector<8x128xf32>
    %50 = vector.extract_strided_slice %43 {offsets = [0, 128], sizes = [8, 128], strides = [1, 1]} : vector<8x512xf32> to vector<8x128xf32>
    %51 = arith.negf %50 : vector<8x128xf32>
    %52 = math.exp %51 : vector<8x128xf32>
    %cst_16 = arith.constant 1.000000e+00 : f32
    %53 = vector.broadcast %cst_16 : f32 to vector<8x128xf32>
    %54 = arith.addf %53, %52 : vector<8x128xf32>
    %55 = arith.divf %53, %54 : vector<8x128xf32>
    %56 = vector.extract_strided_slice %43 {offsets = [0, 256], sizes = [8, 128], strides = [1, 1]} : vector<8x512xf32> to vector<8x128xf32>
    %57 = math.tanh %56 : vector<8x128xf32>
    %58 = vector.extract_strided_slice %43 {offsets = [0, 384], sizes = [8, 128], strides = [1, 1]} : vector<8x512xf32> to vector<8x128xf32>
    %59 = arith.negf %58 : vector<8x128xf32>
    %60 = math.exp %59 : vector<8x128xf32>
    %cst_17 = arith.constant 1.000000e+00 : f32
    %61 = vector.broadcast %cst_17 : f32 to vector<8x128xf32>
    %62 = arith.addf %61, %60 : vector<8x128xf32>
    %63 = arith.divf %61, %62 : vector<8x128xf32>
    %64 = arith.mulf %55, %31 : vector<8x128xf32>
    %65 = arith.mulf %49, %57 : vector<8x128xf32>
    %66 = arith.addf %64, %65 : vector<8x128xf32>
    %67 = math.tanh %66 : vector<8x128xf32>
    %68 = arith.mulf %63, %67 : vector<8x128xf32>
    %69 = arith.truncf %68 : vector<8x128xf32> to vector<8x128xbf16>
    %c1_18 = arith.constant 1 : index
    %c0_19 = arith.constant 0 : index
    %c0_20 = arith.constant 0 : index
    %70 = vector.load %arg3[%c1_18, %c0_19, %c0_20] : memref<9x8x128xbf16, #tpu.memory_space<vmem>>, vector<1x8x128xbf16>
    %71 = vector.shape_cast %70 : vector<1x8x128xbf16> to vector<8x128xbf16>
    %72 = vector.shape_cast %69 : vector<8x128xbf16> to vector<1x8x128xbf16>
    tpu.vector_store %arg3[%c1_18, %c0_19, %c0_20], %72 {strides = array<i32>} : memref<9x8x128xbf16, #tpu.memory_space<vmem>>, vector<1x8x128xbf16>,
    %c2 = arith.constant 2 : index
    %c0_21 = arith.constant 0 : index
    %c0_22 = arith.constant 0 : index
    %73 = vector.load %arg1[%c2, %c0_21, %c0_22] : memref<9x8x512xbf16, #tpu.memory_space<vmem>>, vector<1x8x512xbf16>
    %74 = vector.shape_cast %73 : vector<1x8x512xbf16> to vector<8x512xbf16>
    %75 = arith.extf %74 : vector<8x512xbf16> to vector<8x512xf32>
    %76 = arith.truncf %68 : vector<8x128xf32> to vector<8x128xbf16>
    %cst_23 = arith.constant dense<0.000000e+00> : vector<8x512xf32>
    %77 = tpu.matmul %76, %2, %cst_23 {dimension_numbers = #tpu.dot_dimension_numbers<[1], [0], [0], [1], [0, 0, 1, 1], [], []>} : vector<8x128xbf16>, vector<128x512xbf16>, vector<8x512xf32> -> vector<8x512xf32>
    %78 = arith.addf %75, %77 : vector<8x512xf32>
    %79 = vector.extract_strided_slice %78 {offsets = [0, 0], sizes = [8, 128], strides = [1, 1]} : vector<8x512xf32> to vector<8x128xf32>
    %80 = arith.negf %79 : vector<8x128xf32>
    %81 = math.exp %80 : vector<8x128xf32>
    %cst_24 = arith.constant 1.000000e+00 : f32
    %82 = vector.broadcast %cst_24 : f32 to vector<8x128xf32>
    %83 = arith.addf %82, %81 : vector<8x128xf32>
    %84 = arith.divf %82, %83 : vector<8x128xf32>
    %85 = vector.extract_strided_slice %78 {offsets = [0, 128], sizes = [8, 128], strides = [1, 1]} : vector<8x512xf32> to vector<8x128xf32>
    %86 = arith.negf %85 : vector<8x128xf32>
    %87 = math.exp %86 : vector<8x128xf32>
    %cst_25 = arith.constant 1.000000e+00 : f32
    %88 = vector.broadcast %cst_25 : f32 to vector<8x128xf32>
    %89 = arith.addf %88, %87 : vector<8x128xf32>
    %90 = arith.divf %88, %89 : vector<8x128xf32>
    %91 = vector.extract_strided_slice %78 {offsets = [0, 256], sizes = [8, 128], strides = [1, 1]} : vector<8x512xf32> to vector<8x128xf32>
    %92 = math.tanh %91 : vector<8x128xf32>
    %93 = vector.extract_strided_slice %78 {offsets = [0, 384], sizes = [8, 128], strides = [1, 1]} : vector<8x512xf32> to vector<8x128xf32>
    %94 = arith.negf %93 : vector<8x128xf32>
    %95 = math.exp %94 : vector<8x128xf32>
    %cst_26 = arith.constant 1.000000e+00 : f32
    %96 = vector.broadcast %cst_26 : f32 to vector<8x128xf32>
    %97 = arith.addf %96, %95 : vector<8x128xf32>
    %98 = arith.divf %96, %97 : vector<8x128xf32>
    %99 = arith.mulf %90, %66 : vector<8x128xf32>
    %100 = arith.mulf %84, %92 : vector<8x128xf32>
    %101 = arith.addf %99, %100 : vector<8x128xf32>
    %102 = math.tanh %101 : vector<8x128xf32>
    %103 = arith.mulf %98, %102 : vector<8x128xf32>
    %104 = arith.truncf %103 : vector<8x128xf32> to vector<8x128xbf16>
    %c2_27 = arith.constant 2 : index
    %c0_28 = arith.constant 0 : index
    %c0_29 = arith.constant 0 : index
    %105 = vector.load %arg3[%c2_27, %c0_28, %c0_29] : memref<9x8x128xbf16, #tpu.memory_space<vmem>>, vector<1x8x128xbf16>
    %106 = vector.shape_cast %105 : vector<1x8x128xbf16> to vector<8x128xbf16>
    %107 = vector.shape_cast %104 : vector<8x128xbf16> to vector<1x8x128xbf16>
    tpu.vector_store %arg3[%c2_27, %c0_28, %c0_29], %107 {strides = array<i32>} : memref<9x8x128xbf16, #tpu.memory_space<vmem>>, vector<1x8x128xbf16>,
    %c3 = arith.constant 3 : index
    %c0_30 = arith.constant 0 : index
    %c0_31 = arith.constant 0 : index
    %108 = vector.load %arg1[%c3, %c0_30, %c0_31] : memref<9x8x512xbf16, #tpu.memory_space<vmem>>, vector<1x8x512xbf16>
    %109 = vector.shape_cast %108 : vector<1x8x512xbf16> to vector<8x512xbf16>
    %110 = arith.extf %109 : vector<8x512xbf16> to vector<8x512xf32>
    %111 = arith.truncf %103 : vector<8x128xf32> to vector<8x128xbf16>
    %cst_32 = arith.constant dense<0.000000e+00> : vector<8x512xf32>
    %112 = tpu.matmul %111, %2, %cst_32 {dimension_numbers = #tpu.dot_dimension_numbers<[1], [0], [0], [1], [0, 0, 1, 1], [], []>} : vector<8x128xbf16>, vector<128x512xbf16>, vector<8x512xf32> -> vector<8x512xf32>
    %113 = arith.addf %110, %112 : vector<8x512xf32>
    %114 = vector.extract_strided_slice %113 {offsets = [0, 0], sizes = [8, 128], strides = [1, 1]} : vector<8x512xf32> to vector<8x128xf32>
    %115 = arith.negf %114 : vector<8x128xf32>
    %116 = math.exp %115 : vector<8x128xf32>
    %cst_33 = arith.constant 1.000000e+00 : f32
    %117 = vector.broadcast %cst_33 : f32 to vector<8x128xf32>
    %118 = arith.addf %117, %116 : vector<8x128xf32>
    %119 = arith.divf %117, %118 : vector<8x128xf32>
    %120 = vector.extract_strided_slice %113 {offsets = [0, 128], sizes = [8, 128], strides = [1, 1]} : vector<8x512xf32> to vector<8x128xf32>
    %121 = arith.negf %120 : vector<8x128xf32>
    %122 = math.exp %121 : vector<8x128xf32>
    %cst_34 = arith.constant 1.000000e+00 : f32
    %123 = vector.broadcast %cst_34 : f32 to vector<8x128xf32>
    %124 = arith.addf %123, %122 : vector<8x128xf32>
    %125 = arith.divf %123, %124 : vector<8x128xf32>
    %126 = vector.extract_strided_slice %113 {offsets = [0, 256], sizes = [8, 128], strides = [1, 1]} : vector<8x512xf32> to vector<8x128xf32>
    %127 = math.tanh %126 : vector<8x128xf32>
    %128 = vector.extract_strided_slice %113 {offsets = [0, 384], sizes = [8, 128], strides = [1, 1]} : vector<8x512xf32> to vector<8x128xf32>
    %129 = arith.negf %128 : vector<8x128xf32>
    %130 = math.exp %129 : vector<8x128xf32>
    %cst_35 = arith.constant 1.000000e+00 : f32
    %131 = vector.broadcast %cst_35 : f32 to vector<8x128xf32>
    %132 = arith.addf %131, %130 : vector<8x128xf32>
    %133 = arith.divf %131, %132 : vector<8x128xf32>
    %134 = arith.mulf %125, %101 : vector<8x128xf32>
    %135 = arith.mulf %119, %127 : vector<8x128xf32>
    %136 = arith.addf %134, %135 : vector<8x128xf32>
    %137 = math.tanh %136 : vector<8x128xf32>
    %138 = arith.mulf %133, %137 : vector<8x128xf32>
    %139 = arith.truncf %138 : vector<8x128xf32> to vector<8x128xbf16>
    %c3_36 = arith.constant 3 : index
    %c0_37 = arith.constant 0 : index
    %c0_38 = arith.constant 0 : index
    %140 = vector.load %arg3[%c3_36, %c0_37, %c0_38] : memref<9x8x128xbf16, #tpu.memory_space<vmem>>, vector<1x8x128xbf16>
    %141 = vector.shape_cast %140 : vector<1x8x128xbf16> to vector<8x128xbf16>
    %142 = vector.shape_cast %139 : vector<8x128xbf16> to vector<1x8x128xbf16>
    tpu.vector_store %arg3[%c3_36, %c0_37, %c0_38], %142 {strides = array<i32>} : memref<9x8x128xbf16, #tpu.memory_space<vmem>>, vector<1x8x128xbf16>,
    %c4 = arith.constant 4 : index
    %c0_39 = arith.constant 0 : index
    %c0_40 = arith.constant 0 : index
    %143 = vector.load %arg1[%c4, %c0_39, %c0_40] : memref<9x8x512xbf16, #tpu.memory_space<vmem>>, vector<1x8x512xbf16>
    %144 = vector.shape_cast %143 : vector<1x8x512xbf16> to vector<8x512xbf16>
    %145 = arith.extf %144 : vector<8x512xbf16> to vector<8x512xf32>
    %146 = arith.truncf %138 : vector<8x128xf32> to vector<8x128xbf16>
    %cst_41 = arith.constant dense<0.000000e+00> : vector<8x512xf32>
    %147 = tpu.matmul %146, %2, %cst_41 {dimension_numbers = #tpu.dot_dimension_numbers<[1], [0], [0], [1], [0, 0, 1, 1], [], []>} : vector<8x128xbf16>, vector<128x512xbf16>, vector<8x512xf32> -> vector<8x512xf32>
    %148 = arith.addf %145, %147 : vector<8x512xf32>
    %149 = vector.extract_strided_slice %148 {offsets = [0, 0], sizes = [8, 128], strides = [1, 1]} : vector<8x512xf32> to vector<8x128xf32>
    %150 = arith.negf %149 : vector<8x128xf32>
    %151 = math.exp %150 : vector<8x128xf32>
    %cst_42 = arith.constant 1.000000e+00 : f32
    %152 = vector.broadcast %cst_42 : f32 to vector<8x128xf32>
    %153 = arith.addf %152, %151 : vector<8x128xf32>
    %154 = arith.divf %152, %153 : vector<8x128xf32>
    %155 = vector.extract_strided_slice %148 {offsets = [0, 128], sizes = [8, 128], strides = [1, 1]} : vector<8x512xf32> to vector<8x128xf32>
    %156 = arith.negf %155 : vector<8x128xf32>
    %157 = math.exp %156 : vector<8x128xf32>
    %cst_43 = arith.constant 1.000000e+00 : f32
    %158 = vector.broadcast %cst_43 : f32 to vector<8x128xf32>
    %159 = arith.addf %158, %157 : vector<8x128xf32>
    %160 = arith.divf %158, %159 : vector<8x128xf32>
    %161 = vector.extract_strided_slice %148 {offsets = [0, 256], sizes = [8, 128], strides = [1, 1]} : vector<8x512xf32> to vector<8x128xf32>
    %162 = math.tanh %161 : vector<8x128xf32>
    %163 = vector.extract_strided_slice %148 {offsets = [0, 384], sizes = [8, 128], strides = [1, 1]} : vector<8x512xf32> to vector<8x128xf32>
    %164 = arith.negf %163 : vector<8x128xf32>
    %165 = math.exp %164 : vector<8x128xf32>
    %cst_44 = arith.constant 1.000000e+00 : f32
    %166 = vector.broadcast %cst_44 : f32 to vector<8x128xf32>
    %167 = arith.addf %166, %165 : vector<8x128xf32>
    %168 = arith.divf %166, %167 : vector<8x128xf32>
    %169 = arith.mulf %160, %136 : vector<8x128xf32>
    %170 = arith.mulf %154, %162 : vector<8x128xf32>
    %171 = arith.addf %169, %170 : vector<8x128xf32>
    %172 = math.tanh %171 : vector<8x128xf32>
    %173 = arith.mulf %168, %172 : vector<8x128xf32>
    %174 = arith.truncf %173 : vector<8x128xf32> to vector<8x128xbf16>
    %c4_45 = arith.constant 4 : index
    %c0_46 = arith.constant 0 : index
    %c0_47 = arith.constant 0 : index
    %175 = vector.load %arg3[%c4_45, %c0_46, %c0_47] : memref<9x8x128xbf16, #tpu.memory_space<vmem>>, vector<1x8x128xbf16>
    %176 = vector.shape_cast %175 : vector<1x8x128xbf16> to vector<8x128xbf16>
    %177 = vector.shape_cast %174 : vector<8x128xbf16> to vector<1x8x128xbf16>
    tpu.vector_store %arg3[%c4_45, %c0_46, %c0_47], %177 {strides = array<i32>} : memref<9x8x128xbf16, #tpu.memory_space<vmem>>, vector<1x8x128xbf16>,
    %c5 = arith.constant 5 : index
    %c0_48 = arith.constant 0 : index
    %c0_49 = arith.constant 0 : index
    %178 = vector.load %arg1[%c5, %c0_48, %c0_49] : memref<9x8x512xbf16, #tpu.memory_space<vmem>>, vector<1x8x512xbf16>
    %179 = vector.shape_cast %178 : vector<1x8x512xbf16> to vector<8x512xbf16>
    %180 = arith.extf %179 : vector<8x512xbf16> to vector<8x512xf32>
    %181 = arith.truncf %173 : vector<8x128xf32> to vector<8x128xbf16>
    %cst_50 = arith.constant dense<0.000000e+00> : vector<8x512xf32>
    %182 = tpu.matmul %181, %2, %cst_50 {dimension_numbers = #tpu.dot_dimension_numbers<[1], [0], [0], [1], [0, 0, 1, 1], [], []>} : vector<8x128xbf16>, vector<128x512xbf16>, vector<8x512xf32> -> vector<8x512xf32>
    %183 = arith.addf %180, %182 : vector<8x512xf32>
    %184 = vector.extract_strided_slice %183 {offsets = [0, 0], sizes = [8, 128], strides = [1, 1]} : vector<8x512xf32> to vector<8x128xf32>
    %185 = arith.negf %184 : vector<8x128xf32>
    %186 = math.exp %185 : vector<8x128xf32>
    %cst_51 = arith.constant 1.000000e+00 : f32
    %187 = vector.broadcast %cst_51 : f32 to vector<8x128xf32>
    %188 = arith.addf %187, %186 : vector<8x128xf32>
    %189 = arith.divf %187, %188 : vector<8x128xf32>
    %190 = vector.extract_strided_slice %183 {offsets = [0, 128], sizes = [8, 128], strides = [1, 1]} : vector<8x512xf32> to vector<8x128xf32>
    %191 = arith.negf %190 : vector<8x128xf32>
    %192 = math.exp %191 : vector<8x128xf32>
    %cst_52 = arith.constant 1.000000e+00 : f32
    %193 = vector.broadcast %cst_52 : f32 to vector<8x128xf32>
    %194 = arith.addf %193, %192 : vector<8x128xf32>
    %195 = arith.divf %193, %194 : vector<8x128xf32>
    %196 = vector.extract_strided_slice %183 {offsets = [0, 256], sizes = [8, 128], strides = [1, 1]} : vector<8x512xf32> to vector<8x128xf32>
    %197 = math.tanh %196 : vector<8x128xf32>
    %198 = vector.extract_strided_slice %183 {offsets = [0, 384], sizes = [8, 128], strides = [1, 1]} : vector<8x512xf32> to vector<8x128xf32>
    %199 = arith.negf %198 : vector<8x128xf32>
    %200 = math.exp %199 : vector<8x128xf32>
    %cst_53 = arith.constant 1.000000e+00 : f32
    %201 = vector.broadcast %cst_53 : f32 to vector<8x128xf32>
    %202 = arith.addf %201, %200 : vector<8x128xf32>
    %203 = arith.divf %201, %202 : vector<8x128xf32>
    %204 = arith.mulf %195, %171 : vector<8x128xf32>
    %205 = arith.mulf %189, %197 : vector<8x128xf32>
    %206 = arith.addf %204, %205 : vector<8x128xf32>
    %207 = math.tanh %206 : vector<8x128xf32>
    %208 = arith.mulf %203, %207 : vector<8x128xf32>
    %209 = arith.truncf %208 : vector<8x128xf32> to vector<8x128xbf16>
    %c5_54 = arith.constant 5 : index
    %c0_55 = arith.constant 0 : index
    %c0_56 = arith.constant 0 : index
    %210 = vector.load %arg3[%c5_54, %c0_55, %c0_56] : memref<9x8x128xbf16, #tpu.memory_space<vmem>>, vector<1x8x128xbf16>
    %211 = vector.shape_cast %210 : vector<1x8x128xbf16> to vector<8x128xbf16>
    %212 = vector.shape_cast %209 : vector<8x128xbf16> to vector<1x8x128xbf16>
    tpu.vector_store %arg3[%c5_54, %c0_55, %c0_56], %212 {strides = array<i32>} : memref<9x8x128xbf16, #tpu.memory_space<vmem>>, vector<1x8x128xbf16>,
    %c6 = arith.constant 6 : index
    %c0_57 = arith.constant 0 : index
    %c0_58 = arith.constant 0 : index
    %213 = vector.load %arg1[%c6, %c0_57, %c0_58] : memref<9x8x512xbf16, #tpu.memory_space<vmem>>, vector<1x8x512xbf16>
    %214 = vector.shape_cast %213 : vector<1x8x512xbf16> to vector<8x512xbf16>
    %215 = arith.extf %214 : vector<8x512xbf16> to vector<8x512xf32>
    %216 = arith.truncf %208 : vector<8x128xf32> to vector<8x128xbf16>
    %cst_59 = arith.constant dense<0.000000e+00> : vector<8x512xf32>
    %217 = tpu.matmul %216, %2, %cst_59 {dimension_numbers = #tpu.dot_dimension_numbers<[1], [0], [0], [1], [0, 0, 1, 1], [], []>} : vector<8x128xbf16>, vector<128x512xbf16>, vector<8x512xf32> -> vector<8x512xf32>
    %218 = arith.addf %215, %217 : vector<8x512xf32>
    %219 = vector.extract_strided_slice %218 {offsets = [0, 0], sizes = [8, 128], strides = [1, 1]} : vector<8x512xf32> to vector<8x128xf32>
    %220 = arith.negf %219 : vector<8x128xf32>
    %221 = math.exp %220 : vector<8x128xf32>
    %cst_60 = arith.constant 1.000000e+00 : f32
    %222 = vector.broadcast %cst_60 : f32 to vector<8x128xf32>
    %223 = arith.addf %222, %221 : vector<8x128xf32>
    %224 = arith.divf %222, %223 : vector<8x128xf32>
    %225 = vector.extract_strided_slice %218 {offsets = [0, 128], sizes = [8, 128], strides = [1, 1]} : vector<8x512xf32> to vector<8x128xf32>
    %226 = arith.negf %225 : vector<8x128xf32>
    %227 = math.exp %226 : vector<8x128xf32>
    %cst_61 = arith.constant 1.000000e+00 : f32
    %228 = vector.broadcast %cst_61 : f32 to vector<8x128xf32>
    %229 = arith.addf %228, %227 : vector<8x128xf32>
    %230 = arith.divf %228, %229 : vector<8x128xf32>
    %231 = vector.extract_strided_slice %218 {offsets = [0, 256], sizes = [8, 128], strides = [1, 1]} : vector<8x512xf32> to vector<8x128xf32>
    %232 = math.tanh %231 : vector<8x128xf32>
    %233 = vector.extract_strided_slice %218 {offsets = [0, 384], sizes = [8, 128], strides = [1, 1]} : vector<8x512xf32> to vector<8x128xf32>
    %234 = arith.negf %233 : vector<8x128xf32>
    %235 = math.exp %234 : vector<8x128xf32>
    %cst_62 = arith.constant 1.000000e+00 : f32
    %236 = vector.broadcast %cst_62 : f32 to vector<8x128xf32>
    %237 = arith.addf %236, %235 : vector<8x128xf32>
    %238 = arith.divf %236, %237 : vector<8x128xf32>
    %239 = arith.mulf %230, %206 : vector<8x128xf32>
    %240 = arith.mulf %224, %232 : vector<8x128xf32>
    %241 = arith.addf %239, %240 : vector<8x128xf32>
    %242 = math.tanh %241 : vector<8x128xf32>
    %243 = arith.mulf %238, %242 : vector<8x128xf32>
    %244 = arith.truncf %243 : vector<8x128xf32> to vector<8x128xbf16>
    %c6_63 = arith.constant 6 : index
    %c0_64 = arith.constant 0 : index
    %c0_65 = arith.constant 0 : index
    %245 = vector.load %arg3[%c6_63, %c0_64, %c0_65] : memref<9x8x128xbf16, #tpu.memory_space<vmem>>, vector<1x8x128xbf16>
    %246 = vector.shape_cast %245 : vector<1x8x128xbf16> to vector<8x128xbf16>
    %247 = vector.shape_cast %244 : vector<8x128xbf16> to vector<1x8x128xbf16>
    tpu.vector_store %arg3[%c6_63, %c0_64, %c0_65], %247 {strides = array<i32>} : memref<9x8x128xbf16, #tpu.memory_space<vmem>>, vector<1x8x128xbf16>,
    %c7 = arith.constant 7 : index
    %c0_66 = arith.constant 0 : index
    %c0_67 = arith.constant 0 : index
    %248 = vector.load %arg1[%c7, %c0_66, %c0_67] : memref<9x8x512xbf16, #tpu.memory_space<vmem>>, vector<1x8x512xbf16>
    %249 = vector.shape_cast %248 : vector<1x8x512xbf16> to vector<8x512xbf16>
    %250 = arith.extf %249 : vector<8x512xbf16> to vector<8x512xf32>
    %251 = arith.truncf %243 : vector<8x128xf32> to vector<8x128xbf16>
    %cst_68 = arith.constant dense<0.000000e+00> : vector<8x512xf32>
    %252 = tpu.matmul %251, %2, %cst_68 {dimension_numbers = #tpu.dot_dimension_numbers<[1], [0], [0], [1], [0, 0, 1, 1], [], []>} : vector<8x128xbf16>, vector<128x512xbf16>, vector<8x512xf32> -> vector<8x512xf32>
    %253 = arith.addf %250, %252 : vector<8x512xf32>
    %254 = vector.extract_strided_slice %253 {offsets = [0, 0], sizes = [8, 128], strides = [1, 1]} : vector<8x512xf32> to vector<8x128xf32>
    %255 = arith.negf %254 : vector<8x128xf32>
    %256 = math.exp %255 : vector<8x128xf32>
    %cst_69 = arith.constant 1.000000e+00 : f32
    %257 = vector.broadcast %cst_69 : f32 to vector<8x128xf32>
    %258 = arith.addf %257, %256 : vector<8x128xf32>
    %259 = arith.divf %257, %258 : vector<8x128xf32>
    %260 = vector.extract_strided_slice %253 {offsets = [0, 128], sizes = [8, 128], strides = [1, 1]} : vector<8x512xf32> to vector<8x128xf32>
    %261 = arith.negf %260 : vector<8x128xf32>
    %262 = math.exp %261 : vector<8x128xf32>
    %cst_70 = arith.constant 1.000000e+00 : f32
    %263 = vector.broadcast %cst_70 : f32 to vector<8x128xf32>
    %264 = arith.addf %263, %262 : vector<8x128xf32>
    %265 = arith.divf %263, %264 : vector<8x128xf32>
    %266 = vector.extract_strided_slice %253 {offsets = [0, 256], sizes = [8, 128], strides = [1, 1]} : vector<8x512xf32> to vector<8x128xf32>
    %267 = math.tanh %266 : vector<8x128xf32>
    %268 = vector.extract_strided_slice %253 {offsets = [0, 384], sizes = [8, 128], strides = [1, 1]} : vector<8x512xf32> to vector<8x128xf32>
    %269 = arith.negf %268 : vector<8x128xf32>
    %270 = math.exp %269 : vector<8x128xf32>
    %cst_71 = arith.constant 1.000000e+00 : f32
    %271 = vector.broadcast %cst_71 : f32 to vector<8x128xf32>
    %272 = arith.addf %271, %270 : vector<8x128xf32>
    %273 = arith.divf %271, %272 : vector<8x128xf32>
    %274 = arith.mulf %265, %241 : vector<8x128xf32>
    %275 = arith.mulf %259, %267 : vector<8x128xf32>
    %276 = arith.addf %274, %275 : vector<8x128xf32>
    %277 = math.tanh %276 : vector<8x128xf32>
    %278 = arith.mulf %273, %277 : vector<8x128xf32>
    %279 = arith.truncf %278 : vector<8x128xf32> to vector<8x128xbf16>
    %c7_72 = arith.constant 7 : index
    %c0_73 = arith.constant 0 : index
    %c0_74 = arith.constant 0 : index
    %280 = vector.load %arg3[%c7_72, %c0_73, %c0_74] : memref<9x8x128xbf16, #tpu.memory_space<vmem>>, vector<1x8x128xbf16>
    %281 = vector.shape_cast %280 : vector<1x8x128xbf16> to vector<8x128xbf16>
    %282 = vector.shape_cast %279 : vector<8x128xbf16> to vector<1x8x128xbf16>
    tpu.vector_store %arg3[%c7_72, %c0_73, %c0_74], %282 {strides = array<i32>} : memref<9x8x128xbf16, #tpu.memory_space<vmem>>, vector<1x8x128xbf16>,
    %c8 = arith.constant 8 : index
    %c0_75 = arith.constant 0 : index
    %c0_76 = arith.constant 0 : index
    %283 = vector.load %arg1[%c8, %c0_75, %c0_76] : memref<9x8x512xbf16, #tpu.memory_space<vmem>>, vector<1x8x512xbf16>
    %284 = vector.shape_cast %283 : vector<1x8x512xbf16> to vector<8x512xbf16>
    %285 = arith.extf %284 : vector<8x512xbf16> to vector<8x512xf32>
    %286 = arith.truncf %278 : vector<8x128xf32> to vector<8x128xbf16>
    %cst_77 = arith.constant dense<0.000000e+00> : vector<8x512xf32>
    %287 = tpu.matmul %286, %2, %cst_77 {dimension_numbers = #tpu.dot_dimension_numbers<[1], [0], [0], [1], [0, 0, 1, 1], [], []>} : vector<8x128xbf16>, vector<128x512xbf16>, vector<8x512xf32> -> vector<8x512xf32>
    %288 = arith.addf %285, %287 : vector<8x512xf32>
    %289 = vector.extract_strided_slice %288 {offsets = [0, 0], sizes = [8, 128], strides = [1, 1]} : vector<8x512xf32> to vector<8x128xf32>
    %290 = arith.negf %289 : vector<8x128xf32>
    %291 = math.exp %290 : vector<8x128xf32>
    %cst_78 = arith.constant 1.000000e+00 : f32
    %292 = vector.broadcast %cst_78 : f32 to vector<8x128xf32>
    %293 = arith.addf %292, %291 : vector<8x128xf32>
    %294 = arith.divf %292, %293 : vector<8x128xf32>
    %295 = vector.extract_strided_slice %288 {offsets = [0, 128], sizes = [8, 128], strides = [1, 1]} : vector<8x512xf32> to vector<8x128xf32>
    %296 = arith.negf %295 : vector<8x128xf32>
    %297 = math.exp %296 : vector<8x128xf32>
    %cst_79 = arith.constant 1.000000e+00 : f32
    %298 = vector.broadcast %cst_79 : f32 to vector<8x128xf32>
    %299 = arith.addf %298, %297 : vector<8x128xf32>
    %300 = arith.divf %298, %299 : vector<8x128xf32>
    %301 = vector.extract_strided_slice %288 {offsets = [0, 256], sizes = [8, 128], strides = [1, 1]} : vector<8x512xf32> to vector<8x128xf32>
    %302 = math.tanh %301 : vector<8x128xf32>
    %303 = vector.extract_strided_slice %288 {offsets = [0, 384], sizes = [8, 128], strides = [1, 1]} : vector<8x512xf32> to vector<8x128xf32>
    %304 = arith.negf %303 : vector<8x128xf32>
    %305 = math.exp %304 : vector<8x128xf32>
    %cst_80 = arith.constant 1.000000e+00 : f32
    %306 = vector.broadcast %cst_80 : f32 to vector<8x128xf32>
    %307 = arith.addf %306, %305 : vector<8x128xf32>
    %308 = arith.divf %306, %307 : vector<8x128xf32>
    %309 = arith.mulf %300, %276 : vector<8x128xf32>
    %310 = arith.mulf %294, %302 : vector<8x128xf32>
    %311 = arith.addf %309, %310 : vector<8x128xf32>
    %312 = math.tanh %311 : vector<8x128xf32>
    %313 = arith.mulf %308, %312 : vector<8x128xf32>
    %314 = arith.truncf %313 : vector<8x128xf32> to vector<8x128xbf16>
    %c8_81 = arith.constant 8 : index
    %c0_82 = arith.constant 0 : index
    %c0_83 = arith.constant 0 : index
    %315 = vector.load %arg3[%c8_81, %c0_82, %c0_83] : memref<9x8x128xbf16, #tpu.memory_space<vmem>>, vector<1x8x128xbf16>
    %316 = vector.shape_cast %315 : vector<1x8x128xbf16> to vector<8x128xbf16>
    %317 = vector.shape_cast %314 : vector<8x128xbf16> to vector<1x8x128xbf16>
    tpu.vector_store %arg3[%c8_81, %c0_82, %c0_83], %317 {strides = array<i32>} : memref<9x8x128xbf16, #tpu.memory_space<vmem>>, vector<1x8x128xbf16>,
    return
  }
  func.func @transform_0(%arg0: i32) -> (i32, i32, i32) {
    %c0_i32 = arith.constant 0 : i32
    %c0_i32_0 = arith.constant 0 : i32
    %c0_i32_1 = arith.constant 0 : i32
    return %c0_i32, %arg0, %c0_i32_0 : i32, i32, i32
  }
  func.func @transform_1(%arg0: i32) -> (i32, i32) {
    %c0_i32 = arith.constant 0 : i32
    %c0_i32_0 = arith.constant 0 : i32
    %c0_i32_1 = arith.constant 0 : i32
    return %c0_i32, %c0_i32_0 : i32, i32
  }
  func.func @transform_2(%arg0: i32) -> (i32, i32, i32) {
    %c0_i32 = arith.constant 0 : i32
    %c0_i32_0 = arith.constant 0 : i32
    %c0_i32_1 = arith.constant 0 : i32
    return %c0_i32, %arg0, %c0_i32_0 : i32, i32, i32
  }
}

module attributes {stable_mosaic.version = 11 : i64} {
  func.func @_matmul_bias_kernel(%arg0: i32, %arg1: i32, %arg2: i32, %arg3: memref<80x128xbf16, #tpu.memory_space<vmem>>, %arg4: memref<128x512xbf16, #tpu.memory_space<vmem>>, %arg5: memref<1x512xf32, #tpu.memory_space<vmem>>, %arg6: memref<80x512xbf16, #tpu.memory_space<vmem>>, %arg7: memref<80x512xf32, #tpu.memory_space<vmem>>) attributes {dimension_semantics = [#tpu.dimension_semantics<parallel>, #tpu.dimension_semantics<parallel>, #tpu.dimension_semantics<arbitrary>], iteration_bounds = array<i64: 1, 1, 1>, scalar_prefetch = 0 : i64, scratch_operands = 1 : i64, tpu.core_type = #tpu.core_type<tc>, window_params = [{transform_indices = @transform_0, window_bounds = array<i64: 80, 128>}, {transform_indices = @transform_1, window_bounds = array<i64: 128, 512>}, {transform_indices = @transform_2, window_bounds = array<i64: 1, 512>}, {transform_indices = @transform_3, window_bounds = array<i64: 80, 512>}]} {
    %c0_i32 = arith.constant 0 : i32
    %0 = arith.cmpi eq, %arg2, %c0_i32 : i32
    %1 = arith.extui %0 : i1 to i32
    %c0_i32_0 = arith.constant 0 : i32
    %2 = arith.cmpi ne, %1, %c0_i32_0 : i32
    scf.if %2 {
      %cst_10 = arith.constant 0.000000e+00 : f32
      %12 = vector.broadcast %cst_10 : f32 to vector<80x512xf32>
      %c0_11 = arith.constant 0 : index
      %c0_12 = arith.constant 0 : index
      %13 = vector.load %arg7[%c0_11, %c0_12] : memref<80x512xf32, #tpu.memory_space<vmem>>, vector<80x512xf32>
      tpu.vector_store %arg7[%c0_11, %c0_12], %12 {strides = array<i32>} : memref<80x512xf32, #tpu.memory_space<vmem>>, vector<80x512xf32>,
    } else {
    }
    %c0 = arith.constant 0 : index
    %c0_1 = arith.constant 0 : index
    %3 = vector.load %arg7[%c0, %c0_1] : memref<80x512xf32, #tpu.memory_space<vmem>>, vector<80x512xf32>
    %c0_2 = arith.constant 0 : index
    %c0_3 = arith.constant 0 : index
    %4 = vector.load %arg3[%c0_2, %c0_3] : memref<80x128xbf16, #tpu.memory_space<vmem>>, vector<80x128xbf16>
    %c0_4 = arith.constant 0 : index
    %c0_5 = arith.constant 0 : index
    %5 = vector.load %arg4[%c0_4, %c0_5] : memref<128x512xbf16, #tpu.memory_space<vmem>>, vector<128x512xbf16>
    %cst = arith.constant dense<0.000000e+00> : vector<80x512xf32>
    %6 = tpu.matmul %4, %5, %cst {dimension_numbers = #tpu.dot_dimension_numbers<[1], [0], [0], [1], [0, 0, 1, 1], [], []>} : vector<80x128xbf16>, vector<128x512xbf16>, vector<80x512xf32> -> vector<80x512xf32>
    %7 = arith.addf %3, %6 : vector<80x512xf32>
    %c0_6 = arith.constant 0 : index
    %c0_7 = arith.constant 0 : index
    %8 = vector.load %arg7[%c0_6, %c0_7] : memref<80x512xf32, #tpu.memory_space<vmem>>, vector<80x512xf32>
    tpu.vector_store %arg7[%c0_6, %c0_7], %7 {strides = array<i32>} : memref<80x512xf32, #tpu.memory_space<vmem>>, vector<80x512xf32>,
    %c0_i32_8 = arith.constant 0 : i32
    %9 = arith.cmpi eq, %arg2, %c0_i32_8 : i32
    %10 = arith.extui %9 : i1 to i32
    %c0_i32_9 = arith.constant 0 : i32
    %11 = arith.cmpi ne, %10, %c0_i32_9 : i32
    scf.if %11 {
      %c0_10 = arith.constant 0 : index
      %c0_11 = arith.constant 0 : index
      %12 = vector.load %arg7[%c0_10, %c0_11] : memref<80x512xf32, #tpu.memory_space<vmem>>, vector<80x512xf32>
      %c0_12 = arith.constant 0 : index
      %c0_13 = arith.constant 0 : index
      %13 = vector.load %arg5[%c0_12, %c0_13] : memref<1x512xf32, #tpu.memory_space<vmem>>, vector<1x512xf32>
      %14 = vector.broadcast %13 : vector<1x512xf32> to vector<80x512xf32>
      %15 = arith.addf %12, %14 : vector<80x512xf32>
      %16 = arith.truncf %15 : vector<80x512xf32> to vector<80x512xbf16>
      %c0_14 = arith.constant 0 : index
      %c0_15 = arith.constant 0 : index
      %17 = vector.load %arg6[%c0_14, %c0_15] : memref<80x512xbf16, #tpu.memory_space<vmem>>, vector<80x512xbf16>
      tpu.vector_store %arg6[%c0_14, %c0_15], %16 {strides = array<i32>} : memref<80x512xbf16, #tpu.memory_space<vmem>>, vector<80x512xbf16>,
    } else {
    }
    return
  }
  func.func @transform_0(%arg0: i32, %arg1: i32, %arg2: i32) -> (i32, i32) {
    %c0_i32 = arith.constant 0 : i32
    return %arg0, %arg2 : i32, i32
  }
  func.func @transform_1(%arg0: i32, %arg1: i32, %arg2: i32) -> (i32, i32) {
    %c0_i32 = arith.constant 0 : i32
    return %arg2, %arg1 : i32, i32
  }
  func.func @transform_2(%arg0: i32, %arg1: i32, %arg2: i32) -> (i32, i32) {
    %c0_i32 = arith.constant 0 : i32
    %c0_i32_0 = arith.constant 0 : i32
    return %c0_i32, %arg1 : i32, i32
  }
  func.func @transform_3(%arg0: i32, %arg1: i32, %arg2: i32) -> (i32, i32) {
    %c0_i32 = arith.constant 0 : i32
    return %arg0, %arg1 : i32, i32
  }
}

module attributes {stable_mosaic.version = 11 : i64} {
  func.func @_matmul_bias_kernel(%arg0: i32, %arg1: i32, %arg2: i32, %arg3: memref<80x128xbf16, #tpu.memory_space<vmem>>, %arg4: memref<128x128xbf16, #tpu.memory_space<vmem>>, %arg5: memref<1x128xf32, #tpu.memory_space<vmem>>, %arg6: memref<80x128xf32, #tpu.memory_space<vmem>>, %arg7: memref<80x128xf32, #tpu.memory_space<vmem>>) attributes {dimension_semantics = [#tpu.dimension_semantics<parallel>, #tpu.dimension_semantics<parallel>, #tpu.dimension_semantics<arbitrary>], iteration_bounds = array<i64: 1, 1, 1>, scalar_prefetch = 0 : i64, scratch_operands = 1 : i64, tpu.core_type = #tpu.core_type<tc>, window_params = [{transform_indices = @transform_0, window_bounds = array<i64: 80, 128>}, {transform_indices = @transform_1, window_bounds = array<i64: 128, 128>}, {transform_indices = @transform_2, window_bounds = array<i64: 1, 128>}, {transform_indices = @transform_3, window_bounds = array<i64: 80, 128>}]} {
    %c0_i32 = arith.constant 0 : i32
    %0 = arith.cmpi eq, %arg2, %c0_i32 : i32
    %1 = arith.extui %0 : i1 to i32
    %c0_i32_0 = arith.constant 0 : i32
    %2 = arith.cmpi ne, %1, %c0_i32_0 : i32
    scf.if %2 {
      %cst_10 = arith.constant 0.000000e+00 : f32
      %12 = vector.broadcast %cst_10 : f32 to vector<80x128xf32>
      %c0_11 = arith.constant 0 : index
      %c0_12 = arith.constant 0 : index
      %13 = vector.load %arg7[%c0_11, %c0_12] : memref<80x128xf32, #tpu.memory_space<vmem>>, vector<80x128xf32>
      tpu.vector_store %arg7[%c0_11, %c0_12], %12 {strides = array<i32>} : memref<80x128xf32, #tpu.memory_space<vmem>>, vector<80x128xf32>,
    } else {
    }
    %c0 = arith.constant 0 : index
    %c0_1 = arith.constant 0 : index
    %3 = vector.load %arg7[%c0, %c0_1] : memref<80x128xf32, #tpu.memory_space<vmem>>, vector<80x128xf32>
    %c0_2 = arith.constant 0 : index
    %c0_3 = arith.constant 0 : index
    %4 = vector.load %arg3[%c0_2, %c0_3] : memref<80x128xbf16, #tpu.memory_space<vmem>>, vector<80x128xbf16>
    %c0_4 = arith.constant 0 : index
    %c0_5 = arith.constant 0 : index
    %5 = vector.load %arg4[%c0_4, %c0_5] : memref<128x128xbf16, #tpu.memory_space<vmem>>, vector<128x128xbf16>
    %cst = arith.constant dense<0.000000e+00> : vector<80x128xf32>
    %6 = tpu.matmul %4, %5, %cst {dimension_numbers = #tpu.dot_dimension_numbers<[1], [0], [0], [1], [0, 0, 1, 1], [], []>} : vector<80x128xbf16>, vector<128x128xbf16>, vector<80x128xf32> -> vector<80x128xf32>
    %7 = arith.addf %3, %6 : vector<80x128xf32>
    %c0_6 = arith.constant 0 : index
    %c0_7 = arith.constant 0 : index
    %8 = vector.load %arg7[%c0_6, %c0_7] : memref<80x128xf32, #tpu.memory_space<vmem>>, vector<80x128xf32>
    tpu.vector_store %arg7[%c0_6, %c0_7], %7 {strides = array<i32>} : memref<80x128xf32, #tpu.memory_space<vmem>>, vector<80x128xf32>,
    %c0_i32_8 = arith.constant 0 : i32
    %9 = arith.cmpi eq, %arg2, %c0_i32_8 : i32
    %10 = arith.extui %9 : i1 to i32
    %c0_i32_9 = arith.constant 0 : i32
    %11 = arith.cmpi ne, %10, %c0_i32_9 : i32
    scf.if %11 {
      %c0_10 = arith.constant 0 : index
      %c0_11 = arith.constant 0 : index
      %12 = vector.load %arg7[%c0_10, %c0_11] : memref<80x128xf32, #tpu.memory_space<vmem>>, vector<80x128xf32>
      %c0_12 = arith.constant 0 : index
      %c0_13 = arith.constant 0 : index
      %13 = vector.load %arg5[%c0_12, %c0_13] : memref<1x128xf32, #tpu.memory_space<vmem>>, vector<1x128xf32>
      %14 = vector.broadcast %13 : vector<1x128xf32> to vector<80x128xf32>
      %15 = arith.addf %12, %14 : vector<80x128xf32>
      %c0_14 = arith.constant 0 : index
      %c0_15 = arith.constant 0 : index
      %16 = vector.load %arg6[%c0_14, %c0_15] : memref<80x128xf32, #tpu.memory_space<vmem>>, vector<80x128xf32>
      tpu.vector_store %arg6[%c0_14, %c0_15], %15 {strides = array<i32>} : memref<80x128xf32, #tpu.memory_space<vmem>>, vector<80x128xf32>,
    } else {
    }
    return
  }
  func.func @transform_0(%arg0: i32, %arg1: i32, %arg2: i32) -> (i32, i32) {
    %c0_i32 = arith.constant 0 : i32
    return %arg0, %arg2 : i32, i32
  }
  func.func @transform_1(%arg0: i32, %arg1: i32, %arg2: i32) -> (i32, i32) {
    %c0_i32 = arith.constant 0 : i32
    return %arg2, %arg1 : i32, i32
  }
  func.func @transform_2(%arg0: i32, %arg1: i32, %arg2: i32) -> (i32, i32) {
    %c0_i32 = arith.constant 0 : i32
    %c0_i32_0 = arith.constant 0 : i32
    return %c0_i32, %arg1 : i32, i32
  }
  func.func @transform_3(%arg0: i32, %arg1: i32, %arg2: i32) -> (i32, i32) {
    %c0_i32 = arith.constant 0 : i32
    return %arg0, %arg1 : i32, i32
  }
}

</mosaic_0001>

<bundles_post_ra>
// kernel: encoder_to_decoder_forward.8
= control target key start
LH: loop header
LB: loop body
LE: loop exit
PB: predicated region body
PF: predicated region fallthrough
CT: control target
= control target key end

     0   :  { %v229_v0 = vmov 0.0   ;;  %vm230_vm0 = vmmov 0   ;;  %s284_s1 = inlined_call_operand.vmem [shape: bf16[128,128], index: 1, kind: input, shape index: {}]   ;;  %s285_s0 = inlined_call_operand.vmem [shape: bf16[16,128], index: 0, kind: input, shape index: {}]   ;;  %s286_s2 = inlined_call_operand.vmem [shape: f32[1,128], index: 2, kind: input, shape index: {}]   ;;  %s287_s3 = inlined_call_operand.vmem [shape: bf16[16,128], index: 3, kind: output, shape index: {}]  }
   0x1   :  { %198 = vmatprep.subr.bf16.mxu0 %v229_v0  ;;  %v220_v1 = vld [vmem:[%s284_s1] sm:$0xff]   ;;  %214 = vmatprep.mubr.msk.bf16.mxu0 %vm230_vm0, %v229_v0  ;;  %v221_v2 = vld [vmem:[%s284_s1 + $0x8] sm:$0xff]   ;;  %v222_v3 = vld [vmem:[%s284_s1 + $0x10] sm:$0xff]  }
   0x2   :  { %199 = vmatpush3.bf16.msra.mxu0 %v220_v1  ;;  %v223_v4 = vld [vmem:[%s284_s1 + $0x18] sm:$0xff]   ;;  %v224_v5 = vld [vmem:[%s284_s1 + $0x20] sm:$0xff]   ;;  %v225_v6 = vld [vmem:[%s284_s1 + $0x28] sm:$0xff]  }
   0x3   :  { %200 = vmatprep.subr.bf16.mxu0 %v229_v0  ;;  %v226_v7 = vld [vmem:[%s284_s1 + $0x30] sm:$0xff]   ;;  %v227_v8 = vld [vmem:[%s284_s1 + $0x38] sm:$0xff]   ;;  %v228_v9 = vld [vmem:[%s285_s0] sm:$0xff]  }
   0x4   :  { %v179_v10 = vld [vmem:[%s286_s2] ss:$0 sm:$0xff] }
   0x6   :  { %201 = vmatpush3.bf16.msra.mxu0 %v221_v2 }
   0x7   :  { %202 = vmatprep.subr.bf16.mxu0 %v229_v0 }
   0xa   :  { %203 = vmatpush3.bf16.msra.mxu0 %v222_v3 }
   0xb   :  { %204 = vmatprep.subr.bf16.mxu0 %v229_v0 }
   0xe   :  { %205 = vmatpush3.bf16.msra.mxu0 %v223_v4 }
   0xf   :  { %206 = vmatprep.subr.bf16.mxu0 %v229_v0 }
  0x12   :  { %207 = vmatpush3.bf16.msra.mxu0 %v224_v5 }
  0x13   :  { %208 = vmatprep.subr.bf16.mxu0 %v229_v0 }
  0x16   :  { %209 = vmatpush3.bf16.msra.mxu0 %v225_v6 }
  0x17   :  { %210 = vmatprep.subr.bf16.mxu0 %v229_v0 }
  0x1a   :  { %211 = vmatpush3.bf16.msra.mxu0 %v226_v7 }
  0x1b   :  { %212 = vmatprep.subr.bf16.mxu0 %v229_v0 }
  0x1e   :  { %213 = vmatpush3.bf16.msra.mxu0 %v227_v8 }
  0x21   :  { %215 = vmatmul.mubr.bf16.vlgmr.msra.gmra.mrb[0].mxu0 %v228_v9 }
  0xf4   :  { %v129_v11 = vpop.f32.mrb[0].mxu0 }
  0xf5   :  { %v152_v12 = vadd.f32 %v179_v10, %v129_v11  ;;  %v216_v13 = vpop.f32.mrb[1].mxu0 }
  0xf6   :  { %v132_v14 = vpop.f32.mrb[2].mxu0 }
  0xf7   :  { %v153_v15 = vadd.f32 %v179_v10, %v132_v14  ;;  %v217_v16 = vpop.f32.mrb[3].mxu0  ;;  %v154_v17 = vmax.f32 %v152_v12, 0.0 }
  0xf9   :  { %v155_v18 = vmax.f32 %v153_v15, 0.0 }
  0xfb   :  { %v187_v19 = vpack.c.bf16 %v155_v18, %v154_v17 }
  0xfd   :  { %188 = vst [vmem:[%s287_s3] sm:$0xff] %v187_v19  }

// kernel: encoder_to_decoder_forward.7
= control target key start
LH: loop header
LB: loop body
LE: loop exit
PB: predicated region body
PF: predicated region fallthrough
CT: control target
= control target key end

     0   :  { %vm154_vm0 = vcmask 293888   ;;  %vm203_vm1 = vcmask 1041408   ;;  %vm400_vm2 = vcmask 130048   ;;  %vm472_vm3 = vcmask 122880   ;;  %s1458_s1 = inlined_call_operand.vmem [shape: bf16[36,16], index: 1, kind: input, shape index: {}]   ;;  %s1459_s0 = inlined_call_operand.vmem [shape: bf16[2,256,36], index: 0, kind: input, shape index: {}]   ;;  %s1460_s2 = inlined_call_operand.vmem [shape: f32[1,16], index: 2, kind: input, shape index: {}]   ;;  %s1461_s3 = inlined_call_operand.vmem [shape: f32[2,1,16], index: 3, kind: output, shape index: {}]  }
   0x1   :  { %v1121_v0 = vld [vmem:[%s1458_s1] sm:$0xff]   ;;  %v1122_v1 = vld [vmem:[%s1458_s1 + $0x8] sm:$0xff]   ;;  %v1123_v2 = vld [vmem:[%s1458_s1 + $0x10] ss:$0 sps:$4 sm:$0x33]  }
   0x2   :  { %1043 = vmatprep.subr.bf16.mxu0 %v1121_v0  ;;  %1081 = vmatprep.subr.bf16.mxu1 %v1121_v0  ;;  %v1124_v3 = vld [vmem:[%s1459_s0] sm:$0xff]   ;;  %v205_v5 = vsel %vm203_vm1, %v1123_v2, 0  ;;  %v1126_v6 = vld [vmem:[%s1459_s0 + $0x8] sm:$0xff]   ;;  %v1128_v8 = vld [vmem:[%s1459_s0 + $0x10] sm:$0xff]  }
   0x3   :  { %1044 = vmatpush3.bf16.msra.mxu0 %v1121_v0  ;;  %1082 = vmatpush3.bf16.msra.mxu1 %v1121_v0  ;;  %v1125_v4 = vld [vmem:[%s1459_s0 + $0x80] sm:$0xff]   ;;  %v1127_v7 = vld [vmem:[%s1459_s0 + $0x88] sm:$0xff]   ;;  %v1129_v9 = vld [vmem:[%s1459_s0 + $0x90] sm:$0xff]  }
   0x4   :  { %1045 = vmatprep.subr.bf16.mxu0 %v1122_v1  ;;  %1083 = vmatprep.subr.bf16.mxu1 %v1122_v1  ;;  %v1130_v10 = vld [vmem:[%s1459_s0 + $0x18] sm:$0xff]   ;;  %v1132_v12 = vld [vmem:[%s1459_s0 + $0x20] sm:$0xff]   ;;  %v1134_v14 = vld [vmem:[%s1459_s0 + $0x28] sm:$0xff]  }
   0x5   :  { %1049 = vmatprep.mubr.msk.bf16.mxu0 %vm154_vm0, %v1124_v3  ;;  %1087 = vmatprep.mubr.msk.bf16.mxu1 %vm154_vm0, %v1125_v4  ;;  %v1131_v11 = vld [vmem:[%s1459_s0 + $0x98] sm:$0xff]   ;;  %v1133_v13 = vld [vmem:[%s1459_s0 + $0xa0] sm:$0xff]   ;;  %v1135_v15 = vld [vmem:[%s1459_s0 + $0xa8] sm:$0xff]  }
   0x6   :  { %v1136_v16 = vld [vmem:[%s1459_s0 + $0x30] sm:$0xff]   ;;  %v1138_v18 = vld [vmem:[%s1459_s0 + $0x38] sm:$0xff]   ;;  %v1140_v20 = vld [vmem:[%s1459_s0 + $0x40] sm:$0xff]  }
   0x7   :  { %1046 = vmatpush3.bf16.msra.mxu0 %v1122_v1  ;;  %1084 = vmatpush3.bf16.msra.mxu1 %v1122_v1  ;;  %v1137_v17 = vld [vmem:[%s1459_s0 + $0xb0] sm:$0xff]   ;;  %v1139_v19 = vld [vmem:[%s1459_s0 + $0xb8] sm:$0xff]   ;;  %v1141_v21 = vld [vmem:[%s1459_s0 + $0xc0] sm:$0xff]  }
   0x8   :  { %1119 = vmatprep.subr.msk.bf16.mxu0 %vm203_vm1, %v1123_v2  ;;  %1120 = vmatprep.subr.msk.bf16.mxu1 %vm203_vm1, %v1123_v2  ;;  %v1142_v22 = vld [vmem:[%s1459_s0 + $0x48] sm:$0xff]   ;;  %v1144_v24 = vld [vmem:[%s1459_s0 + $0x50] sm:$0xff]   ;;  %v1146_v26 = vld [vmem:[%s1459_s0 + $0x58] sm:$0xff]  }
   0x9   :  { %v1143_v23 = vld [vmem:[%s1459_s0 + $0xc8] sm:$0xff]   ;;  %v1145_v25 = vld [vmem:[%s1459_s0 + $0xd0] sm:$0xff]   ;;  %v1147_v27 = vld [vmem:[%s1459_s0 + $0xd8] sm:$0xff]  }
   0xa   :  { %v1148_v28 = vld [vmem:[%s1459_s0 + $0x60] sm:$0xff]   ;;  %v1150_v30 = vld [vmem:[%s1459_s0 + $0x68] sm:$0xff]   ;;  %v1152_v32 = vld [vmem:[%s1459_s0 + $0x70] sm:$0xff]  }
   0xb   :  { %1048 = vmatpush3.bf16.msra.mxu0 %v205_v5  ;;  %1086 = vmatpush3.bf16.msra.mxu1 %v205_v5  ;;  %v1149_v29 = vld [vmem:[%s1459_s0 + $0xe0] sm:$0xff]   ;;  %v1151_v31 = vld [vmem:[%s1459_s0 + $0xe8] sm:$0xff]   ;;  %v1153_v33 = vld [vmem:[%s1459_s0 + $0xf0] sm:$0xff]  }
   0xc   :  { %v1154_v34 = vld [vmem:[%s1459_s0 + $0x78] sm:$0xff]   ;;  %v1316_v36 = vld [vmem:[%s1460_s2] ss:$0 sm:$0xff] }
   0xd   :  { %v1155_v35 = vld [vmem:[%s1459_s0 + $0xf8] sm:$0xff]  }
   0xe   :  { %1050 = vmatmul.mubr.msk.bf16.vlgmr.msra.gmra.mrb[0].mxu0 %vm154_vm0, %v1126_v6  ;;  %1088 = vmatmul.mubr.msk.bf16.vlgmr.msra.gmra.mrb[0].mxu1 %vm154_vm0, %v1127_v7 }
   0xf   :  { %1053 = vmatprep.mubr.msk.bf16.mxu0 %vm154_vm0, %v1128_v8  ;;  %1091 = vmatprep.mubr.msk.bf16.mxu1 %vm154_vm0, %v1129_v9 }
  0x16   :  { %1054 = vmatmul.mubr.msk.bf16.gmra.mrb[4].mxu0 %vm154_vm0, %v1130_v10  ;;  %1092 = vmatmul.mubr.msk.bf16.gmra.mrb[4].mxu1 %vm154_vm0, %v1131_v11 }
  0x17   :  { %1057 = vmatprep.mubr.msk.bf16.mxu0 %vm154_vm0, %v1132_v12  ;;  %1095 = vmatprep.mubr.msk.bf16.mxu1 %vm154_vm0, %v1133_v13 }
  0x1e   :  { %1058 = vmatmul.mubr.msk.bf16.gmra.mrb[8].mxu0 %vm154_vm0, %v1134_v14  ;;  %1096 = vmatmul.mubr.msk.bf16.gmra.mrb[8].mxu1 %vm154_vm0, %v1135_v15 }
  0x1f   :  { %1061 = vmatprep.mubr.msk.bf16.mxu0 %vm154_vm0, %v1136_v16  ;;  %1099 = vmatprep.mubr.msk.bf16.mxu1 %vm154_vm0, %v1137_v17 }
  0x26   :  { %1062 = vmatmul.mubr.msk.bf16.gmra.mrb[12].mxu0 %vm154_vm0, %v1138_v18  ;;  %1100 = vmatmul.mubr.msk.bf16.gmra.mrb[12].mxu1 %vm154_vm0, %v1139_v19 }
  0x27   :  { %1065 = vmatprep.mubr.msk.bf16.mxu0 %vm154_vm0, %v1140_v20  ;;  %1103 = vmatprep.mubr.msk.bf16.mxu1 %vm154_vm0, %v1141_v21 }
  0x2e   :  { %1066 = vmatmul.mubr.msk.bf16.gmra.mrb[16].mxu0 %vm154_vm0, %v1142_v22  ;;  %1104 = vmatmul.mubr.msk.bf16.gmra.mrb[16].mxu1 %vm154_vm0, %v1143_v23 }
  0x2f   :  { %1069 = vmatprep.mubr.msk.bf16.mxu0 %vm154_vm0, %v1144_v24  ;;  %1107 = vmatprep.mubr.msk.bf16.mxu1 %vm154_vm0, %v1145_v25 }
  0x36   :  { %1070 = vmatmul.mubr.msk.bf16.gmra.mrb[20].mxu0 %vm154_vm0, %v1146_v26  ;;  %1108 = vmatmul.mubr.msk.bf16.gmra.mrb[20].mxu1 %vm154_vm0, %v1147_v27 }
  0x37   :  { %1073 = vmatprep.mubr.msk.bf16.mxu0 %vm154_vm0, %v1148_v28  ;;  %1111 = vmatprep.mubr.msk.bf16.mxu1 %vm154_vm0, %v1149_v29 }
  0x3e   :  { %1074 = vmatmul.mubr.msk.bf16.gmra.mrb[24].mxu0 %vm154_vm0, %v1150_v30  ;;  %1112 = vmatmul.mubr.msk.bf16.gmra.mrb[24].mxu1 %vm154_vm0, %v1151_v31 }
  0x3f   :  { %1077 = vmatprep.mubr.msk.bf16.mxu0 %vm154_vm0, %v1152_v32  ;;  %1115 = vmatprep.mubr.msk.bf16.mxu1 %vm154_vm0, %v1153_v33 }
  0x46   :  { %1078 = vmatmul.mubr.msk.bf16.gmra.mrb[28].mxu0 %vm154_vm0, %v1154_v34  ;;  %1116 = vmatmul.mubr.msk.bf16.gmra.mrb[28].mxu1 %vm154_vm0, %v1155_v35 }
  0xe1   :  { %v1051_v37 = vpop.f32.mrb[0].mxu0  ;;  %v1089_v38 = vpop.f32.mrb[0].mxu1 }
  0xe2   :  { %v241_v39 = vpop.f32.mrb[1].mxu0  ;;  %v669_v40 = vpop.f32.mrb[1].mxu1  ;;  %v250_v41 = vadd.f32 %v1051_v37, %v1316_v36  ;;  %v678_v42 = vadd.f32 %v1089_v38, %v1316_v36 }
  0xe3   :  { %v242_v43 = vadd.f32 %v1316_v36, %v241_v39  ;;  %v670_v44 = vadd.f32 %v1316_v36, %v669_v40  ;;  %v1052_v45 = vpop.f32.mrb[2].mxu0  ;;  %v1090_v46 = vpop.f32.mrb[2].mxu1 }
  0xe4   :  { %v253_v47 = vadd.f32 %v1052_v45, %v1316_v36  ;;  %v681_v48 = vadd.f32 %v1090_v46, %v1316_v36  ;;  %v244_v49 = vpop.f32.mrb[3].mxu0  ;;  %v672_v50 = vpop.f32.mrb[3].mxu1  ;;  %v370_v55 = vmax.f32 %v250_v41, 0.0  ;;  %v798_v56 = vmax.f32 %v678_v42, 0.0 }
  0xe5   :  { %v368_v51 = vmax.f32 %v242_v43, 0.0  ;;  %v796_v52 = vmax.f32 %v670_v44, 0.0  ;;  %v245_v53 = vadd.f32 %v1316_v36, %v244_v49  ;;  %v673_v54 = vadd.f32 %v1316_v36, %v672_v50 }
  0xe6   :  { %v371_v59 = vmax.f32 %v253_v47, 0.0  ;;  %v799_v60 = vmax.f32 %v681_v48, 0.0  ;;  %v404_v7 = vsel %vm400_vm2, %v370_v55, 0.0  ;;  %v831_v8 = vsel %vm400_vm2, %v798_v56, 0.0 }
  0xe7   :  { %v369_v57 = vmax.f32 %v245_v53, 0.0  ;;  %v797_v58 = vmax.f32 %v673_v54, 0.0  ;;  %v401_v61 = vsel %vm400_vm2, %v368_v51, 0.0  ;;  %v828_v62 = vsel %vm400_vm2, %v796_v52, 0.0 }
  0xe8   :  { %v406_v17 = vsel %vm400_vm2, %v371_v59, 0.0  ;;  %v833_v18 = vsel %vm400_vm2, %v799_v60, 0.0 }
  0xe9   :  { %v402_v63 = vsel %vm400_vm2, %v369_v57, 0.0  ;;  %v829_v0 = vsel %vm400_vm2, %v797_v58, 0.0  ;;  %v1055_v1 = vpop.f32.mrb[4].mxu0  ;;  %v1093_v2 = vpop.f32.mrb[4].mxu1 }
  0xea   :  { %v403_v3 = vadd.f32 %v402_v63, %v401_v61  ;;  %v830_v4 = vadd.f32 %v829_v0, %v828_v62  ;;  %v257_v5 = vpop.f32.mrb[5].mxu0  ;;  %v685_v6 = vpop.f32.mrb[5].mxu1  ;;  %v266_v21 = vadd.f32 %v1055_v1, %v1316_v36  ;;  %v694_v22 = vadd.f32 %v1093_v2, %v1316_v36 }
  0xeb   :  { %v258_v9 = vadd.f32 %v1316_v36, %v257_v5  ;;  %v686_v10 = vadd.f32 %v1316_v36, %v685_v6  ;;  %v1056_v11 = vpop.f32.mrb[6].mxu0  ;;  %v1094_v12 = vpop.f32.mrb[6].mxu1 }
  0xec   :  { %v405_v13 = vadd.f32 %v404_v7, %v403_v3  ;;  %v832_v14 = vadd.f32 %v831_v8, %v830_v4  ;;  %v260_v15 = vpop.f32.mrb[7].mxu0  ;;  %v688_v16 = vpop.f32.mrb[7].mxu1  ;;  %v269_v27 = vadd.f32 %v1056_v11, %v1316_v36  ;;  %v697_v28 = vadd.f32 %v1094_v12, %v1316_v36 }
  0xed   :  { %v372_v19 = vmax.f32 %v258_v9, 0.0  ;;  %v800_v20 = vmax.f32 %v686_v10, 0.0  ;;  %v261_v31 = vadd.f32 %v1316_v36, %v260_v15  ;;  %v689_v32 = vadd.f32 %v1316_v36, %v688_v16 }
  0xee   :  { %v407_v23 = vadd.f32 %v406_v17, %v405_v13  ;;  %v834_v24 = vadd.f32 %v833_v18, %v832_v14  ;;  %v374_v35 = vmax.f32 %v266_v21, 0.0  ;;  %v802_v37 = vmax.f32 %v694_v22, 0.0 }
  0xef   :  { %v408_v25 = vsel %vm400_vm2, %v372_v19, 0.0  ;;  %v835_v26 = vsel %vm400_vm2, %v800_v20, 0.0  ;;  %v373_v38 = vmax.f32 %v261_v31, 0.0  ;;  %v801_v39 = vmax.f32 %v689_v32, 0.0 }
  0xf0   :  { %v409_v29 = vadd.f32 %v408_v25, %v407_v23  ;;  %v836_v30 = vadd.f32 %v835_v26, %v834_v24  ;;  %v375_v42 = vmax.f32 %v269_v27, 0.0  ;;  %v803_v43 = vmax.f32 %v697_v28, 0.0 }
  0xf1   :  { %v1059_v33 = vpop.f32.mrb[8].mxu0  ;;  %v1097_v34 = vpop.f32.mrb[8].mxu1  ;;  %v410_v48 = vsel %vm400_vm2, %v373_v38, 0.0  ;;  %v837_v49 = vsel %vm400_vm2, %v801_v39, 0.0  ;;  %v412_v58 = vsel %vm400_vm2, %v374_v35, 0.0  ;;  %v839_v59 = vsel %vm400_vm2, %v802_v37, 0.0 }
  0xf2   :  { %v273_v40 = vpop.f32.mrb[9].mxu0  ;;  %v701_v41 = vpop.f32.mrb[9].mxu1  ;;  %v282_v50 = vadd.f32 %v1059_v33, %v1316_v36  ;;  %v710_v51 = vadd.f32 %v1097_v34, %v1316_v36  ;;  %v411_v54 = vadd.f32 %v410_v48, %v409_v29  ;;  %v838_v55 = vadd.f32 %v837_v49, %v836_v30 }
  0xf3   :  { %v274_v44 = vadd.f32 %v1316_v36, %v273_v40  ;;  %v702_v45 = vadd.f32 %v1316_v36, %v701_v41  ;;  %v1060_v46 = vpop.f32.mrb[10].mxu0  ;;  %v1098_v47 = vpop.f32.mrb[10].mxu1  ;;  %v414_v62 = vsel %vm400_vm2, %v375_v42, 0.0  ;;  %v841_v63 = vsel %vm400_vm2, %v803_v43, 0.0 }
  0xf4   :  { %v276_v52 = vpop.f32.mrb[11].mxu0  ;;  %v704_v53 = vpop.f32.mrb[11].mxu1  ;;  %v285_v60 = vadd.f32 %v1060_v46, %v1316_v36  ;;  %v713_v61 = vadd.f32 %v1098_v47, %v1316_v36  ;;  %v413_v0 = vadd.f32 %v412_v58, %v411_v54  ;;  %v840_v1 = vadd.f32 %v839_v59, %v838_v55 }
  0xf5   :  { %v376_v56 = vmax.f32 %v274_v44, 0.0  ;;  %v804_v57 = vmax.f32 %v702_v45, 0.0  ;;  %v277_v4 = vadd.f32 %v1316_v36, %v276_v52  ;;  %v705_v5 = vadd.f32 %v1316_v36, %v704_v53 }
  0xf6   :  { %v378_v6 = vmax.f32 %v282_v50, 0.0  ;;  %v806_v7 = vmax.f32 %v710_v51, 0.0  ;;  %v415_v8 = vadd.f32 %v414_v62, %v413_v0  ;;  %v842_v9 = vadd.f32 %v841_v63, %v840_v1 }
  0xf7   :  { %v416_v2 = vsel %vm400_vm2, %v376_v56, 0.0  ;;  %v843_v3 = vsel %vm400_vm2, %v804_v57, 0.0  ;;  %v379_v12 = vmax.f32 %v285_v60, 0.0  ;;  %v807_v13 = vmax.f32 %v713_v61, 0.0 }
  0xf8   :  { %v377_v14 = vmax.f32 %v277_v4, 0.0  ;;  %v805_v15 = vmax.f32 %v705_v5, 0.0  ;;  %v417_v18 = vadd.f32 %v416_v2, %v415_v8  ;;  %v844_v19 = vadd.f32 %v843_v3, %v842_v9 }
  0xf9   :  { %v1063_v10 = vpop.f32.mrb[12].mxu0  ;;  %v1101_v11 = vpop.f32.mrb[12].mxu1  ;;  %v420_v30 = vsel %vm400_vm2, %v378_v6, 0.0  ;;  %v847_v31 = vsel %vm400_vm2, %v806_v7, 0.0  ;;  %v422_v39 = vsel %vm400_vm2, %v379_v12, 0.0  ;;  %v849_v40 = vsel %vm400_vm2, %v807_v13, 0.0 }
  0xfa   :  { %v289_v16 = vpop.f32.mrb[13].mxu0  ;;  %v717_v17 = vpop.f32.mrb[13].mxu1  ;;  %v298_v20 = vadd.f32 %v1063_v10, %v1316_v36  ;;  %v726_v21 = vadd.f32 %v1101_v11, %v1316_v36  ;;  %v418_v24 = vsel %vm400_vm2, %v377_v14, 0.0  ;;  %v845_v25 = vsel %vm400_vm2, %v805_v15, 0.0 }
  0xfb   :  { %v1064_v22 = vpop.f32.mrb[14].mxu0  ;;  %v1102_v23 = vpop.f32.mrb[14].mxu1  ;;  %v290_v26 = vadd.f32 %v1316_v36, %v289_v16  ;;  %v718_v27 = vadd.f32 %v1316_v36, %v717_v17  ;;  %v419_v32 = vadd.f32 %v418_v24, %v417_v18  ;;  %v846_v33 = vadd.f32 %v845_v25, %v844_v19 }
  0xfc   :  { %v292_v28 = vpop.f32.mrb[15].mxu0  ;;  %v720_v29 = vpop.f32.mrb[15].mxu1  ;;  %v301_v37 = vadd.f32 %v1064_v22, %v1316_v36  ;;  %v729_v38 = vadd.f32 %v1102_v23, %v1316_v36  ;;  %v382_v43 = vmax.f32 %v298_v20, 0.0  ;;  %v810_v44 = vmax.f32 %v726_v21, 0.0 }
  0xfd   :  { %v380_v34 = vmax.f32 %v290_v26, 0.0  ;;  %v808_v35 = vmax.f32 %v718_v27, 0.0  ;;  %v421_v41 = vadd.f32 %v420_v30, %v419_v32  ;;  %v848_v42 = vadd.f32 %v847_v31, %v846_v33 }
  0xfe   :  { %v293_v49 = vadd.f32 %v1316_v36, %v292_v28  ;;  %v721_v50 = vadd.f32 %v1316_v36, %v720_v29  ;;  %v383_v53 = vmax.f32 %v301_v37, 0.0  ;;  %v811_v54 = vmax.f32 %v729_v38, 0.0 }
  0xff   :  { %v424_v45 = vsel %vm400_vm2, %v380_v34, 0.0  ;;  %v851_v46 = vsel %vm400_vm2, %v808_v35, 0.0  ;;  %v423_v47 = vadd.f32 %v422_v39, %v421_v41  ;;  %v850_v48 = vadd.f32 %v849_v40, %v848_v42 }
 0x100   :  { %v381_v61 = vmax.f32 %v293_v49, 0.0  ;;  %v809_v62 = vmax.f32 %v721_v50, 0.0  ;;  %v428_v1 = vsel %vm400_vm2, %v382_v43, 0.0  ;;  %v855_v2 = vsel %vm400_vm2, %v810_v44, 0.0 }
 0x101   :  { %v1067_v51 = vpop.f32.mrb[16].mxu0  ;;  %v1105_v52 = vpop.f32.mrb[16].mxu1  ;;  %v425_v59 = vadd.f32 %v424_v45, %v423_v47  ;;  %v852_v60 = vadd.f32 %v851_v46, %v850_v48  ;;  %v430_v11 = vsel %vm400_vm2, %v383_v53, 0.0  ;;  %v857_v12 = vsel %vm400_vm2, %v811_v54, 0.0 }
 0x102   :  { %v1377_v55 = vadd.f32 %v1067_v51, %v1316_v36  ;;  %v1380_v56 = vadd.f32 %v1105_v52, %v1316_v36  ;;  %v305_v57 = vpop.f32.mrb[17].mxu0  ;;  %v733_v58 = vpop.f32.mrb[17].mxu1  ;;  %v426_v7 = vsel %vm400_vm2, %v381_v61, 0.0  ;;  %v853_v8 = vsel %vm400_vm2, %v809_v62, 0.0 }
 0x103   :  { %v1068_v63 = vpop.f32.mrb[18].mxu0  ;;  %v1106_v0 = vpop.f32.mrb[18].mxu1  ;;  %v306_v3 = vadd.f32 %v1316_v36, %v305_v57  ;;  %v734_v4 = vadd.f32 %v1316_v36, %v733_v58  ;;  %v427_v13 = vadd.f32 %v426_v7, %v425_v59  ;;  %v854_v14 = vadd.f32 %v853_v8, %v852_v60 }
 0x104   :  { %v308_v5 = vpop.f32.mrb[19].mxu0  ;;  %v736_v6 = vpop.f32.mrb[19].mxu1  ;;  %v317_v9 = vadd.f32 %v1068_v63, %v1316_v36  ;;  %v745_v10 = vadd.f32 %v1106_v0, %v1316_v36  ;;  %v386_v15 = vmax.f32 %v1377_v55, 0.0  ;;  %v814_v16 = vmax.f32 %v1380_v56, 0.0 }
 0x105   :  { %v384_v17 = vmax.f32 %v306_v3, 0.0  ;;  %v812_v18 = vmax.f32 %v734_v4, 0.0  ;;  %v429_v19 = vadd.f32 %v428_v1, %v427_v13  ;;  %v856_v20 = vadd.f32 %v855_v2, %v854_v14 }
 0x106   :  { %v309_v21 = vadd.f32 %v1316_v36, %v308_v5  ;;  %v737_v22 = vadd.f32 %v1316_v36, %v736_v6  ;;  %v387_v25 = vmax.f32 %v317_v9, 0.0  ;;  %v815_v26 = vmax.f32 %v745_v10, 0.0 }
 0x107   :  { %v432_v23 = vsel %vm400_vm2, %v384_v17, 0.0  ;;  %v859_v24 = vsel %vm400_vm2, %v812_v18, 0.0  ;;  %v431_v29 = vadd.f32 %v430_v11, %v429_v19  ;;  %v858_v30 = vadd.f32 %v857_v12, %v856_v20 }
 0x108   :  { %v385_v31 = vmax.f32 %v309_v21, 0.0  ;;  %v813_v32 = vmax.f32 %v737_v22, 0.0  ;;  %v436_v54 = vsel %vm400_vm2, %v386_v15, 0.0  ;;  %v863_v55 = vsel %vm400_vm2, %v814_v16, 0.0 }
 0x109   :  { %v1071_v27 = vpop.f32.mrb[20].mxu0  ;;  %v1109_v28 = vpop.f32.mrb[20].mxu1  ;;  %v433_v42 = vadd.f32 %v432_v23, %v431_v29  ;;  %v860_v43 = vadd.f32 %v859_v24, %v858_v30  ;;  %v438_v56 = vsel %vm400_vm2, %v387_v25, 0.0  ;;  %v865_v57 = vsel %vm400_vm2, %v815_v26, 0.0 }
 0x10a   :  { %v321_v33 = vpop.f32.mrb[21].mxu0  ;;  %v749_v34 = vpop.f32.mrb[21].mxu1  ;;  %v330_v35 = vadd.f32 %v1071_v27, %v1316_v36  ;;  %v758_v37 = vadd.f32 %v1109_v28, %v1316_v36  ;;  %v434_v44 = vsel %vm400_vm2, %v385_v31, 0.0  ;;  %v861_v45 = vsel %vm400_vm2, %v813_v32, 0.0 }
 0x10b   :  { %v322_v38 = vadd.f32 %v1316_v36, %v321_v33  ;;  %v750_v39 = vadd.f32 %v1316_v36, %v749_v34  ;;  %v1072_v40 = vpop.f32.mrb[22].mxu0  ;;  %v1110_v41 = vpop.f32.mrb[22].mxu1  ;;  %v435_v50 = vadd.f32 %v434_v44, %v433_v42  ;;  %v862_v51 = vadd.f32 %v861_v45, %v860_v43 }
 0x10c   :  { %v324_v46 = vpop.f32.mrb[23].mxu0  ;;  %v752_v47 = vpop.f32.mrb[23].mxu1  ;;  %v333_v52 = vadd.f32 %v1072_v40, %v1316_v36  ;;  %v761_v53 = vadd.f32 %v1110_v41, %v1316_v36  ;;  %v390_v60 = vmax.f32 %v330_v35, 0.0  ;;  %v818_v61 = vmax.f32 %v758_v37, 0.0 }
 0x10d   :  { %v388_v48 = vmax.f32 %v322_v38, 0.0  ;;  %v816_v49 = vmax.f32 %v750_v39, 0.0  ;;  %v437_v58 = vadd.f32 %v436_v54, %v435_v50  ;;  %v864_v59 = vadd.f32 %v863_v55, %v862_v51 }
 0x10e   :  { %v325_v0 = vadd.f32 %v1316_v36, %v324_v46  ;;  %v753_v1 = vadd.f32 %v1316_v36, %v752_v47  ;;  %v391_v6 = vmax.f32 %v333_v52, 0.0  ;;  %v819_v7 = vmax.f32 %v761_v53, 0.0 }
 0x10f   :  { %v440_v62 = vsel %vm400_vm2, %v388_v48, 0.0  ;;  %v867_v63 = vsel %vm400_vm2, %v816_v49, 0.0  ;;  %v439_v4 = vadd.f32 %v438_v56, %v437_v58  ;;  %v866_v5 = vadd.f32 %v865_v57, %v864_v59 }
 0x110   :  { %v389_v10 = vmax.f32 %v325_v0, 0.0  ;;  %v817_v11 = vmax.f32 %v753_v1, 0.0  ;;  %v444_v22 = vsel %vm400_vm2, %v390_v60, 0.0  ;;  %v871_v23 = vsel %vm400_vm2, %v818_v61, 0.0 }
 0x111   :  { %v1075_v2 = vpop.f32.mrb[24].mxu0  ;;  %v1113_v3 = vpop.f32.mrb[24].mxu1  ;;  %v441_v16 = vadd.f32 %v440_v62, %v439_v4  ;;  %v868_v17 = vadd.f32 %v867_v63, %v866_v5  ;;  %v446_v30 = vsel %vm400_vm2, %v391_v6, 0.0  ;;  %v873_v31 = vsel %vm400_vm2, %v819_v7, 0.0 }
 0x112   :  { %v337_v8 = vpop.f32.mrb[25].mxu0  ;;  %v765_v9 = vpop.f32.mrb[25].mxu1  ;;  %v346_v12 = vadd.f32 %v1075_v2, %v1316_v36  ;;  %v774_v13 = vadd.f32 %v1113_v3, %v1316_v36  ;;  %v442_v24 = vsel %vm400_vm2, %v389_v10, 0.0  ;;  %v869_v25 = vsel %vm400_vm2, %v817_v11, 0.0 }
 0x113   :  { %v1076_v14 = vpop.f32.mrb[26].mxu0  ;;  %v1114_v15 = vpop.f32.mrb[26].mxu1  ;;  %v338_v18 = vadd.f32 %v1316_v36, %v337_v8  ;;  %v766_v19 = vadd.f32 %v1316_v36, %v765_v9  ;;  %v443_v26 = vadd.f32 %v442_v24, %v441_v16  ;;  %v870_v27 = vadd.f32 %v869_v25, %v868_v17 }
 0x114   :  { %v340_v20 = vpop.f32.mrb[27].mxu0  ;;  %v768_v21 = vpop.f32.mrb[27].mxu1  ;;  %v349_v32 = vadd.f32 %v1076_v14, %v1316_v36  ;;  %v777_v33 = vadd.f32 %v1114_v15, %v1316_v36  ;;  %v394_v37 = vmax.f32 %v346_v12, 0.0  ;;  %v822_v38 = vmax.f32 %v774_v13, 0.0 }
 0x115   :  { %v392_v28 = vmax.f32 %v338_v18, 0.0  ;;  %v820_v29 = vmax.f32 %v766_v19, 0.0  ;;  %v445_v34 = vadd.f32 %v444_v22, %v443_v26  ;;  %v872_v35 = vadd.f32 %v871_v23, %v870_v27 }
 0x116   :  { %v341_v41 = vadd.f32 %v1316_v36, %v340_v20  ;;  %v769_v42 = vadd.f32 %v1316_v36, %v768_v21  ;;  %v395_v49 = vmax.f32 %v349_v32, 0.0  ;;  %v823_v50 = vmax.f32 %v777_v33, 0.0 }
 0x117   :  { %v448_v39 = vsel %vm400_vm2, %v392_v28, 0.0  ;;  %v875_v40 = vsel %vm400_vm2, %v820_v29, 0.0  ;;  %v447_v45 = vadd.f32 %v446_v30, %v445_v34  ;;  %v874_v46 = vadd.f32 %v873_v31, %v872_v35 }
 0x118   :  { %v393_v51 = vmax.f32 %v341_v41, 0.0  ;;  %v821_v52 = vmax.f32 %v769_v42, 0.0  ;;  %v452_v55 = vsel %vm400_vm2, %v394_v37, 0.0  ;;  %v879_v56 = vsel %vm400_vm2, %v822_v38, 0.0 }
 0x119   :  { %v1079_v43 = vpop.f32.mrb[28].mxu0  ;;  %v1117_v44 = vpop.f32.mrb[28].mxu1  ;;  %v449_v57 = vadd.f32 %v448_v39, %v447_v45  ;;  %v876_v58 = vadd.f32 %v875_v40, %v874_v46  ;;  %v454_v5 = vsel %vm400_vm2, %v395_v49, 0.0  ;;  %v881_v6 = vsel %vm400_vm2, %v823_v50, 0.0 }
 0x11a   :  { %v353_v47 = vpop.f32.mrb[29].mxu0  ;;  %v781_v48 = vpop.f32.mrb[29].mxu1  ;;  %v450_v61 = vsel %vm400_vm2, %v393_v51, 0.0  ;;  %v877_v62 = vsel %vm400_vm2, %v821_v52, 0.0  ;;  %v362_v3 = vadd.f32 %v1079_v43, %v1316_v36  ;;  %v790_v4 = vadd.f32 %v1117_v44, %v1316_v36 }
 0x11b   :  { %v1080_v53 = vpop.f32.mrb[30].mxu0  ;;  %v1118_v54 = vpop.f32.mrb[30].mxu1  ;;  %v354_v63 = vadd.f32 %v1316_v36, %v353_v47  ;;  %v782_v0 = vadd.f32 %v1316_v36, %v781_v48  ;;  %v451_v1 = vadd.f32 %v450_v61, %v449_v57  ;;  %v878_v2 = vadd.f32 %v877_v62, %v876_v58 }
 0x11c   :  { %v356_v59 = vpop.f32.mrb[31].mxu0  ;;  %v784_v60 = vpop.f32.mrb[31].mxu1  ;;  %v365_v15 = vadd.f32 %v1080_v53, %v1316_v36  ;;  %v793_v16 = vadd.f32 %v1118_v54, %v1316_v36  ;;  %v398_v21 = vmax.f32 %v362_v3, 0.0  ;;  %v826_v22 = vmax.f32 %v790_v4, 0.0 }
 0x11d   :  { %v396_v7 = vmax.f32 %v354_v63, 0.0  ;;  %v824_v8 = vmax.f32 %v782_v0, 0.0  ;;  %v453_v9 = vadd.f32 %v452_v55, %v451_v1  ;;  %v880_v10 = vadd.f32 %v879_v56, %v878_v2 }
 0x11e   :  { %v357_v11 = vadd.f32 %v1316_v36, %v356_v59  ;;  %v785_v12 = vadd.f32 %v1316_v36, %v784_v60  ;;  %v399_v27 = vmax.f32 %v365_v15, 0.0  ;;  %v827_v28 = vmax.f32 %v793_v16, 0.0 }
 0x11f   :  { %v456_v13 = vsel %vm400_vm2, %v396_v7, 0.0  ;;  %v883_v14 = vsel %vm400_vm2, %v824_v8, 0.0  ;;  %v455_v17 = vadd.f32 %v454_v5, %v453_v9  ;;  %v882_v18 = vadd.f32 %v881_v6, %v880_v10 }
 0x120   :  { %v397_v19 = vmax.f32 %v357_v11, 0.0  ;;  %v825_v20 = vmax.f32 %v785_v12, 0.0  ;;  %v460_v31 = vsel %vm400_vm2, %v398_v21, 0.0  ;;  %v887_v36 = vsel %vm400_vm2, %v826_v22, 0.0 }
 0x121   :  { %v457_v23 = vadd.f32 %v456_v13, %v455_v17  ;;  %v884_v24 = vadd.f32 %v883_v14, %v882_v18  ;;  %v462_v34 = vsel %vm400_vm2, %v399_v27, 0.0  ;;  %v889_v35 = vsel %vm400_vm2, %v827_v28, 0.0 }
 0x122   :  { %v458_v25 = vsel %vm400_vm2, %v397_v19, 0.0  ;;  %v885_v26 = vsel %vm400_vm2, %v825_v20, 0.0 }
 0x123   :  { %v459_v29 = vadd.f32 %v458_v25, %v457_v23  ;;  %v886_v30 = vadd.f32 %v885_v26, %v884_v24 }
 0x125   :  { %v461_v32 = vadd.f32 %v460_v31, %v459_v29  ;;  %v888_v33 = vadd.f32 %v887_v36, %v886_v30 }
 0x127   :  { %v463_v37 = vadd.f32 %v462_v34, %v461_v32  ;;  %v890_v38 = vadd.f32 %v889_v35, %v888_v33 }
 0x129   :  { %v464_v39 = vrot.slane %v463_v37, 4  ;;  %v891_v40 = vrot.slane %v890_v38, 4 }
 0x12b   :  { %v465_v41 = vadd.f32 %v464_v39, %v463_v37  ;;  %v892_v42 = vadd.f32 %v891_v40, %v890_v38 }
 0x12d   :  { %v466_v43 = vrot.slane %v465_v41, 2  ;;  %v893_v44 = vrot.slane %v892_v42, 2 }
 0x12f   :  { %v467_v45 = vadd.f32 %v466_v43, %v465_v41  ;;  %v894_v46 = vadd.f32 %v893_v44, %v892_v42 }
 0x131   :  { %v468_v47 = vrot.slane %v467_v45, 1  ;;  %v895_v48 = vrot.slane %v894_v46, 1 }
 0x133   :  { %v469_v49 = vadd.f32 %v468_v47, %v467_v45  ;;  %v896_v50 = vadd.f32 %v895_v48, %v894_v46 }
 0x135   :  { %v471_v51 = vmul.f32 0.00390625, %v469_v49  ;;  %v897_v52 = vmul.f32 0.00390625, %v896_v50 }
 0x137   :  { %473 = vst.msk [vmem:[%s1461_s3] sm:$0x1] %vm472_vm3, %v471_v51  ;;  %1004 = vst.msk [vmem:[%s1461_s3 + $0x1] sm:$0x1] %vm472_vm3, %v897_v52 }

// kernel: encoder_to_decoder_forward.13
= control target key start
LH: loop header
LB: loop body
LE: loop exit
PB: predicated region body
PF: predicated region fallthrough
CT: control target
= control target key end

     0   :  { %v374_v0 = vmov 0.0   ;;  %vm375_vm0 = vmmov 0   ;;  %s473_s1 = inlined_call_operand.vmem [shape: bf16[128,128], index: 1, kind: input, shape index: {}]   ;;  %s474_s0 = inlined_call_operand.vmem [shape: bf16[80,128], index: 0, kind: input, shape index: {}]   ;;  %s475_s2 = inlined_call_operand.vmem [shape: f32[1,128], index: 2, kind: input, shape index: {}]   ;;  %s476_s3 = inlined_call_operand.vmem [shape: f32[80,128], index: 3, kind: output, shape index: {}]  }
   0x1   :  { %307 = vmatprep.subr.bf16.mxu0 %v374_v0  ;;  %v361_v1 = vld [vmem:[%s473_s1] sm:$0xff]   ;;  %343 = vmatprep.subr.bf16.mxu1 %v374_v0  ;;  %v362_v2 = vld [vmem:[%s473_s1 + $0x8] sm:$0xff]   ;;  %v363_v3 = vld [vmem:[%s473_s1 + $0x10] sm:$0xff]  }
   0x2   :  { %323 = vmatprep.mubr.msk.bf16.mxu0 %vm375_vm0, %v374_v0  ;;  %335 = vmatprep.mubr.msk.bf16.mxu1 %vm375_vm0, %v374_v0  ;;  %v364_v4 = vld [vmem:[%s473_s1 + $0x18] sm:$0xff]   ;;  %v365_v5 = vld [vmem:[%s473_s1 + $0x20] sm:$0xff]   ;;  %v366_v6 = vld [vmem:[%s473_s1 + $0x28] sm:$0xff]  }
   0x3   :  { %308 = vmatpush3.bf16.msra.mxu0 %v361_v1  ;;  %351 = vmatpush3.bf16.msra.mxu1 %v361_v1  ;;  %v367_v7 = vld [vmem:[%s473_s1 + $0x30] sm:$0xff]   ;;  %v368_v8 = vld [vmem:[%s473_s1 + $0x38] sm:$0xff]   ;;  %v369_v9 = vld [vmem:[%s474_s0] sm:$0xff]  }
   0x4   :  { %309 = vmatprep.subr.bf16.mxu0 %v374_v0  ;;  %344 = vmatprep.subr.bf16.mxu1 %v374_v0  ;;  %v370_v10 = vld [vmem:[%s474_s0 + $0x18] sm:$0xff]   ;;  %v371_v11 = vld [vmem:[%s474_s0 + $0x8] sm:$0xff]   ;;  %v372_v12 = vld [vmem:[%s474_s0 + $0x20] sm:$0xff]  }
   0x5   :  { %v373_v13 = vld [vmem:[%s474_s0 + $0x10] sm:$0xff]   ;;  %v293_v14 = vld [vmem:[%s475_s2] ss:$0 sm:$0xff] }
   0x7   :  { %310 = vmatpush3.bf16.msra.mxu0 %v362_v2  ;;  %352 = vmatpush3.bf16.msra.mxu1 %v362_v2 }
   0x8   :  { %311 = vmatprep.subr.bf16.mxu0 %v374_v0  ;;  %345 = vmatprep.subr.bf16.mxu1 %v374_v0 }
   0xb   :  { %312 = vmatpush3.bf16.msra.mxu0 %v363_v3  ;;  %353 = vmatpush3.bf16.msra.mxu1 %v363_v3 }
   0xc   :  { %313 = vmatprep.subr.bf16.mxu0 %v374_v0  ;;  %346 = vmatprep.subr.bf16.mxu1 %v374_v0 }
   0xf   :  { %314 = vmatpush3.bf16.msra.mxu0 %v364_v4  ;;  %354 = vmatpush3.bf16.msra.mxu1 %v364_v4 }
  0x10   :  { %315 = vmatprep.subr.bf16.mxu0 %v374_v0  ;;  %347 = vmatprep.subr.bf16.mxu1 %v374_v0 }
  0x13   :  { %316 = vmatpush3.bf16.msra.mxu0 %v365_v5  ;;  %355 = vmatpush3.bf16.msra.mxu1 %v365_v5 }
  0x14   :  { %317 = vmatprep.subr.bf16.mxu0 %v374_v0  ;;  %348 = vmatprep.subr.bf16.mxu1 %v374_v0 }
  0x17   :  { %318 = vmatpush3.bf16.msra.mxu0 %v366_v6  ;;  %356 = vmatpush3.bf16.msra.mxu1 %v366_v6 }
  0x18   :  { %319 = vmatprep.subr.bf16.mxu0 %v374_v0  ;;  %349 = vmatprep.subr.bf16.mxu1 %v374_v0 }
  0x1b   :  { %320 = vmatpush3.bf16.msra.mxu0 %v367_v7  ;;  %357 = vmatpush3.bf16.msra.mxu1 %v367_v7 }
  0x1c   :  { %321 = vmatprep.subr.bf16.mxu0 %v374_v0  ;;  %350 = vmatprep.subr.bf16.mxu1 %v374_v0 }
  0x1f   :  { %322 = vmatpush3.bf16.msra.mxu0 %v368_v8  ;;  %358 = vmatpush3.bf16.msra.mxu1 %v368_v8 }
  0x22   :  { %324 = vmatmul.mubr.bf16.vlgmr.msra.gmra.mrb[0].mxu0 %v369_v9  ;;  %336 = vmatmul.mubr.bf16.vlgmr.msra.gmra.mrb[0].mxu1 %v370_v10 }
  0x23   :  { %327 = vmatprep.mubr.msk.bf16.mxu0 %vm375_vm0, %v374_v0  ;;  %339 = vmatprep.mubr.msk.bf16.mxu1 %vm375_vm0, %v374_v0 }
  0x2a   :  { %328 = vmatmul.mubr.bf16.gmra.mrb[4].mxu0 %v371_v11  ;;  %340 = vmatmul.mubr.bf16.gmra.mrb[4].mxu1 %v372_v12 }
  0x2b   :  { %331 = vmatprep.mubr.msk.bf16.mxu0 %vm375_vm0, %v374_v0 }
  0x32   :  { %332 = vmatmul.mubr.bf16.gmra.mrb[8].mxu0 %v373_v13 }
  0xf5   :  { %v177_v15 = vpop.f32.mrb[0].mxu0  ;;  %v201_v16 = vpop.f32.mrb[0].mxu1 }
  0xf6   :  { %v256_v17 = vadd.f32 %v293_v14, %v177_v15  ;;  %v325_v18 = vpop.f32.mrb[1].mxu0  ;;  %v262_v19 = vadd.f32 %v293_v14, %v201_v16  ;;  %v337_v20 = vpop.f32.mrb[1].mxu1 }
  0xf7   :  { %v180_v21 = vpop.f32.mrb[2].mxu0  ;;  %v204_v22 = vpop.f32.mrb[2].mxu1 }
  0xf8   :  { %266 = vst [vmem:[%s476_s3] sm:$0xff] %v256_v17  ;;  %v257_v23 = vadd.f32 %v293_v14, %v180_v21  ;;  %v326_v24 = vpop.f32.mrb[3].mxu0  ;;  %272 = vst [vmem:[%s476_s3 + $0x30] sm:$0xff] %v262_v19  ;;  %v263_v25 = vadd.f32 %v293_v14, %v204_v22  ;;  %v338_v26 = vpop.f32.mrb[3].mxu1 }
  0xfa   :  { %267 = vst [vmem:[%s476_s3 + $0x8] sm:$0xff] %v257_v23  ;;  %273 = vst [vmem:[%s476_s3 + $0x38] sm:$0xff] %v263_v25 }
  0xfd   :  { %v185_v27 = vpop.f32.mrb[4].mxu0  ;;  %v209_v28 = vpop.f32.mrb[4].mxu1 }
  0xfe   :  { %v258_v29 = vadd.f32 %v293_v14, %v185_v27  ;;  %v329_v30 = vpop.f32.mrb[5].mxu0  ;;  %v264_v31 = vadd.f32 %v293_v14, %v209_v28  ;;  %v341_v32 = vpop.f32.mrb[5].mxu1 }
  0xff   :  { %v188_v33 = vpop.f32.mrb[6].mxu0  ;;  %v212_v34 = vpop.f32.mrb[6].mxu1 }
 0x100   :  { %268 = vst [vmem:[%s476_s3 + $0x10] sm:$0xff] %v258_v29  ;;  %v259_v35 = vadd.f32 %v293_v14, %v188_v33  ;;  %v330_v36 = vpop.f32.mrb[7].mxu0  ;;  %274 = vst [vmem:[%s476_s3 + $0x40] sm:$0xff] %v264_v31  ;;  %v265_v37 = vadd.f32 %v293_v14, %v212_v34  ;;  %v342_v38 = vpop.f32.mrb[7].mxu1 }
 0x102   :  { %269 = vst [vmem:[%s476_s3 + $0x18] sm:$0xff] %v259_v35  ;;  %275 = vst [vmem:[%s476_s3 + $0x48] sm:$0xff] %v265_v37 }
 0x105   :  { %v193_v39 = vpop.f32.mrb[8].mxu0 }
 0x106   :  { %v260_v40 = vadd.f32 %v293_v14, %v193_v39  ;;  %v333_v41 = vpop.f32.mrb[9].mxu0 }
 0x107   :  { %v196_v42 = vpop.f32.mrb[10].mxu0 }
 0x108   :  { %270 = vst [vmem:[%s476_s3 + $0x20] sm:$0xff] %v260_v40  ;;  %v261_v43 = vadd.f32 %v293_v14, %v196_v42  ;;  %v334_v44 = vpop.f32.mrb[11].mxu0 }
 0x10a   :  { %271 = vst [vmem:[%s476_s3 + $0x28] sm:$0xff] %v261_v43 }

// kernel: encoder_to_decoder_forward.10
= control target key start
LH: loop header
LB: loop body
LE: loop exit
PB: predicated region body
PF: predicated region fallthrough
CT: control target
= control target key end

     0   :  { %v1594_v1 = vmov 0   ;;  %s2347_s1 = inlined_call_operand.vmem [shape: bf16[128,512], index: 1, kind: input, shape index: {}]   ;;  %s2348_s0 = inlined_call_operand.vmem [shape: bf16[9,8,512], index: 0, kind: input, shape index: {}]   ;;  %s2349_s2 = inlined_call_operand.vmem [shape: bf16[9,8,128], index: 2, kind: output, shape index: {}]  }
   0x1   :  { %v1613_v0 = vld [vmem:[%s2347_s1 + $0x4] ss:$16 sps:$4 sm:$0xff]   ;;  %242 = vmatprep.mubr.bf16.mxu0 %v1594_v1  ;;  %283 = vmatprep.mubr.bf16.mxu1 %v1594_v1  ;;  %v1620_v2 = vld [vmem:[%s2347_s1] ss:$16 sps:$4 sm:$0xff]   ;;  %v1643_v6 = vld [vmem:[%s2347_s1 + $0xc] ss:$16 sps:$4 sm:$0xff]  }
   0x2   :  { %210 = vmatprep.subr.bf16.mxu0 %v1613_v0  ;;  %v1626_v3 = vld [vmem:[%s2347_s1 + $0x24] ss:$16 sps:$4 sm:$0xff]   ;;  %v1632_v4 = vld [vmem:[%s2347_s1 + $0x20] ss:$16 sps:$4 sm:$0xff]   ;;  %v1648_v7 = vld [vmem:[%s2347_s1 + $0x8] ss:$16 sps:$4 sm:$0xff]   ;;  %251 = vmatprep.subr.bf16.mxu1 %v1643_v6 }
   0x3   :  { %211 = vmatpush1.bf16.msra.mxu0 %v1620_v2  ;;  %v1638_v5 = vld [vmem:[%s2347_s1 + $0x44] ss:$16 sps:$4 sm:$0xff]   ;;  %v1654_v8 = vld [vmem:[%s2347_s1 + $0x40] ss:$16 sps:$4 sm:$0xff]   ;;  %252 = vmatpush1.bf16.msra.mxu1 %v1648_v7  ;;  %v1667_v10 = vld [vmem:[%s2347_s1 + $0x2c] ss:$16 sps:$4 sm:$0xff]  }
   0x4   :  { %212 = vmatprep.subr.bf16.mxu0 %v1626_v3  ;;  %v1661_v9 = vld [vmem:[%s2347_s1 + $0x64] ss:$16 sps:$4 sm:$0xff]   ;;  %v1672_v11 = vld [vmem:[%s2347_s1 + $0x28] ss:$16 sps:$4 sm:$0xff]   ;;  %253 = vmatprep.subr.bf16.mxu1 %v1667_v10  ;;  %v1679_v12 = vld [vmem:[%s2347_s1 + $0x60] ss:$16 sps:$4 sm:$0xff]  }
   0x5   :  { %v1684_v13 = vld [vmem:[%s2347_s1 + $0x84] ss:$16 sps:$4 sm:$0xff]   ;;  %v1689_v14 = vld [vmem:[%s2347_s1 + $0x4c] ss:$16 sps:$4 sm:$0xff]   ;;  %v1696_v15 = vld [vmem:[%s2347_s1 + $0x48] ss:$16 sps:$4 sm:$0xff]  }
   0x6   :  { %v1702_v16 = vld [vmem:[%s2347_s1 + $0x6c] ss:$16 sps:$4 sm:$0xff]   ;;  %v1708_v17 = vld [vmem:[%s2347_s1 + $0x80] ss:$16 sps:$4 sm:$0xff]   ;;  %v1714_v18 = vld [vmem:[%s2347_s1 + $0xa4] ss:$16 sps:$4 sm:$0xff]  }
   0x7   :  { %213 = vmatpush1.bf16.msra.mxu0 %v1632_v4  ;;  %254 = vmatpush1.bf16.msra.mxu1 %v1672_v11  ;;  %v1720_v19 = vld [vmem:[%s2347_s1 + $0x68] ss:$16 sps:$4 sm:$0xff]   ;;  %v1726_v20 = vld [vmem:[%s2347_s1 + $0x8c] ss:$16 sps:$4 sm:$0xff]   ;;  %v1732_v21 = vld [vmem:[%s2347_s1 + $0xa0] ss:$16 sps:$4 sm:$0xff]  }
   0x8   :  { %214 = vmatprep.subr.bf16.mxu0 %v1638_v5  ;;  %255 = vmatprep.subr.bf16.mxu1 %v1689_v14  ;;  %v1737_v22 = vld [vmem:[%s2347_s1 + $0xc4] ss:$16 sps:$4 sm:$0xff]   ;;  %v1744_v23 = vld [vmem:[%s2347_s1 + $0x88] ss:$16 sps:$4 sm:$0xff]   ;;  %v1750_v24 = vld [vmem:[%s2347_s1 + $0xac] ss:$16 sps:$4 sm:$0xff]  }
   0x9   :  { %v1756_v25 = vld [vmem:[%s2347_s1 + $0xc0] ss:$16 sps:$4 sm:$0xff]   ;;  %v1762_v26 = vld [vmem:[%s2347_s1 + $0xe4] ss:$16 sps:$4 sm:$0xff]   ;;  %v1768_v27 = vld [vmem:[%s2347_s1 + $0xa8] ss:$16 sps:$4 sm:$0xff]  }
   0xa   :  { %v1774_v28 = vld [vmem:[%s2347_s1 + $0xcc] ss:$16 sps:$4 sm:$0xff]   ;;  %v1780_v29 = vld [vmem:[%s2347_s1 + $0xe0] ss:$16 sps:$4 sm:$0xff]   ;;  %v1787_v30 = vld [vmem:[%s2347_s1 + $0xc8] ss:$16 sps:$4 sm:$0xff]  }
   0xb   :  { %215 = vmatpush1.bf16.msra.mxu0 %v1654_v8  ;;  %256 = vmatpush1.bf16.msra.mxu1 %v1696_v15  ;;  %v1793_v31 = vld [vmem:[%s2347_s1 + $0xec] ss:$16 sps:$4 sm:$0xff]   ;;  %v1800_v32 = vld [vmem:[%s2347_s1 + $0xe8] ss:$16 sps:$4 sm:$0xff]   ;;  %v44_v33 = vld [vmem:[%s2348_s0] sm:$0xff] }
   0xc   :  { %216 = vmatprep.subr.bf16.mxu0 %v1661_v9  ;;  %257 = vmatprep.subr.bf16.mxu1 %v1702_v16  ;;  %v46_v34 = vunpack.c.l.bf16 %v44_v33  ;;  %v47_v35 = vunpack.c.h.bf16 %v44_v33  ;;  %v45_v37 = vld [vmem:[%s2348_s0 + $0x8] sm:$0xff] }
   0xd   :  { %v49_v44 = vunpack.c.h.bf16 %v45_v37  ;;  %v48_v50 = vunpack.c.l.bf16 %v45_v37 }
   0xf   :  { %217 = vmatpush1.bf16.msra.mxu0 %v1679_v12  ;;  %258 = vmatpush1.bf16.msra.mxu1 %v1720_v19 }
  0x10   :  { %218 = vmatprep.subr.bf16.mxu0 %v1684_v13  ;;  %259 = vmatprep.subr.bf16.mxu1 %v1726_v20 }
  0x13   :  { %219 = vmatpush1.bf16.msra.mxu0 %v1708_v17  ;;  %260 = vmatpush1.bf16.msra.mxu1 %v1744_v23 }
  0x14   :  { %220 = vmatprep.subr.bf16.mxu0 %v1714_v18  ;;  %261 = vmatprep.subr.bf16.mxu1 %v1750_v24 }
  0x17   :  { %221 = vmatpush1.bf16.msra.mxu0 %v1732_v21  ;;  %262 = vmatpush1.bf16.msra.mxu1 %v1768_v27 }
  0x18   :  { %222 = vmatprep.subr.bf16.mxu0 %v1737_v22  ;;  %263 = vmatprep.subr.bf16.mxu1 %v1774_v28 }
  0x1b   :  { %223 = vmatpush1.bf16.msra.mxu0 %v1756_v25  ;;  %264 = vmatpush1.bf16.msra.mxu1 %v1787_v30 }
  0x1c   :  { %224 = vmatprep.subr.bf16.mxu0 %v1762_v26  ;;  %265 = vmatprep.subr.bf16.mxu1 %v1793_v31 }
  0x1f   :  { %225 = vmatpush1.bf16.msra.mxu0 %v1780_v29  ;;  %266 = vmatpush1.bf16.msra.mxu1 %v1800_v32 }
  0x20   :  { %329 = vmatprep.subr.bf16.mxu0 %v1613_v0  ;;  %370 = vmatprep.subr.bf16.mxu1 %v1643_v6 }
  0x22   :  { %243 = vmatmul.mubr.bf16.vlgmr.msra.gmra.mrb[0].mxu0 %v1594_v1  ;;  %284 = vmatmul.mubr.bf16.vlgmr.msra.gmra.mrb[0].mxu1 %v1594_v1 }
  0x23   :  { %330 = vmatpush1.bf16.msra.mxu0 %v1620_v2  ;;  %361 = vmatprep.mubr.bf16.mxu0 %v1594_v1 }
  0x24   :  { %331 = vmatprep.subr.bf16.mxu0 %v1626_v3  ;;  %371 = vmatpush1.bf16.msra.mxu1 %v1648_v7 }
  0x25   :  { %372 = vmatprep.subr.bf16.mxu1 %v1667_v10  ;;  %402 = vmatprep.mubr.bf16.mxu1 %v1594_v1 }
  0x27   :  { %332 = vmatpush1.bf16.msra.mxu0 %v1632_v4 }
  0x28   :  { %333 = vmatprep.subr.bf16.mxu0 %v1638_v5  ;;  %373 = vmatpush1.bf16.msra.mxu1 %v1672_v11 }
  0x29   :  { %374 = vmatprep.subr.bf16.mxu1 %v1689_v14 }
  0x2b   :  { %334 = vmatpush1.bf16.msra.mxu0 %v1654_v8 }
  0x2c   :  { %335 = vmatprep.subr.bf16.mxu0 %v1661_v9  ;;  %375 = vmatpush1.bf16.msra.mxu1 %v1696_v15 }
  0x2d   :  { %376 = vmatprep.subr.bf16.mxu1 %v1702_v16 }
  0x2f   :  { %336 = vmatpush1.bf16.msra.mxu0 %v1679_v12 }
  0x30   :  { %337 = vmatprep.subr.bf16.mxu0 %v1684_v13  ;;  %377 = vmatpush1.bf16.msra.mxu1 %v1720_v19 }
  0x31   :  { %378 = vmatprep.subr.bf16.mxu1 %v1726_v20 }
  0x33   :  { %338 = vmatpush1.bf16.msra.mxu0 %v1708_v17 }
  0x34   :  { %339 = vmatprep.subr.bf16.mxu0 %v1714_v18  ;;  %379 = vmatpush1.bf16.msra.mxu1 %v1744_v23 }
  0x35   :  { %380 = vmatprep.subr.bf16.mxu1 %v1750_v24 }
  0x37   :  { %340 = vmatpush1.bf16.msra.mxu0 %v1732_v21 }
  0x38   :  { %341 = vmatprep.subr.bf16.mxu0 %v1737_v22  ;;  %381 = vmatpush1.bf16.msra.mxu1 %v1768_v27 }
  0x39   :  { %382 = vmatprep.subr.bf16.mxu1 %v1774_v28 }
  0x3b   :  { %342 = vmatpush1.bf16.msra.mxu0 %v1756_v25 }
  0x3c   :  { %343 = vmatprep.subr.bf16.mxu0 %v1762_v26  ;;  %383 = vmatpush1.bf16.msra.mxu1 %v1787_v30 }
  0x3d   :  { %384 = vmatprep.subr.bf16.mxu1 %v1793_v31 }
  0x3f   :  { %344 = vmatpush1.bf16.msra.mxu0 %v1780_v29 }
  0x40   :  { %449 = vmatprep.subr.bf16.mxu0 %v1613_v0  ;;  %385 = vmatpush1.bf16.msra.mxu1 %v1800_v32 }
  0x41   :  { %490 = vmatprep.subr.bf16.mxu1 %v1643_v6 }
  0xf5   :  { %v244_v36 = vpop.f32.mrb[0].mxu0  ;;  %v285_v46 = vpop.f32.mrb[0].mxu1 }
  0xf6   :  { %v292_v38 = vadd.f32 %v244_v36, %v46_v34  ;;  %v246_v39 = vpop.f32.mrb[1].mxu0  ;;  %v287_v47 = vpop.f32.mrb[1].mxu1  ;;  %v294_v53 = vadd.f32 %v285_v46, %v48_v50 }
  0xf7   :  { %v293_v40 = vadd.f32 %v246_v39, %v47_v35  ;;  %v248_v41 = vpop.f32.mrb[2].mxu0  ;;  %v295_v48 = vadd.f32 %v287_v47, %v49_v44  ;;  %v289_v49 = vpop.f32.mrb[2].mxu1  ;;  %v1321_v39 = vld [vmem:[%s2348_s0 + $0x10] sm:$0xff] }
  0xf8   :  { %v1318_v42 = vmul.f32 -1.442695, %v292_v38  ;;  %v249_v43 = vpop.f32.mrb[3].mxu0  ;;  %v290_v51 = vpop.f32.mrb[3].mxu1  ;;  %v326_v41 = vunpack.c.h.bf16 %v1321_v39 }
  0xf9   :  { %v1319_v45 = vmul.f32 -1.442695, %v293_v40  ;;  %v1320_v52 = vmul.f32 -1.442695, %v295_v48  ;;  %v325_v40 = vunpack.c.l.bf16 %v1321_v39 }
  0xfa   :  { %1418 = vpow2.f32 %v1318_v42 }
  0xfb   :  { %1420 = vpow2.f32 %v1319_v45  ;;  %v1322_v45 = vld [vmem:[%s2348_s0 + $0x18] sm:$0xff] }
  0xfc   :  { %1422 = vpow2.f32 %v1320_v52 }
  0xfd   :  { %1424 = vtanh.f32 %v294_v53 }
 0x104   :  { %v1419_v54 = vpop.eup %1418 }
 0x105   :  { %v1421_v55 = vpop.eup %1420  ;;  %v299_v56 = vadd.f32 1.0, %v1419_v54 }
 0x106   :  { %v305_v57 = vadd.f32 1.0, %v1421_v55  ;;  %v1423_v58 = vpop.eup %1422  ;;  %v328_v55 = vunpack.c.h.bf16 %v1322_v45 }
 0x107   :  { %1426 = vrcp.f32 %v299_v56  ;;  %v1425_v59 = vpop.eup %1424  ;;  %v312_v61 = vadd.f32 1.0, %v1423_v58 }
 0x108   :  { %1428 = vrcp.f32 %v305_v57  ;;  %v327_v57 = vunpack.c.l.bf16 %v1322_v45 }
 0x109   :  { %1430 = vrcp.f32 %v312_v61 }
 0x111   :  { %v1427_v60 = vpop.eup %1426 }
 0x112   :  { %v1429_v62 = vpop.eup %1428  ;;  %v316_v63 = vmul.f32 %v1427_v60, %v1425_v59 }
 0x113   :  { %v315_v33 = vmul.f32 0.0, %v1429_v62  ;;  %v1431_v35 = vpop.eup %1430 }
 0x115   :  { %v1848_v34 = vadd.f32 %v316_v63, %v315_v33 }
 0x117   :  { %1432 = vtanh.f32 %v1848_v34 }
 0x121   :  { %v1433_v36 = vpop.eup %1432 }
 0x122   :  { %v319_v37 = vmul.f32 %v1433_v36, %v1431_v35 }
 0x124   :  { %v320_v38 = vpack.c.bf16 %v319_v37, %v319_v37 }
 0x126   :  { %321 = vst [vmem:[%s2349_s2] sm:$0xf] %v320_v38  ;;  %362 = vmatmul.mubr.bf16.vlgmr.msra.gmra.mrb[4].mxu0 %v320_v38  ;;  %403 = vmatmul.mubr.bf16.vlgmr.msra.gmra.mrb[4].mxu1 %v320_v38 }
 0x127   :  { %450 = vmatpush1.bf16.msra.mxu0 %v1620_v2  ;;  %491 = vmatpush1.bf16.msra.mxu1 %v1648_v7 }
 0x128   :  { %451 = vmatprep.subr.bf16.mxu0 %v1626_v3  ;;  %492 = vmatprep.subr.bf16.mxu1 %v1667_v10 }
 0x129   :  { %481 = vmatprep.mubr.bf16.mxu0 %v1594_v1  ;;  %522 = vmatprep.mubr.bf16.mxu1 %v1594_v1 }
 0x12b   :  { %452 = vmatpush1.bf16.msra.mxu0 %v1632_v4  ;;  %493 = vmatpush1.bf16.msra.mxu1 %v1672_v11 }
 0x12c   :  { %453 = vmatprep.subr.bf16.mxu0 %v1638_v5  ;;  %494 = vmatprep.subr.bf16.mxu1 %v1689_v14 }
 0x12f   :  { %454 = vmatpush1.bf16.msra.mxu0 %v1654_v8  ;;  %495 = vmatpush1.bf16.msra.mxu1 %v1696_v15 }
 0x130   :  { %455 = vmatprep.subr.bf16.mxu0 %v1661_v9  ;;  %496 = vmatprep.subr.bf16.mxu1 %v1702_v16 }
 0x133   :  { %456 = vmatpush1.bf16.msra.mxu0 %v1679_v12  ;;  %497 = vmatpush1.bf16.msra.mxu1 %v1720_v19 }
 0x134   :  { %457 = vmatprep.subr.bf16.mxu0 %v1684_v13  ;;  %498 = vmatprep.subr.bf16.mxu1 %v1726_v20 }
 0x137   :  { %458 = vmatpush1.bf16.msra.mxu0 %v1708_v17  ;;  %499 = vmatpush1.bf16.msra.mxu1 %v1744_v23 }
 0x138   :  { %459 = vmatprep.subr.bf16.mxu0 %v1714_v18  ;;  %500 = vmatprep.subr.bf16.mxu1 %v1750_v24 }
 0x13b   :  { %460 = vmatpush1.bf16.msra.mxu0 %v1732_v21  ;;  %501 = vmatpush1.bf16.msra.mxu1 %v1768_v27 }
 0x13c   :  { %461 = vmatprep.subr.bf16.mxu0 %v1737_v22  ;;  %502 = vmatprep.subr.bf16.mxu1 %v1774_v28 }
 0x13f   :  { %462 = vmatpush1.bf16.msra.mxu0 %v1756_v25  ;;  %503 = vmatpush1.bf16.msra.mxu1 %v1787_v30 }
 0x140   :  { %463 = vmatprep.subr.bf16.mxu0 %v1762_v26  ;;  %504 = vmatprep.subr.bf16.mxu1 %v1793_v31 }
 0x143   :  { %464 = vmatpush1.bf16.msra.mxu0 %v1780_v29  ;;  %505 = vmatpush1.bf16.msra.mxu1 %v1800_v32 }
 0x144   :  { %569 = vmatprep.subr.bf16.mxu0 %v1613_v0  ;;  %610 = vmatprep.subr.bf16.mxu1 %v1643_v6 }
 0x1f9   :  { %v363_v42 = vpop.f32.mrb[4].mxu0  ;;  %v404_v43 = vpop.f32.mrb[4].mxu1 }
 0x1fa   :  { %v411_v44 = vadd.f32 %v363_v42, %v325_v40  ;;  %v365_v46 = vpop.f32.mrb[5].mxu0  ;;  %v406_v47 = vpop.f32.mrb[5].mxu1  ;;  %v413_v59 = vadd.f32 %v404_v43, %v327_v57 }
 0x1fb   :  { %v412_v48 = vadd.f32 %v365_v46, %v326_v41  ;;  %v367_v49 = vpop.f32.mrb[6].mxu0  ;;  %v408_v50 = vpop.f32.mrb[6].mxu1  ;;  %v414_v56 = vadd.f32 %v406_v47, %v328_v55 }
 0x1fc   :  { %v1323_v51 = vmul.f32 -1.442695, %v411_v44  ;;  %v368_v52 = vpop.f32.mrb[7].mxu0  ;;  %v409_v53 = vpop.f32.mrb[7].mxu1 }
 0x1fd   :  { %v1324_v54 = vmul.f32 -1.442695, %v412_v48  ;;  %v1325_v58 = vmul.f32 -1.442695, %v414_v56 }
 0x1fe   :  { %1434 = vpow2.f32 %v1323_v51  ;;  %v1328_v51 = vld [vmem:[%s2348_s0 + $0x28] sm:$0xff] }
 0x1ff   :  { %1436 = vpow2.f32 %v1324_v54 }
 0x200   :  { %1438 = vpow2.f32 %v1325_v58 }
 0x201   :  { %1440 = vtanh.f32 %v413_v59 }
 0x208   :  { %v1435_v60 = vpop.eup %1434 }
 0x209   :  { %v1437_v61 = vpop.eup %1436  ;;  %v418_v62 = vadd.f32 1.0, %v1435_v60 }
 0x20a   :  { %v424_v63 = vadd.f32 1.0, %v1437_v61  ;;  %v1439_v33 = vpop.eup %1438  ;;  %v448_v61 = vunpack.c.h.bf16 %v1328_v51 }
 0x20b   :  { %1442 = vrcp.f32 %v418_v62  ;;  %v1441_v35 = vpop.eup %1440  ;;  %v431_v39 = vadd.f32 1.0, %v1439_v33 }
 0x20c   :  { %1444 = vrcp.f32 %v424_v63  ;;  %v447_v63 = vunpack.c.l.bf16 %v1328_v51 }
 0x20d   :  { %1446 = vrcp.f32 %v431_v39 }
 0x215   :  { %v1443_v36 = vpop.eup %1442 }
 0x216   :  { %v1445_v37 = vpop.eup %1444  ;;  %v435_v38 = vmul.f32 %v1443_v36, %v1441_v35 }
 0x217   :  { %v434_v40 = vmul.f32 %v1445_v37, %v1848_v34  ;;  %v1447_v42 = vpop.eup %1446  ;;  %v1327_v34 = vld [vmem:[%s2348_s0 + $0x20] sm:$0xff] }
 0x218   :  { %v445_v46 = vunpack.c.l.bf16 %v1327_v34  ;;  %v446_v47 = vunpack.c.h.bf16 %v1327_v34 }
 0x219   :  { %v1895_v41 = vadd.f32 %v435_v38, %v434_v40 }
 0x21b   :  { %1448 = vtanh.f32 %v1895_v41 }
 0x225   :  { %v1449_v43 = vpop.eup %1448 }
 0x226   :  { %v438_v44 = vmul.f32 %v1449_v43, %v1447_v42 }
 0x228   :  { %v439_v45 = vpack.c.bf16 %v438_v44, %v438_v44 }
 0x22a   :  { %1326 = vst [vmem:[%s2349_s2 + $0x4] sm:$0xf] %v439_v45  ;;  %482 = vmatmul.mubr.bf16.vlgmr.msra.gmra.mrb[8].mxu0 %v439_v45  ;;  %523 = vmatmul.mubr.bf16.vlgmr.msra.gmra.mrb[8].mxu1 %v439_v45 }
 0x22b   :  { %570 = vmatpush1.bf16.msra.mxu0 %v1620_v2  ;;  %611 = vmatpush1.bf16.msra.mxu1 %v1648_v7 }
 0x22c   :  { %571 = vmatprep.subr.bf16.mxu0 %v1626_v3  ;;  %612 = vmatprep.subr.bf16.mxu1 %v1667_v10 }
 0x22d   :  { %601 = vmatprep.mubr.bf16.mxu0 %v1594_v1  ;;  %642 = vmatprep.mubr.bf16.mxu1 %v1594_v1 }
 0x22f   :  { %572 = vmatpush1.bf16.msra.mxu0 %v1632_v4  ;;  %613 = vmatpush1.bf16.msra.mxu1 %v1672_v11 }
 0x230   :  { %573 = vmatprep.subr.bf16.mxu0 %v1638_v5  ;;  %614 = vmatprep.subr.bf16.mxu1 %v1689_v14 }
 0x233   :  { %574 = vmatpush1.bf16.msra.mxu0 %v1654_v8  ;;  %615 = vmatpush1.bf16.msra.mxu1 %v1696_v15 }
 0x234   :  { %575 = vmatprep.subr.bf16.mxu0 %v1661_v9  ;;  %616 = vmatprep.subr.bf16.mxu1 %v1702_v16 }
 0x237   :  { %576 = vmatpush1.bf16.msra.mxu0 %v1679_v12  ;;  %617 = vmatpush1.bf16.msra.mxu1 %v1720_v19 }
 0x238   :  { %577 = vmatprep.subr.bf16.mxu0 %v1684_v13  ;;  %618 = vmatprep.subr.bf16.mxu1 %v1726_v20 }
 0x23b   :  { %578 = vmatpush1.bf16.msra.mxu0 %v1708_v17  ;;  %619 = vmatpush1.bf16.msra.mxu1 %v1744_v23 }
 0x23c   :  { %579 = vmatprep.subr.bf16.mxu0 %v1714_v18  ;;  %620 = vmatprep.subr.bf16.mxu1 %v1750_v24 }
 0x23f   :  { %580 = vmatpush1.bf16.msra.mxu0 %v1732_v21  ;;  %621 = vmatpush1.bf16.msra.mxu1 %v1768_v27 }
 0x240   :  { %581 = vmatprep.subr.bf16.mxu0 %v1737_v22  ;;  %622 = vmatprep.subr.bf16.mxu1 %v1774_v28 }
 0x243   :  { %582 = vmatpush1.bf16.msra.mxu0 %v1756_v25  ;;  %623 = vmatpush1.bf16.msra.mxu1 %v1787_v30 }
 0x244   :  { %583 = vmatprep.subr.bf16.mxu0 %v1762_v26  ;;  %624 = vmatprep.subr.bf16.mxu1 %v1793_v31 }
 0x247   :  { %584 = vmatpush1.bf16.msra.mxu0 %v1780_v29  ;;  %625 = vmatpush1.bf16.msra.mxu1 %v1800_v32 }
 0x248   :  { %689 = vmatprep.subr.bf16.mxu0 %v1613_v0  ;;  %730 = vmatprep.subr.bf16.mxu1 %v1643_v6 }
 0x2fd   :  { %v483_v48 = vpop.f32.mrb[8].mxu0  ;;  %v524_v49 = vpop.f32.mrb[8].mxu1 }
 0x2fe   :  { %v531_v50 = vadd.f32 %v483_v48, %v445_v46  ;;  %v485_v52 = vpop.f32.mrb[9].mxu0  ;;  %v526_v53 = vpop.f32.mrb[9].mxu1  ;;  %v533_v35 = vadd.f32 %v524_v49, %v447_v63 }
 0x2ff   :  { %v532_v54 = vadd.f32 %v485_v52, %v446_v47  ;;  %v487_v55 = vpop.f32.mrb[10].mxu0  ;;  %v528_v56 = vpop.f32.mrb[10].mxu1  ;;  %v534_v62 = vadd.f32 %v526_v53, %v448_v61 }
 0x300   :  { %v1329_v57 = vmul.f32 -1.442695, %v531_v50  ;;  %v488_v58 = vpop.f32.mrb[11].mxu0  ;;  %v529_v59 = vpop.f32.mrb[11].mxu1 }
 0x301   :  { %v1330_v60 = vmul.f32 -1.442695, %v532_v54  ;;  %v1331_v33 = vmul.f32 -1.442695, %v534_v62 }
 0x302   :  { %1450 = vpow2.f32 %v1329_v57  ;;  %v1334_v57 = vld [vmem:[%s2348_s0 + $0x38] sm:$0xff] }
 0x303   :  { %1452 = vpow2.f32 %v1330_v60 }
 0x304   :  { %1454 = vpow2.f32 %v1331_v33 }
 0x305   :  { %1456 = vtanh.f32 %v533_v35 }
 0x30c   :  { %v1451_v36 = vpop.eup %1450 }
 0x30d   :  { %v1453_v37 = vpop.eup %1452  ;;  %v538_v38 = vadd.f32 1.0, %v1451_v36 }
 0x30e   :  { %v544_v39 = vadd.f32 1.0, %v1453_v37  ;;  %v1455_v40 = vpop.eup %1454  ;;  %v568_v37 = vunpack.c.h.bf16 %v1334_v57 }
 0x30f   :  { %1458 = vrcp.f32 %v538_v38  ;;  %v1457_v42 = vpop.eup %1456  ;;  %v551_v34 = vadd.f32 1.0, %v1455_v40 }
 0x310   :  { %1460 = vrcp.f32 %v544_v39  ;;  %v567_v39 = vunpack.c.l.bf16 %v1334_v57 }
 0x311   :  { %1462 = vrcp.f32 %v551_v34 }
 0x319   :  { %v1459_v43 = vpop.eup %1458 }
 0x31a   :  { %v1461_v44 = vpop.eup %1460  ;;  %v555_v45 = vmul.f32 %v1459_v43, %v1457_v42 }
 0x31b   :  { %v554_v46 = vmul.f32 %v1461_v44, %v1895_v41  ;;  %v1463_v48 = vpop.eup %1462  ;;  %v1333_v41 = vld [vmem:[%s2348_s0 + $0x30] sm:$0xff] }
 0x31c   :  { %v565_v52 = vunpack.c.l.bf16 %v1333_v41  ;;  %v566_v53 = vunpack.c.h.bf16 %v1333_v41 }
 0x31d   :  { %v1942_v47 = vadd.f32 %v555_v45, %v554_v46 }
 0x31f   :  { %1464 = vtanh.f32 %v1942_v47 }
 0x329   :  { %v1465_v49 = vpop.eup %1464 }
 0x32a   :  { %v558_v50 = vmul.f32 %v1465_v49, %v1463_v48 }
 0x32c   :  { %v559_v51 = vpack.c.bf16 %v558_v50, %v558_v50 }
 0x32e   :  { %1332 = vst [vmem:[%s2349_s2 + $0x8] sm:$0xf] %v559_v51  ;;  %602 = vmatmul.mubr.bf16.vlgmr.msra.gmra.mrb[12].mxu0 %v559_v51  ;;  %643 = vmatmul.mubr.bf16.vlgmr.msra.gmra.mrb[12].mxu1 %v559_v51 }
 0x32f   :  { %690 = vmatpush1.bf16.msra.mxu0 %v1620_v2  ;;  %731 = vmatpush1.bf16.msra.mxu1 %v1648_v7 }
 0x330   :  { %691 = vmatprep.subr.bf16.mxu0 %v1626_v3  ;;  %732 = vmatprep.subr.bf16.mxu1 %v1667_v10 }
 0x331   :  { %721 = vmatprep.mubr.bf16.mxu0 %v1594_v1  ;;  %762 = vmatprep.mubr.bf16.mxu1 %v1594_v1 }
 0x333   :  { %692 = vmatpush1.bf16.msra.mxu0 %v1632_v4  ;;  %733 = vmatpush1.bf16.msra.mxu1 %v1672_v11 }
 0x334   :  { %693 = vmatprep.subr.bf16.mxu0 %v1638_v5  ;;  %734 = vmatprep.subr.bf16.mxu1 %v1689_v14 }
 0x337   :  { %694 = vmatpush1.bf16.msra.mxu0 %v1654_v8  ;;  %735 = vmatpush1.bf16.msra.mxu1 %v1696_v15 }
 0x338   :  { %695 = vmatprep.subr.bf16.mxu0 %v1661_v9  ;;  %736 = vmatprep.subr.bf16.mxu1 %v1702_v16 }
 0x33b   :  { %696 = vmatpush1.bf16.msra.mxu0 %v1679_v12  ;;  %737 = vmatpush1.bf16.msra.mxu1 %v1720_v19 }
 0x33c   :  { %697 = vmatprep.subr.bf16.mxu0 %v1684_v13  ;;  %738 = vmatprep.subr.bf16.mxu1 %v1726_v20 }
 0x33f   :  { %698 = vmatpush1.bf16.msra.mxu0 %v1708_v17  ;;  %739 = vmatpush1.bf16.msra.mxu1 %v1744_v23 }
 0x340   :  { %699 = vmatprep.subr.bf16.mxu0 %v1714_v18  ;;  %740 = vmatprep.subr.bf16.mxu1 %v1750_v24 }
 0x343   :  { %700 = vmatpush1.bf16.msra.mxu0 %v1732_v21  ;;  %741 = vmatpush1.bf16.msra.mxu1 %v1768_v27 }
 0x344   :  { %701 = vmatprep.subr.bf16.mxu0 %v1737_v22  ;;  %742 = vmatprep.subr.bf16.mxu1 %v1774_v28 }
 0x347   :  { %702 = vmatpush1.bf16.msra.mxu0 %v1756_v25  ;;  %743 = vmatpush1.bf16.msra.mxu1 %v1787_v30 }
 0x348   :  { %703 = vmatprep.subr.bf16.mxu0 %v1762_v26  ;;  %744 = vmatprep.subr.bf16.mxu1 %v1793_v31 }
 0x34b   :  { %704 = vmatpush1.bf16.msra.mxu0 %v1780_v29  ;;  %745 = vmatpush1.bf16.msra.mxu1 %v1800_v32 }
 0x34c   :  { %809 = vmatprep.subr.bf16.mxu0 %v1613_v0  ;;  %850 = vmatprep.subr.bf16.mxu1 %v1643_v6 }
 0x401   :  { %v603_v54 = vpop.f32.mrb[12].mxu0  ;;  %v644_v55 = vpop.f32.mrb[12].mxu1 }
 0x402   :  { %v651_v56 = vadd.f32 %v603_v54, %v565_v52  ;;  %v605_v58 = vpop.f32.mrb[13].mxu0  ;;  %v646_v59 = vpop.f32.mrb[13].mxu1  ;;  %v653_v42 = vadd.f32 %v644_v55, %v567_v39 }
 0x403   :  { %v652_v60 = vadd.f32 %v605_v58, %v566_v53  ;;  %v607_v61 = vpop.f32.mrb[14].mxu0  ;;  %v648_v62 = vpop.f32.mrb[14].mxu1  ;;  %v654_v38 = vadd.f32 %v646_v59, %v568_v37 }
 0x404   :  { %v1335_v63 = vmul.f32 -1.442695, %v651_v56  ;;  %v608_v33 = vpop.f32.mrb[15].mxu0  ;;  %v649_v35 = vpop.f32.mrb[15].mxu1 }
 0x405   :  { %v1336_v36 = vmul.f32 -1.442695, %v652_v60  ;;  %v1337_v40 = vmul.f32 -1.442695, %v654_v38 }
 0x406   :  { %1466 = vpow2.f32 %v1335_v63  ;;  %v1340_v63 = vld [vmem:[%s2348_s0 + $0x48] sm:$0xff] }
 0x407   :  { %1468 = vpow2.f32 %v1336_v36 }
 0x408   :  { %1470 = vpow2.f32 %v1337_v40 }
 0x409   :  { %1472 = vtanh.f32 %v653_v42  ;;  %v688_v42 = vunpack.c.h.bf16 %v1340_v63 }
 0x410   :  { %v1467_v43 = vpop.eup %1466 }
 0x411   :  { %v1469_v44 = vpop.eup %1468  ;;  %v658_v45 = vadd.f32 1.0, %v1467_v43 }
 0x412   :  { %v664_v34 = vadd.f32 1.0, %v1469_v44  ;;  %v1471_v46 = vpop.eup %1470  ;;  %v687_v44 = vunpack.c.l.bf16 %v1340_v63 }
 0x413   :  { %1474 = vrcp.f32 %v658_v45  ;;  %v1473_v48 = vpop.eup %1472  ;;  %v671_v41 = vadd.f32 1.0, %v1471_v46 }
 0x414   :  { %1476 = vrcp.f32 %v664_v34 }
 0x415   :  { %1478 = vrcp.f32 %v671_v41 }
 0x41d   :  { %v1475_v49 = vpop.eup %1474 }
 0x41e   :  { %v1477_v50 = vpop.eup %1476  ;;  %v675_v51 = vmul.f32 %v1475_v49, %v1473_v48 }
 0x41f   :  { %v674_v52 = vmul.f32 %v1477_v50, %v1942_v47  ;;  %v1479_v54 = vpop.eup %1478  ;;  %v1339_v47 = vld [vmem:[%s2348_s0 + $0x40] sm:$0xff] }
 0x420   :  { %v685_v58 = vunpack.c.l.bf16 %v1339_v47  ;;  %v686_v59 = vunpack.c.h.bf16 %v1339_v47 }
 0x421   :  { %v1989_v53 = vadd.f32 %v675_v51, %v674_v52 }
 0x423   :  { %1480 = vtanh.f32 %v1989_v53 }
 0x42d   :  { %v1481_v55 = vpop.eup %1480 }
 0x42e   :  { %v678_v56 = vmul.f32 %v1481_v55, %v1479_v54 }
 0x430   :  { %v679_v57 = vpack.c.bf16 %v678_v56, %v678_v56 }
 0x432   :  { %1338 = vst [vmem:[%s2349_s2 + $0xc] sm:$0xf] %v679_v57  ;;  %722 = vmatmul.mubr.bf16.vlgmr.msra.gmra.mrb[16].mxu0 %v679_v57  ;;  %763 = vmatmul.mubr.bf16.vlgmr.msra.gmra.mrb[16].mxu1 %v679_v57 }
 0x433   :  { %810 = vmatpush1.bf16.msra.mxu0 %v1620_v2  ;;  %851 = vmatpush1.bf16.msra.mxu1 %v1648_v7 }
 0x434   :  { %811 = vmatprep.subr.bf16.mxu0 %v1626_v3  ;;  %852 = vmatprep.subr.bf16.mxu1 %v1667_v10 }
 0x435   :  { %841 = vmatprep.mubr.bf16.mxu0 %v1594_v1  ;;  %882 = vmatprep.mubr.bf16.mxu1 %v1594_v1 }
 0x437   :  { %812 = vmatpush1.bf16.msra.mxu0 %v1632_v4  ;;  %853 = vmatpush1.bf16.msra.mxu1 %v1672_v11 }
 0x438   :  { %813 = vmatprep.subr.bf16.mxu0 %v1638_v5  ;;  %854 = vmatprep.subr.bf16.mxu1 %v1689_v14 }
 0x43b   :  { %814 = vmatpush1.bf16.msra.mxu0 %v1654_v8  ;;  %855 = vmatpush1.bf16.msra.mxu1 %v1696_v15 }
 0x43c   :  { %815 = vmatprep.subr.bf16.mxu0 %v1661_v9  ;;  %856 = vmatprep.subr.bf16.mxu1 %v1702_v16 }
 0x43f   :  { %816 = vmatpush1.bf16.msra.mxu0 %v1679_v12  ;;  %857 = vmatpush1.bf16.msra.mxu1 %v1720_v19 }
 0x440   :  { %817 = vmatprep.subr.bf16.mxu0 %v1684_v13  ;;  %858 = vmatprep.subr.bf16.mxu1 %v1726_v20 }
 0x443   :  { %818 = vmatpush1.bf16.msra.mxu0 %v1708_v17  ;;  %859 = vmatpush1.bf16.msra.mxu1 %v1744_v23 }
 0x444   :  { %819 = vmatprep.subr.bf16.mxu0 %v1714_v18  ;;  %860 = vmatprep.subr.bf16.mxu1 %v1750_v24 }
 0x447   :  { %820 = vmatpush1.bf16.msra.mxu0 %v1732_v21  ;;  %861 = vmatpush1.bf16.msra.mxu1 %v1768_v27 }
 0x448   :  { %821 = vmatprep.subr.bf16.mxu0 %v1737_v22  ;;  %862 = vmatprep.subr.bf16.mxu1 %v1774_v28 }
 0x44b   :  { %822 = vmatpush1.bf16.msra.mxu0 %v1756_v25  ;;  %863 = vmatpush1.bf16.msra.mxu1 %v1787_v30 }
 0x44c   :  { %823 = vmatprep.subr.bf16.mxu0 %v1762_v26  ;;  %864 = vmatprep.subr.bf16.mxu1 %v1793_v31 }
 0x44f   :  { %824 = vmatpush1.bf16.msra.mxu0 %v1780_v29  ;;  %865 = vmatpush1.bf16.msra.mxu1 %v1800_v32 }
 0x450   :  { %929 = vmatprep.subr.bf16.mxu0 %v1613_v0  ;;  %970 = vmatprep.subr.bf16.mxu1 %v1643_v6 }
 0x505   :  { %v723_v60 = vpop.f32.mrb[16].mxu0  ;;  %v764_v61 = vpop.f32.mrb[16].mxu1 }
 0x506   :  { %v771_v62 = vadd.f32 %v723_v60, %v685_v58  ;;  %v725_v33 = vpop.f32.mrb[17].mxu0  ;;  %v766_v35 = vpop.f32.mrb[17].mxu1  ;;  %v773_v34 = vadd.f32 %v764_v61, %v687_v44  ;;  %v2134_v44 = vld [vmem:[%s2347_s1 + $0x28] ss:$16 sps:$4 sm:$0xff]  }
 0x507   :  { %v772_v36 = vadd.f32 %v725_v33, %v686_v59  ;;  %v727_v37 = vpop.f32.mrb[18].mxu0  ;;  %v768_v0 = vpop.f32.mrb[18].mxu1  ;;  %v774_v43 = vadd.f32 %v766_v35, %v688_v42  ;;  %v2120_v42 = vld [vmem:[%s2347_s1 + $0x2c] ss:$16 sps:$4 sm:$0xff]  }
 0x508   :  { %v1341_v38 = vmul.f32 -1.442695, %v771_v62  ;;  %v728_v6 = vpop.f32.mrb[19].mxu0  ;;  %v769_v39 = vpop.f32.mrb[19].mxu1 }
 0x509   :  { %v1342_v40 = vmul.f32 -1.442695, %v772_v36  ;;  %v1343_v45 = vmul.f32 -1.442695, %v774_v43  ;;  %v2102_v6 = vld [vmem:[%s2347_s1] ss:$16 sps:$4 sm:$0xff]  }
 0x50a   :  { %1482 = vpow2.f32 %v1341_v38  ;;  %v2108_v39 = vld [vmem:[%s2347_s1 + $0x8] ss:$16 sps:$4 sm:$0xff]   ;;  %v2128_v43 = vld [vmem:[%s2347_s1 + $0x20] ss:$16 sps:$4 sm:$0xff]  }
 0x50b   :  { %1484 = vpow2.f32 %v1342_v40  ;;  %v2114_v40 = vld [vmem:[%s2347_s1 + $0x24] ss:$16 sps:$4 sm:$0xff]  }
 0x50c   :  { %1486 = vpow2.f32 %v1343_v45  ;;  %v2140_v45 = vld [vmem:[%s2347_s1 + $0x44] ss:$16 sps:$4 sm:$0xff]  }
 0x50d   :  { %1488 = vtanh.f32 %v773_v34  ;;  %v2146_v34 = vld [vmem:[%s2347_s1 + $0x4c] ss:$16 sps:$4 sm:$0xff]  }
 0x514   :  { %v1483_v46 = vpop.eup %1482 }
 0x515   :  { %v1485_v48 = vpop.eup %1484  ;;  %v778_v49 = vadd.f32 1.0, %v1483_v46  ;;  %v2152_v46 = vld [vmem:[%s2347_s1 + $0x40] ss:$16 sps:$4 sm:$0xff]  }
 0x516   :  { %v784_v50 = vadd.f32 1.0, %v1485_v48  ;;  %v1487_v51 = vpop.eup %1486  ;;  %v2158_v48 = vld [vmem:[%s2347_s1 + $0x48] ss:$16 sps:$4 sm:$0xff]  }
 0x517   :  { %1490 = vrcp.f32 %v778_v49  ;;  %v1489_v41 = vpop.eup %1488  ;;  %v791_v56 = vadd.f32 1.0, %v1487_v51  ;;  %v2164_v49 = vld [vmem:[%s2347_s1 + $0x64] ss:$16 sps:$4 sm:$0xff]   ;;  %v2176_v51 = vld [vmem:[%s2347_s1 + $0x60] ss:$16 sps:$4 sm:$0xff]  }
 0x518   :  { %1492 = vrcp.f32 %v784_v50  ;;  %v2170_v50 = vld [vmem:[%s2347_s1 + $0x6c] ss:$16 sps:$4 sm:$0xff]  }
 0x519   :  { %1494 = vrcp.f32 %v791_v56  ;;  %v2206_v56 = vld [vmem:[%s2347_s1 + $0x88] ss:$16 sps:$4 sm:$0xff]  }
 0x521   :  { %v1491_v52 = vpop.eup %1490 }
 0x522   :  { %v1493_v54 = vpop.eup %1492  ;;  %v795_v55 = vmul.f32 %v1491_v52, %v1489_v41  ;;  %v2182_v41 = vld [vmem:[%s2347_s1 + $0x68] ss:$16 sps:$4 sm:$0xff]   ;;  %v2188_v52 = vld [vmem:[%s2347_s1 + $0x84] ss:$16 sps:$4 sm:$0xff]  }
 0x523   :  { %v794_v57 = vmul.f32 %v1493_v54, %v1989_v53  ;;  %v1495_v58 = vpop.eup %1494  ;;  %v2194_v54 = vld [vmem:[%s2347_s1 + $0x8c] ss:$16 sps:$4 sm:$0xff]  }
 0x525   :  { %v2036_v47 = vadd.f32 %v795_v55, %v794_v57  ;;  %v2200_v55 = vld [vmem:[%s2347_s1 + $0x80] ss:$16 sps:$4 sm:$0xff]   ;;  %v2212_v57 = vld [vmem:[%s2347_s1 + $0xa4] ss:$16 sps:$4 sm:$0xff]  }
 0x527   :  { %1496 = vtanh.f32 %v2036_v47 }
 0x531   :  { %v1497_v59 = vpop.eup %1496 }
 0x532   :  { %v798_v60 = vmul.f32 %v1497_v59, %v1495_v58  ;;  %v2224_v58 = vld [vmem:[%s2347_s1 + $0xa0] ss:$16 sps:$4 sm:$0xff]   ;;  %v2230_v59 = vld [vmem:[%s2347_s1 + $0xa8] ss:$16 sps:$4 sm:$0xff]  }
 0x534   :  { %v799_v61 = vpack.c.bf16 %v798_v60, %v798_v60  ;;  %v2236_v60 = vld [vmem:[%s2347_s1 + $0xc4] ss:$16 sps:$4 sm:$0xff]  }
 0x536   :  { %1344 = vst [vmem:[%s2349_s2 + $0x10] sm:$0xf] %v799_v61  ;;  %842 = vmatmul.mubr.bf16.vlgmr.msra.gmra.mrb[20].mxu0 %v799_v61  ;;  %883 = vmatmul.mubr.bf16.vlgmr.msra.gmra.mrb[20].mxu1 %v799_v61  ;;  %v2242_v61 = vld [vmem:[%s2347_s1 + $0xcc] ss:$16 sps:$4 sm:$0xff]  }
 0x537   :  { %930 = vmatpush1.bf16.msra.mxu0 %v1620_v2  ;;  %971 = vmatpush1.bf16.msra.mxu1 %v1648_v7  ;;  %v2077_v2 = vld [vmem:[%s2347_s1 + $0x4] ss:$16 sps:$4 sm:$0xff]  }
 0x538   :  { %931 = vmatprep.subr.bf16.mxu0 %v1626_v3  ;;  %972 = vmatprep.subr.bf16.mxu1 %v1667_v10  ;;  %v2083_v3 = vld [vmem:[%s2347_s1 + $0xc] ss:$16 sps:$4 sm:$0xff]  }
 0x539   :  { %961 = vmatprep.mubr.bf16.mxu0 %v1594_v1  ;;  %1002 = vmatprep.mubr.bf16.mxu1 %v1594_v1 }
 0x53b   :  { %932 = vmatpush1.bf16.msra.mxu0 %v1632_v4  ;;  %973 = vmatpush1.bf16.msra.mxu1 %v1672_v11  ;;  %v1345_v4 = vld [vmem:[%s2348_s0 + $0x50] sm:$0xff]  ;;  %v1346_v11 = vld [vmem:[%s2348_s0 + $0x58] sm:$0xff] }
 0x53c   :  { %933 = vmatprep.subr.bf16.mxu0 %v1638_v5  ;;  %974 = vmatprep.subr.bf16.mxu1 %v1689_v14  ;;  %v805_v5 = vunpack.c.l.bf16 %v1345_v4  ;;  %v806_v7 = vunpack.c.h.bf16 %v1345_v4  ;;  %v2248_v4 = vld [vmem:[%s2347_s1 + $0xc0] ss:$16 sps:$4 sm:$0xff]  }
 0x53f   :  { %934 = vmatpush1.bf16.msra.mxu0 %v1654_v8  ;;  %975 = vmatpush1.bf16.msra.mxu1 %v1696_v15 }
 0x540   :  { %935 = vmatprep.subr.bf16.mxu0 %v1661_v9  ;;  %976 = vmatprep.subr.bf16.mxu1 %v1702_v16 }
 0x543   :  { %936 = vmatpush1.bf16.msra.mxu0 %v1679_v12  ;;  %977 = vmatpush1.bf16.msra.mxu1 %v1720_v19 }
 0x544   :  { %937 = vmatprep.subr.bf16.mxu0 %v1684_v13  ;;  %978 = vmatprep.subr.bf16.mxu1 %v1726_v20 }
 0x547   :  { %938 = vmatpush1.bf16.msra.mxu0 %v1708_v17  ;;  %979 = vmatpush1.bf16.msra.mxu1 %v1744_v23  ;;  %v807_v23 = vunpack.c.l.bf16 %v1346_v11 }
 0x548   :  { %939 = vmatprep.subr.bf16.mxu0 %v1714_v18  ;;  %980 = vmatprep.subr.bf16.mxu1 %v1750_v24 }
 0x54b   :  { %940 = vmatpush1.bf16.msra.mxu0 %v1732_v21  ;;  %981 = vmatpush1.bf16.msra.mxu1 %v1768_v27  ;;  %v808_v21 = vunpack.c.h.bf16 %v1346_v11  ;;  %v1351_v11 = vld [vmem:[%s2348_s0 + $0x60] sm:$0xff] }
 0x54c   :  { %941 = vmatprep.subr.bf16.mxu0 %v1737_v22  ;;  %982 = vmatprep.subr.bf16.mxu1 %v1774_v28 }
 0x54f   :  { %942 = vmatpush1.bf16.msra.mxu0 %v1756_v25  ;;  %983 = vmatpush1.bf16.msra.mxu1 %v1787_v30 }
 0x550   :  { %943 = vmatprep.subr.bf16.mxu0 %v1762_v26  ;;  %984 = vmatprep.subr.bf16.mxu1 %v1793_v31 }
 0x553   :  { %944 = vmatpush1.bf16.msra.mxu0 %v1780_v29  ;;  %985 = vmatpush1.bf16.msra.mxu1 %v1800_v32 }
 0x554   :  { %1049 = vmatprep.subr.bf16.mxu0 %v2077_v2  ;;  %1090 = vmatprep.subr.bf16.mxu1 %v2083_v3 }
 0x609   :  { %v843_v8 = vpop.f32.mrb[20].mxu0  ;;  %v884_v9 = vpop.f32.mrb[20].mxu1 }
 0x60a   :  { %v891_v10 = vadd.f32 %v843_v8, %v805_v5  ;;  %v845_v12 = vpop.f32.mrb[21].mxu0  ;;  %v886_v13 = vpop.f32.mrb[21].mxu1  ;;  %v893_v25 = vadd.f32 %v884_v9, %v807_v23  ;;  %v2254_v5 = vld [vmem:[%s2347_s1 + $0xc8] ss:$16 sps:$4 sm:$0xff]   ;;  %v2266_v8 = vld [vmem:[%s2347_s1 + $0xec] ss:$16 sps:$4 sm:$0xff]  }
 0x60b   :  { %v892_v14 = vadd.f32 %v845_v12, %v806_v7  ;;  %v847_v15 = vpop.f32.mrb[22].mxu0  ;;  %v888_v16 = vpop.f32.mrb[22].mxu1  ;;  %v894_v22 = vadd.f32 %v886_v13, %v808_v21  ;;  %v2260_v7 = vld [vmem:[%s2347_s1 + $0xe4] ss:$16 sps:$4 sm:$0xff]   ;;  %v2272_v9 = vld [vmem:[%s2347_s1 + $0xe0] ss:$16 sps:$4 sm:$0xff]   ;;  %v925_v12 = vunpack.c.l.bf16 %v1351_v11  ;;  %v926_v13 = vunpack.c.h.bf16 %v1351_v11 }
 0x60c   :  { %v1347_v17 = vmul.f32 -1.442695, %v891_v10  ;;  %v848_v18 = vpop.f32.mrb[23].mxu0  ;;  %v889_v19 = vpop.f32.mrb[23].mxu1  ;;  %v2278_v10 = vld [vmem:[%s2347_s1 + $0xe8] ss:$16 sps:$4 sm:$0xff]  }
 0x60d   :  { %v1348_v20 = vmul.f32 -1.442695, %v892_v14  ;;  %v1349_v24 = vmul.f32 -1.442695, %v894_v22 }
 0x60e   :  { %1498 = vpow2.f32 %v1347_v17  ;;  %v1352_v17 = vld [vmem:[%s2348_s0 + $0x68] sm:$0xff] }
 0x60f   :  { %1500 = vpow2.f32 %v1348_v20 }
 0x610   :  { %1502 = vpow2.f32 %v1349_v24 }
 0x611   :  { %1504 = vtanh.f32 %v893_v25  ;;  %v928_v25 = vunpack.c.h.bf16 %v1352_v17 }
 0x618   :  { %v1499_v26 = vpop.eup %1498 }
 0x619   :  { %v1501_v27 = vpop.eup %1500  ;;  %v898_v28 = vadd.f32 1.0, %v1499_v26 }
 0x61a   :  { %v904_v29 = vadd.f32 1.0, %v1501_v27  ;;  %v1503_v30 = vpop.eup %1502  ;;  %v927_v27 = vunpack.c.l.bf16 %v1352_v17 }
 0x61b   :  { %1506 = vrcp.f32 %v898_v28  ;;  %v1505_v31 = vpop.eup %1504  ;;  %v911_v63 = vadd.f32 1.0, %v1503_v30 }
 0x61c   :  { %1508 = vrcp.f32 %v904_v29 }
 0x61d   :  { %1510 = vrcp.f32 %v911_v63 }
 0x625   :  { %v1507_v32 = vpop.eup %1506 }
 0x626   :  { %v1509_v53 = vpop.eup %1508  ;;  %v915_v62 = vmul.f32 %v1507_v32, %v1505_v31 }
 0x627   :  { %v914_v33 = vmul.f32 %v1509_v53, %v2036_v47  ;;  %v1511_v36 = vpop.eup %1510  ;;  %v2218_v47 = vld [vmem:[%s2347_s1 + $0xac] ss:$16 sps:$4 sm:$0xff]  }
 0x629   :  { %v2093_v35 = vadd.f32 %v915_v62, %v914_v33 }
 0x62b   :  { %1512 = vtanh.f32 %v2093_v35 }
 0x635   :  { %v1513_v37 = vpop.eup %1512 }
 0x636   :  { %v918_v0 = vmul.f32 %v1513_v37, %v1511_v36 }
 0x638   :  { %v919_v38 = vpack.c.bf16 %v918_v0, %v918_v0 }
 0x63a   :  { %1350 = vst [vmem:[%s2349_s2 + $0x14] sm:$0xf] %v919_v38  ;;  %962 = vmatmul.mubr.bf16.vlgmr.msra.gmra.mrb[24].mxu0 %v919_v38  ;;  %1003 = vmatmul.mubr.bf16.vlgmr.msra.gmra.mrb[24].mxu1 %v919_v38 }
 0x63b   :  { %1050 = vmatpush1.bf16.msra.mxu0 %v2102_v6  ;;  %1091 = vmatpush1.bf16.msra.mxu1 %v2108_v39 }
 0x63c   :  { %1051 = vmatprep.subr.bf16.mxu0 %v2114_v40  ;;  %1092 = vmatprep.subr.bf16.mxu1 %v2120_v42 }
 0x63d   :  { %1081 = vmatprep.mubr.bf16.mxu0 %v1594_v1  ;;  %1122 = vmatprep.mubr.bf16.mxu1 %v1594_v1 }
 0x63f   :  { %1052 = vmatpush1.bf16.msra.mxu0 %v2128_v43  ;;  %1093 = vmatpush1.bf16.msra.mxu1 %v2134_v44 }
 0x640   :  { %1053 = vmatprep.subr.bf16.mxu0 %v2140_v45  ;;  %1094 = vmatprep.subr.bf16.mxu1 %v2146_v34 }
 0x643   :  { %1054 = vmatpush1.bf16.msra.mxu0 %v2152_v46  ;;  %1095 = vmatpush1.bf16.msra.mxu1 %v2158_v48 }
 0x644   :  { %1055 = vmatprep.subr.bf16.mxu0 %v2164_v49  ;;  %1096 = vmatprep.subr.bf16.mxu1 %v2170_v50 }
 0x647   :  { %1056 = vmatpush1.bf16.msra.mxu0 %v2176_v51  ;;  %1097 = vmatpush1.bf16.msra.mxu1 %v2182_v41 }
 0x648   :  { %1057 = vmatprep.subr.bf16.mxu0 %v2188_v52  ;;  %1098 = vmatprep.subr.bf16.mxu1 %v2194_v54 }
 0x64b   :  { %1058 = vmatpush1.bf16.msra.mxu0 %v2200_v55  ;;  %1099 = vmatpush1.bf16.msra.mxu1 %v2206_v56 }
 0x64c   :  { %1059 = vmatprep.subr.bf16.mxu0 %v2212_v57  ;;  %1100 = vmatprep.subr.bf16.mxu1 %v2218_v47 }
 0x64f   :  { %1060 = vmatpush1.bf16.msra.mxu0 %v2224_v58  ;;  %1101 = vmatpush1.bf16.msra.mxu1 %v2230_v59 }
 0x650   :  { %1061 = vmatprep.subr.bf16.mxu0 %v2236_v60  ;;  %1102 = vmatprep.subr.bf16.mxu1 %v2242_v61 }
 0x653   :  { %1062 = vmatpush1.bf16.msra.mxu0 %v2248_v4  ;;  %1103 = vmatpush1.bf16.msra.mxu1 %v2254_v5 }
 0x654   :  { %1063 = vmatprep.subr.bf16.mxu0 %v2260_v7  ;;  %1104 = vmatprep.subr.bf16.mxu1 %v2266_v8 }
 0x657   :  { %1064 = vmatpush1.bf16.msra.mxu0 %v2272_v9  ;;  %1105 = vmatpush1.bf16.msra.mxu1 %v2278_v10 }
 0x658   :  { %1169 = vmatprep.subr.bf16.mxu0 %v2077_v2  ;;  %1210 = vmatprep.subr.bf16.mxu1 %v2083_v3 }
 0x70d   :  { %v963_v14 = vpop.f32.mrb[24].mxu0  ;;  %v1004_v15 = vpop.f32.mrb[24].mxu1 }
 0x70e   :  { %v1011_v16 = vadd.f32 %v963_v14, %v925_v12  ;;  %v965_v18 = vpop.f32.mrb[25].mxu0  ;;  %v1006_v19 = vpop.f32.mrb[25].mxu1  ;;  %v1013_v29 = vadd.f32 %v1004_v15, %v927_v27 }
 0x70f   :  { %v1012_v20 = vadd.f32 %v965_v18, %v926_v13  ;;  %v967_v21 = vpop.f32.mrb[26].mxu0  ;;  %v1008_v2 = vpop.f32.mrb[26].mxu1  ;;  %v1014_v26 = vadd.f32 %v1006_v19, %v928_v25  ;;  %v1364_v25 = vld [vmem:[%s2348_s0 + $0x88] sm:$0xff] }
 0x710   :  { %v1353_v22 = vmul.f32 -1.442695, %v1011_v16  ;;  %v968_v3 = vpop.f32.mrb[27].mxu0  ;;  %v1009_v23 = vpop.f32.mrb[27].mxu1  ;;  %v1363_v21 = vld [vmem:[%s2348_s0 + $0x80] sm:$0xff] }
 0x711   :  { %v1354_v24 = vmul.f32 -1.442695, %v1012_v20  ;;  %v1355_v28 = vmul.f32 -1.442695, %v1014_v26  ;;  %v1165_v2 = vunpack.c.l.bf16 %v1363_v21 }
 0x712   :  { %1514 = vpow2.f32 %v1353_v22  ;;  %v1166_v22 = vunpack.c.h.bf16 %v1363_v21 }
 0x713   :  { %1516 = vpow2.f32 %v1354_v24 }
 0x714   :  { %1518 = vpow2.f32 %v1355_v28 }
 0x715   :  { %1520 = vtanh.f32 %v1013_v29 }
 0x71c   :  { %v1515_v30 = vpop.eup %1514 }
 0x71d   :  { %v1517_v31 = vpop.eup %1516  ;;  %v1018_v32 = vadd.f32 1.0, %v1515_v30 }
 0x71e   :  { %v1024_v53 = vadd.f32 1.0, %v1517_v31  ;;  %v1519_v62 = vpop.eup %1518 }
 0x71f   :  { %1522 = vrcp.f32 %v1018_v32  ;;  %v1521_v63 = vpop.eup %1520  ;;  %v1031_v0 = vadd.f32 1.0, %v1519_v62 }
 0x720   :  { %1524 = vrcp.f32 %v1024_v53 }
 0x721   :  { %1526 = vrcp.f32 %v1031_v0 }
 0x729   :  { %v1523_v33 = vpop.eup %1522 }
 0x72a   :  { %v1525_v36 = vpop.eup %1524  ;;  %v1035_v37 = vmul.f32 %v1523_v33, %v1521_v63  ;;  %v1168_v63 = vunpack.c.h.bf16 %v1364_v25 }
 0x72b   :  { %v1034_v38 = vmul.f32 %v1525_v36, %v2093_v35  ;;  %v1527_v12 = vpop.eup %1526  ;;  %v1167_v36 = vunpack.c.l.bf16 %v1364_v25 }
 0x72d   :  { %v2290_v11 = vadd.f32 %v1035_v37, %v1034_v38 }
 0x72f   :  { %1528 = vtanh.f32 %v2290_v11 }
 0x739   :  { %v1529_v13 = vpop.eup %1528 }
 0x73a   :  { %v1038_v14 = vmul.f32 %v1529_v13, %v1527_v12 }
 0x73c   :  { %v1039_v15 = vpack.c.bf16 %v1038_v14, %v1038_v14 }
 0x73e   :  { %1356 = vst [vmem:[%s2349_s2 + $0x18] sm:$0xf] %v1039_v15  ;;  %1082 = vmatmul.mubr.bf16.vlgmr.msra.gmra.mrb[28].mxu0 %v1039_v15  ;;  %1123 = vmatmul.mubr.bf16.vlgmr.msra.gmra.mrb[28].mxu1 %v1039_v15 }
 0x73f   :  { %1170 = vmatpush1.bf16.msra.mxu0 %v2102_v6  ;;  %1211 = vmatpush1.bf16.msra.mxu1 %v2108_v39 }
 0x740   :  { %1171 = vmatprep.subr.bf16.mxu0 %v2114_v40  ;;  %1212 = vmatprep.subr.bf16.mxu1 %v2120_v42 }
 0x741   :  { %1201 = vmatprep.mubr.bf16.mxu0 %v1594_v1  ;;  %1242 = vmatprep.mubr.bf16.mxu1 %v1594_v1  ;;  %v1357_v1 = vld [vmem:[%s2348_s0 + $0x70] sm:$0xff] }
 0x742   :  { %v1045_v35 = vunpack.c.l.bf16 %v1357_v1  ;;  %v1046_v6 = vunpack.c.h.bf16 %v1357_v1 }
 0x743   :  { %1172 = vmatpush1.bf16.msra.mxu0 %v2128_v43  ;;  %1213 = vmatpush1.bf16.msra.mxu1 %v2134_v44  ;;  %v1358_v43 = vld [vmem:[%s2348_s0 + $0x78] sm:$0xff] }
 0x744   :  { %1173 = vmatprep.subr.bf16.mxu0 %v2140_v45  ;;  %1214 = vmatprep.subr.bf16.mxu1 %v2146_v34 }
 0x747   :  { %1174 = vmatpush1.bf16.msra.mxu0 %v2152_v46  ;;  %1215 = vmatpush1.bf16.msra.mxu1 %v2158_v48 }
 0x748   :  { %1175 = vmatprep.subr.bf16.mxu0 %v2164_v49  ;;  %1216 = vmatprep.subr.bf16.mxu1 %v2170_v50 }
 0x74b   :  { %1176 = vmatpush1.bf16.msra.mxu0 %v2176_v51  ;;  %1217 = vmatpush1.bf16.msra.mxu1 %v2182_v41 }
 0x74c   :  { %1177 = vmatprep.subr.bf16.mxu0 %v2188_v52  ;;  %1218 = vmatprep.subr.bf16.mxu1 %v2194_v54  ;;  %v1048_v52 = vunpack.c.h.bf16 %v1358_v43 }
 0x74f   :  { %1178 = vmatpush1.bf16.msra.mxu0 %v2200_v55  ;;  %1219 = vmatpush1.bf16.msra.mxu1 %v2206_v56  ;;  %v1047_v55 = vunpack.c.l.bf16 %v1358_v43 }
 0x750   :  { %1179 = vmatprep.subr.bf16.mxu0 %v2212_v57  ;;  %1220 = vmatprep.subr.bf16.mxu1 %v2218_v47 }
 0x753   :  { %1180 = vmatpush1.bf16.msra.mxu0 %v2224_v58  ;;  %1221 = vmatpush1.bf16.msra.mxu1 %v2230_v59 }
 0x754   :  { %1181 = vmatprep.subr.bf16.mxu0 %v2236_v60  ;;  %1222 = vmatprep.subr.bf16.mxu1 %v2242_v61 }
 0x757   :  { %1182 = vmatpush1.bf16.msra.mxu0 %v2248_v4  ;;  %1223 = vmatpush1.bf16.msra.mxu1 %v2254_v5 }
 0x758   :  { %1183 = vmatprep.subr.bf16.mxu0 %v2260_v7  ;;  %1224 = vmatprep.subr.bf16.mxu1 %v2266_v8 }
 0x75b   :  { %1184 = vmatpush1.bf16.msra.mxu0 %v2272_v9  ;;  %1225 = vmatpush1.bf16.msra.mxu1 %v2278_v10 }
 0x811   :  { %v1083_v39 = vpop.f32.mrb[28].mxu0  ;;  %v1124_v40 = vpop.f32.mrb[28].mxu1 }
 0x812   :  { %v1131_v42 = vadd.f32 %v1083_v39, %v1045_v35  ;;  %v1085_v44 = vpop.f32.mrb[29].mxu0  ;;  %v1126_v45 = vpop.f32.mrb[29].mxu1  ;;  %v1133_v57 = vadd.f32 %v1124_v40, %v1047_v55 }
 0x813   :  { %v1132_v34 = vadd.f32 %v1085_v44, %v1046_v6  ;;  %v1087_v46 = vpop.f32.mrb[30].mxu0  ;;  %v1128_v48 = vpop.f32.mrb[30].mxu1  ;;  %v1134_v54 = vadd.f32 %v1126_v45, %v1048_v52 }
 0x814   :  { %v1359_v49 = vmul.f32 -1.442695, %v1131_v42  ;;  %v1088_v50 = vpop.f32.mrb[31].mxu0  ;;  %v1129_v51 = vpop.f32.mrb[31].mxu1 }
 0x815   :  { %v1360_v41 = vmul.f32 -1.442695, %v1132_v34  ;;  %v1361_v56 = vmul.f32 -1.442695, %v1134_v54 }
 0x816   :  { %1530 = vpow2.f32 %v1359_v49 }
 0x817   :  { %1532 = vpow2.f32 %v1360_v41 }
 0x818   :  { %1534 = vpow2.f32 %v1361_v56 }
 0x819   :  { %1536 = vtanh.f32 %v1133_v57 }
 0x820   :  { %v1531_v47 = vpop.eup %1530 }
 0x821   :  { %v1533_v58 = vpop.eup %1532  ;;  %v1138_v59 = vadd.f32 1.0, %v1531_v47 }
 0x822   :  { %v1144_v60 = vadd.f32 1.0, %v1533_v58  ;;  %v1535_v61 = vpop.eup %1534 }
 0x823   :  { %1538 = vrcp.f32 %v1138_v59  ;;  %v1537_v4 = vpop.eup %1536  ;;  %v1151_v9 = vadd.f32 1.0, %v1535_v61 }
 0x824   :  { %1540 = vrcp.f32 %v1144_v60 }
 0x825   :  { %1542 = vrcp.f32 %v1151_v9 }
 0x82d   :  { %v1539_v5 = vpop.eup %1538 }
 0x82e   :  { %v1541_v7 = vpop.eup %1540  ;;  %v1155_v8 = vmul.f32 %v1539_v5, %v1537_v4 }
 0x82f   :  { %v1154_v10 = vmul.f32 %v1541_v7, %v2290_v11  ;;  %v1543_v17 = vpop.eup %1542 }
 0x831   :  { %v1156_v16 = vadd.f32 %v1155_v8, %v1154_v10 }
 0x833   :  { %1544 = vtanh.f32 %v1156_v16 }
 0x83d   :  { %v1545_v18 = vpop.eup %1544 }
 0x83e   :  { %v1158_v19 = vmul.f32 %v1545_v18, %v1543_v17 }
 0x840   :  { %v1159_v20 = vpack.c.bf16 %v1158_v19, %v1158_v19 }
 0x842   :  { %1362 = vst [vmem:[%s2349_s2 + $0x1c] sm:$0xf] %v1159_v20  ;;  %1202 = vmatmul.mubr.bf16.vlgmr.msra.gmra.mrb[32].mxu0 %v1159_v20  ;;  %1243 = vmatmul.mubr.bf16.vlgmr.msra.gmra.mrb[32].mxu1 %v1159_v20 }
 0x915   :  { %v1203_v3 = vpop.f32.mrb[32].mxu0  ;;  %v1244_v23 = vpop.f32.mrb[32].mxu1 }
 0x916   :  { %v1251_v24 = vadd.f32 %v1203_v3, %v1165_v2  ;;  %v1205_v26 = vpop.f32.mrb[33].mxu0  ;;  %v1246_v27 = vpop.f32.mrb[33].mxu1  ;;  %v1253_v0 = vadd.f32 %v1244_v23, %v1167_v36 }
 0x917   :  { %v1252_v28 = vadd.f32 %v1205_v26, %v1166_v22  ;;  %v1207_v29 = vpop.f32.mrb[34].mxu0  ;;  %v1248_v30 = vpop.f32.mrb[34].mxu1  ;;  %v1254_v33 = vadd.f32 %v1246_v27, %v1168_v63 }
 0x918   :  { %v1365_v31 = vmul.f32 -1.442695, %v1251_v24  ;;  %v1208_v32 = vpop.f32.mrb[35].mxu0  ;;  %v1249_v53 = vpop.f32.mrb[35].mxu1 }
 0x919   :  { %v1366_v62 = vmul.f32 -1.442695, %v1252_v28  ;;  %v1367_v37 = vmul.f32 -1.442695, %v1254_v33 }
 0x91a   :  { %1546 = vpow2.f32 %v1365_v31 }
 0x91b   :  { %1548 = vpow2.f32 %v1366_v62 }
 0x91c   :  { %1550 = vpow2.f32 %v1367_v37 }
 0x91d   :  { %1552 = vtanh.f32 %v1253_v0 }
 0x924   :  { %v1547_v38 = vpop.eup %1546 }
 0x925   :  { %v1549_v11 = vpop.eup %1548  ;;  %v1258_v12 = vadd.f32 1.0, %v1547_v38 }
 0x926   :  { %v1264_v13 = vadd.f32 1.0, %v1549_v11  ;;  %v1551_v14 = vpop.eup %1550 }
 0x927   :  { %1554 = vrcp.f32 %v1258_v12  ;;  %v1553_v15 = vpop.eup %1552  ;;  %v1271_v39 = vadd.f32 1.0, %v1551_v14 }
 0x928   :  { %1556 = vrcp.f32 %v1264_v13 }
 0x929   :  { %1558 = vrcp.f32 %v1271_v39 }
 0x931   :  { %v1555_v1 = vpop.eup %1554 }
 0x932   :  { %v1557_v35 = vpop.eup %1556  ;;  %v1275_v6 = vmul.f32 %v1555_v1, %v1553_v15 }
 0x933   :  { %v1274_v40 = vmul.f32 %v1557_v35, %v1156_v16  ;;  %v1559_v43 = vpop.eup %1558 }
 0x935   :  { %v1276_v42 = vadd.f32 %v1275_v6, %v1274_v40 }
 0x937   :  { %1560 = vtanh.f32 %v1276_v42 }
 0x941   :  { %v1561_v44 = vpop.eup %1560 }
 0x942   :  { %v1278_v45 = vmul.f32 %v1561_v44, %v1559_v43 }
 0x944   :  { %v1279_v34 = vpack.c.bf16 %v1278_v45, %v1278_v45 }
 0x946   :  { %1368 = vst [vmem:[%s2349_s2 + $0x20] sm:$0xf] %v1279_v34 }

// kernel: encoder_to_decoder_forward.9
= control target key start
LH: loop header
LB: loop body
LE: loop exit
PB: predicated region body
PF: predicated region fallthrough
CT: control target
= control target key end

     0   :  { %v957_v1 = vmov 0   ;;  %v622_v38 = vlaneseq  ;;  %s1210_s1 = inlined_call_operand.vmem [shape: bf16[128,512], index: 1, kind: input, shape index: {}]   ;;  %s1211_s0 = inlined_call_operand.vmem [shape: bf16[80,128], index: 0, kind: input, shape index: {}]   ;;  %s1212_s2 = inlined_call_operand.vmem [shape: f32[1,512], index: 2, kind: input, shape index: {}]   ;;  %s1213_s3 = inlined_call_operand.vmem [shape: bf16[80,512], index: 3, kind: output, shape index: {}]  }
   0x1   :  { %v904_v0 = vld [vmem:[%s1210_s1 + $0x4] ss:$16 sps:$4 sm:$0xff]   ;;  %363 = vmatprep.mubr.bf16.mxu0 %v957_v1  ;;  %446 = vmatprep.mubr.bf16.mxu1 %v957_v1  ;;  %v906_v2 = vld [vmem:[%s1210_s1 + $0xc] ss:$16 sps:$4 sm:$0xff]   ;;  %v908_v3 = vld [vmem:[%s1210_s1] ss:$16 sps:$4 sm:$0xff]  }
   0x2   :  { %331 = vmatprep.subr.bf16.mxu0 %v904_v0  ;;  %v909_v4 = vld [vmem:[%s1210_s1 + $0x8] ss:$16 sps:$4 sm:$0xff]   ;;  %414 = vmatprep.subr.bf16.mxu1 %v906_v2  ;;  %v910_v5 = vld [vmem:[%s1210_s1 + $0x24] ss:$16 sps:$4 sm:$0xff]   ;;  %v912_v6 = vld [vmem:[%s1210_s1 + $0x2c] ss:$16 sps:$4 sm:$0xff]  }
   0x3   :  { %332 = vmatpush1.bf16.msra.mxu0 %v908_v3  ;;  %415 = vmatpush1.bf16.msra.mxu1 %v909_v4  ;;  %v914_v7 = vld [vmem:[%s1210_s1 + $0x20] ss:$16 sps:$4 sm:$0xff]   ;;  %v915_v8 = vld [vmem:[%s1210_s1 + $0x28] ss:$16 sps:$4 sm:$0xff]   ;;  %v916_v9 = vld [vmem:[%s1210_s1 + $0x44] ss:$16 sps:$4 sm:$0xff]  }
   0x4   :  { %333 = vmatprep.subr.bf16.mxu0 %v910_v5  ;;  %416 = vmatprep.subr.bf16.mxu1 %v912_v6  ;;  %v918_v10 = vld [vmem:[%s1210_s1 + $0x4c] ss:$16 sps:$4 sm:$0xff]   ;;  %v920_v11 = vld [vmem:[%s1210_s1 + $0x40] ss:$16 sps:$4 sm:$0xff]   ;;  %v921_v12 = vld [vmem:[%s1210_s1 + $0x48] ss:$16 sps:$4 sm:$0xff]  }
   0x5   :  { %v922_v13 = vld [vmem:[%s1210_s1 + $0x64] ss:$16 sps:$4 sm:$0xff]   ;;  %v924_v14 = vld [vmem:[%s1210_s1 + $0x6c] ss:$16 sps:$4 sm:$0xff]   ;;  %v926_v15 = vld [vmem:[%s1210_s1 + $0x60] ss:$16 sps:$4 sm:$0xff]  }
   0x6   :  { %v927_v16 = vld [vmem:[%s1210_s1 + $0x68] ss:$16 sps:$4 sm:$0xff]   ;;  %v928_v17 = vld [vmem:[%s1210_s1 + $0x84] ss:$16 sps:$4 sm:$0xff]   ;;  %v930_v18 = vld [vmem:[%s1210_s1 + $0x8c] ss:$16 sps:$4 sm:$0xff]  }
   0x7   :  { %334 = vmatpush1.bf16.msra.mxu0 %v914_v7  ;;  %417 = vmatpush1.bf16.msra.mxu1 %v915_v8  ;;  %v932_v19 = vld [vmem:[%s1210_s1 + $0x80] ss:$16 sps:$4 sm:$0xff]   ;;  %v933_v20 = vld [vmem:[%s1210_s1 + $0x88] ss:$16 sps:$4 sm:$0xff]   ;;  %v934_v21 = vld [vmem:[%s1210_s1 + $0xa4] ss:$16 sps:$4 sm:$0xff]  }
   0x8   :  { %335 = vmatprep.subr.bf16.mxu0 %v916_v9  ;;  %418 = vmatprep.subr.bf16.mxu1 %v918_v10  ;;  %v936_v22 = vld [vmem:[%s1210_s1 + $0xac] ss:$16 sps:$4 sm:$0xff]   ;;  %v938_v23 = vld [vmem:[%s1210_s1 + $0xa0] ss:$16 sps:$4 sm:$0xff]   ;;  %v939_v24 = vld [vmem:[%s1210_s1 + $0xa8] ss:$16 sps:$4 sm:$0xff]  }
   0x9   :  { %v940_v25 = vld [vmem:[%s1210_s1 + $0xc4] ss:$16 sps:$4 sm:$0xff]   ;;  %v942_v26 = vld [vmem:[%s1210_s1 + $0xcc] ss:$16 sps:$4 sm:$0xff]   ;;  %v944_v27 = vld [vmem:[%s1210_s1 + $0xc0] ss:$16 sps:$4 sm:$0xff]  }
   0xa   :  { %v945_v28 = vld [vmem:[%s1210_s1 + $0xc8] ss:$16 sps:$4 sm:$0xff]   ;;  %v946_v29 = vld [vmem:[%s1210_s1 + $0xe4] ss:$16 sps:$4 sm:$0xff]   ;;  %v948_v30 = vld [vmem:[%s1210_s1 + $0xec] ss:$16 sps:$4 sm:$0xff]  }
   0xb   :  { %336 = vmatpush1.bf16.msra.mxu0 %v920_v11  ;;  %419 = vmatpush1.bf16.msra.mxu1 %v921_v12  ;;  %v950_v31 = vld [vmem:[%s1210_s1 + $0xe0] ss:$16 sps:$4 sm:$0xff]   ;;  %v951_v32 = vld [vmem:[%s1210_s1 + $0xe8] ss:$16 sps:$4 sm:$0xff]   ;;  %v623_v39 = vshrl.u32 %v622_v38, 7 }
   0xc   :  { %337 = vmatprep.subr.bf16.mxu0 %v922_v13  ;;  %420 = vmatprep.subr.bf16.mxu1 %v924_v14  ;;  %v952_v33 = vld [vmem:[%s1211_s0] sm:$0xff]   ;;  %v953_v34 = vld [vmem:[%s1211_s0 + $0x8] sm:$0xff]   ;;  %v954_v35 = vld [vmem:[%s1211_s0 + $0x10] sm:$0xff]  }
   0xd   :  { %v955_v36 = vld [vmem:[%s1211_s0 + $0x18] sm:$0xff]   ;;  %v956_v37 = vld [vmem:[%s1211_s0 + $0x20] sm:$0xff]   ;;  %v624_v40 = vsub.s32 0, %v623_v39  ;;  %v632_v41 = vsub.s32 2, %v623_v39  ;;  %v628_v43 = vsub.s32 1, %v623_v39  ;;  %v636_v44 = vsub.s32 3, %v623_v39 }
   0xe   :  { %v620_v42 = vld [vmem:[%s1212_s2] sm:$0xf] }
   0xf   :  { %338 = vmatpush1.bf16.msra.mxu0 %v926_v15  ;;  %421 = vmatpush1.bf16.msra.mxu1 %v927_v16  ;;  %v1102_v45 = vrot.slane %v620_v42, %v624_v40  ;;  %v1104_v46 = vrot.slane %v620_v42, %v632_v41  ;;  %v1106_v47 = vrot.slane %v620_v42, %v628_v43 }
  0x10   :  { %339 = vmatprep.subr.bf16.mxu0 %v928_v17  ;;  %422 = vmatprep.subr.bf16.mxu1 %v930_v18  ;;  %v1108_v48 = vrot.slane %v620_v42, %v636_v44 }
  0x13   :  { %340 = vmatpush1.bf16.msra.mxu0 %v932_v19  ;;  %423 = vmatpush1.bf16.msra.mxu1 %v933_v20 }
  0x14   :  { %341 = vmatprep.subr.bf16.mxu0 %v934_v21  ;;  %424 = vmatprep.subr.bf16.mxu1 %v936_v22 }
  0x17   :  { %342 = vmatpush1.bf16.msra.mxu0 %v938_v23  ;;  %425 = vmatpush1.bf16.msra.mxu1 %v939_v24 }
  0x18   :  { %343 = vmatprep.subr.bf16.mxu0 %v940_v25  ;;  %426 = vmatprep.subr.bf16.mxu1 %v942_v26 }
  0x1b   :  { %344 = vmatpush1.bf16.msra.mxu0 %v944_v27  ;;  %427 = vmatpush1.bf16.msra.mxu1 %v945_v28 }
  0x1c   :  { %345 = vmatprep.subr.bf16.mxu0 %v946_v29  ;;  %428 = vmatprep.subr.bf16.mxu1 %v948_v30 }
  0x1f   :  { %346 = vmatpush1.bf16.msra.mxu0 %v950_v31  ;;  %429 = vmatpush1.bf16.msra.mxu1 %v951_v32 }
  0x22   :  { %364 = vmatmul.mubr.bf16.vlgmr.msra.gmra.mrb[0].mxu0 %v952_v33  ;;  %447 = vmatmul.mubr.bf16.vlgmr.msra.gmra.mrb[0].mxu1 %v952_v33 }
  0x23   :  { %373 = vmatprep.mubr.bf16.mxu0 %v957_v1  ;;  %456 = vmatprep.mubr.bf16.mxu1 %v957_v1 }
  0x2a   :  { %374 = vmatmul.mubr.bf16.gmra.mrb[4].mxu0 %v953_v34  ;;  %457 = vmatmul.mubr.bf16.gmra.mrb[4].mxu1 %v953_v34 }
  0x2b   :  { %383 = vmatprep.mubr.bf16.mxu0 %v957_v1  ;;  %466 = vmatprep.mubr.bf16.mxu1 %v957_v1 }
  0x32   :  { %384 = vmatmul.mubr.bf16.gmra.mrb[8].mxu0 %v954_v35  ;;  %467 = vmatmul.mubr.bf16.gmra.mrb[8].mxu1 %v954_v35 }
  0x33   :  { %393 = vmatprep.mubr.bf16.mxu0 %v957_v1  ;;  %476 = vmatprep.mubr.bf16.mxu1 %v957_v1 }
  0x3a   :  { %394 = vmatmul.mubr.bf16.gmra.mrb[12].mxu0 %v955_v36  ;;  %477 = vmatmul.mubr.bf16.gmra.mrb[12].mxu1 %v955_v36 }
  0x3b   :  { %403 = vmatprep.mubr.bf16.mxu0 %v957_v1  ;;  %486 = vmatprep.mubr.bf16.mxu1 %v957_v1 }
  0x42   :  { %404 = vmatmul.mubr.bf16.gmra.mrb[16].mxu0 %v956_v37  ;;  %487 = vmatmul.mubr.bf16.gmra.mrb[16].mxu1 %v956_v37 }
  0xf5   :  { %v365_v49 = vpop.f32.mrb[0].mxu0  ;;  %v448_v50 = vpop.f32.mrb[0].mxu1 }
  0xf6   :  { %v642_v51 = vadd.f32 %v1102_v45, %v365_v49  ;;  %v644_v52 = vadd.f32 %v1104_v46, %v448_v50  ;;  %v367_v53 = vpop.f32.mrb[1].mxu0  ;;  %v450_v54 = vpop.f32.mrb[1].mxu1 }
  0xf7   :  { %v643_v55 = vadd.f32 %v1106_v47, %v367_v53  ;;  %v645_v56 = vadd.f32 %v1108_v48, %v450_v54  ;;  %v369_v57 = vpop.f32.mrb[2].mxu0  ;;  %v452_v58 = vpop.f32.mrb[2].mxu1 }
  0xf8   :  { %v646_v59 = vadd.f32 %v1102_v45, %v369_v57  ;;  %v648_v60 = vadd.f32 %v1104_v46, %v452_v58  ;;  %v371_v61 = vpop.f32.mrb[3].mxu0  ;;  %v454_v62 = vpop.f32.mrb[3].mxu1 }
  0xf9   :  { %v883_v63 = vpack.c.bf16 %v643_v55, %v642_v51  ;;  %v884_v0 = vpack.c.bf16 %v645_v56, %v644_v52  ;;  %v647_v1 = vadd.f32 %v1106_v47, %v371_v61  ;;  %v649_v2 = vadd.f32 %v1108_v48, %v454_v62 }
  0xfb   :  { %802 = vst [vmem:[%s1213_s3] sm:$0xff] %v883_v63  ;;  %803 = vst [vmem:[%s1213_s3 + $0x8] sm:$0xff] %v884_v0  ;;  %v885_v3 = vpack.c.bf16 %v647_v1, %v646_v59  ;;  %v886_v4 = vpack.c.bf16 %v649_v2, %v648_v60 }
  0xfd   :  { %804 = vst [vmem:[%s1213_s3 + $0x10] sm:$0xff] %v885_v3  ;;  %805 = vst [vmem:[%s1213_s3 + $0x18] sm:$0xff] %v886_v4  ;;  %v375_v5 = vpop.f32.mrb[4].mxu0  ;;  %v458_v6 = vpop.f32.mrb[4].mxu1 }
  0xfe   :  { %v650_v7 = vadd.f32 %v1102_v45, %v375_v5  ;;  %v652_v8 = vadd.f32 %v1104_v46, %v458_v6  ;;  %v377_v9 = vpop.f32.mrb[5].mxu0  ;;  %v460_v10 = vpop.f32.mrb[5].mxu1 }
  0xff   :  { %v651_v11 = vadd.f32 %v1106_v47, %v377_v9  ;;  %v653_v12 = vadd.f32 %v1108_v48, %v460_v10  ;;  %v379_v13 = vpop.f32.mrb[6].mxu0  ;;  %v462_v14 = vpop.f32.mrb[6].mxu1 }
 0x100   :  { %v654_v15 = vadd.f32 %v1102_v45, %v379_v13  ;;  %v656_v16 = vadd.f32 %v1104_v46, %v462_v14  ;;  %v381_v17 = vpop.f32.mrb[7].mxu0  ;;  %v464_v18 = vpop.f32.mrb[7].mxu1 }
 0x101   :  { %v887_v19 = vpack.c.bf16 %v651_v11, %v650_v7  ;;  %v888_v20 = vpack.c.bf16 %v653_v12, %v652_v8  ;;  %v655_v21 = vadd.f32 %v1106_v47, %v381_v17  ;;  %v657_v22 = vadd.f32 %v1108_v48, %v464_v18 }
 0x103   :  { %806 = vst [vmem:[%s1213_s3 + $0x20] sm:$0xff] %v887_v19  ;;  %807 = vst [vmem:[%s1213_s3 + $0x28] sm:$0xff] %v888_v20  ;;  %v889_v23 = vpack.c.bf16 %v655_v21, %v654_v15  ;;  %v890_v24 = vpack.c.bf16 %v657_v22, %v656_v16 }
 0x105   :  { %808 = vst [vmem:[%s1213_s3 + $0x30] sm:$0xff] %v889_v23  ;;  %809 = vst [vmem:[%s1213_s3 + $0x38] sm:$0xff] %v890_v24  ;;  %v385_v25 = vpop.f32.mrb[8].mxu0  ;;  %v468_v26 = vpop.f32.mrb[8].mxu1 }
 0x106   :  { %v658_v27 = vadd.f32 %v1102_v45, %v385_v25  ;;  %v660_v28 = vadd.f32 %v1104_v46, %v468_v26  ;;  %v387_v29 = vpop.f32.mrb[9].mxu0  ;;  %v470_v30 = vpop.f32.mrb[9].mxu1 }
 0x107   :  { %v659_v31 = vadd.f32 %v1106_v47, %v387_v29  ;;  %v661_v32 = vadd.f32 %v1108_v48, %v470_v30  ;;  %v389_v33 = vpop.f32.mrb[10].mxu0  ;;  %v472_v34 = vpop.f32.mrb[10].mxu1 }
 0x108   :  { %v662_v35 = vadd.f32 %v1102_v45, %v389_v33  ;;  %v664_v36 = vadd.f32 %v1104_v46, %v472_v34  ;;  %v391_v37 = vpop.f32.mrb[11].mxu0  ;;  %v474_v38 = vpop.f32.mrb[11].mxu1 }
 0x109   :  { %v891_v39 = vpack.c.bf16 %v659_v31, %v658_v27  ;;  %v892_v40 = vpack.c.bf16 %v661_v32, %v660_v28  ;;  %v663_v41 = vadd.f32 %v1106_v47, %v391_v37  ;;  %v665_v42 = vadd.f32 %v1108_v48, %v474_v38 }
 0x10b   :  { %810 = vst [vmem:[%s1213_s3 + $0x40] sm:$0xff] %v891_v39  ;;  %811 = vst [vmem:[%s1213_s3 + $0x48] sm:$0xff] %v892_v40  ;;  %v893_v43 = vpack.c.bf16 %v663_v41, %v662_v35  ;;  %v894_v44 = vpack.c.bf16 %v665_v42, %v664_v36 }
 0x10d   :  { %812 = vst [vmem:[%s1213_s3 + $0x50] sm:$0xff] %v893_v43  ;;  %813 = vst [vmem:[%s1213_s3 + $0x58] sm:$0xff] %v894_v44  ;;  %v395_v49 = vpop.f32.mrb[12].mxu0  ;;  %v478_v50 = vpop.f32.mrb[12].mxu1 }
 0x10e   :  { %v666_v51 = vadd.f32 %v1102_v45, %v395_v49  ;;  %v668_v52 = vadd.f32 %v1104_v46, %v478_v50  ;;  %v397_v53 = vpop.f32.mrb[13].mxu0  ;;  %v480_v54 = vpop.f32.mrb[13].mxu1 }
 0x10f   :  { %v667_v55 = vadd.f32 %v1106_v47, %v397_v53  ;;  %v669_v56 = vadd.f32 %v1108_v48, %v480_v54  ;;  %v399_v57 = vpop.f32.mrb[14].mxu0  ;;  %v482_v58 = vpop.f32.mrb[14].mxu1 }
 0x110   :  { %v670_v59 = vadd.f32 %v1102_v45, %v399_v57  ;;  %v672_v60 = vadd.f32 %v1104_v46, %v482_v58  ;;  %v401_v61 = vpop.f32.mrb[15].mxu0  ;;  %v484_v62 = vpop.f32.mrb[15].mxu1 }
 0x111   :  { %v895_v63 = vpack.c.bf16 %v667_v55, %v666_v51  ;;  %v896_v0 = vpack.c.bf16 %v669_v56, %v668_v52  ;;  %v671_v1 = vadd.f32 %v1106_v47, %v401_v61  ;;  %v673_v2 = vadd.f32 %v1108_v48, %v484_v62 }
 0x113   :  { %814 = vst [vmem:[%s1213_s3 + $0x60] sm:$0xff] %v895_v63  ;;  %815 = vst [vmem:[%s1213_s3 + $0x68] sm:$0xff] %v896_v0  ;;  %v897_v3 = vpack.c.bf16 %v671_v1, %v670_v59  ;;  %v898_v4 = vpack.c.bf16 %v673_v2, %v672_v60 }
 0x115   :  { %816 = vst [vmem:[%s1213_s3 + $0x70] sm:$0xff] %v897_v3  ;;  %817 = vst [vmem:[%s1213_s3 + $0x78] sm:$0xff] %v898_v4  ;;  %v405_v5 = vpop.f32.mrb[16].mxu0  ;;  %v488_v6 = vpop.f32.mrb[16].mxu1 }
 0x116   :  { %v674_v7 = vadd.f32 %v1102_v45, %v405_v5  ;;  %v676_v8 = vadd.f32 %v1104_v46, %v488_v6  ;;  %v407_v9 = vpop.f32.mrb[17].mxu0  ;;  %v490_v10 = vpop.f32.mrb[17].mxu1 }
 0x117   :  { %v675_v11 = vadd.f32 %v1106_v47, %v407_v9  ;;  %v677_v12 = vadd.f32 %v1108_v48, %v490_v10  ;;  %v409_v13 = vpop.f32.mrb[18].mxu0  ;;  %v492_v14 = vpop.f32.mrb[18].mxu1 }
 0x118   :  { %v678_v15 = vadd.f32 %v1102_v45, %v409_v13  ;;  %v680_v16 = vadd.f32 %v1104_v46, %v492_v14  ;;  %v411_v17 = vpop.f32.mrb[19].mxu0  ;;  %v494_v18 = vpop.f32.mrb[19].mxu1 }
 0x119   :  { %v899_v19 = vpack.c.bf16 %v675_v11, %v674_v7  ;;  %v900_v20 = vpack.c.bf16 %v677_v12, %v676_v8  ;;  %v679_v21 = vadd.f32 %v1106_v47, %v411_v17  ;;  %v681_v22 = vadd.f32 %v1108_v48, %v494_v18 }
 0x11b   :  { %818 = vst [vmem:[%s1213_s3 + $0x80] sm:$0xff] %v899_v19  ;;  %819 = vst [vmem:[%s1213_s3 + $0x88] sm:$0xff] %v900_v20  ;;  %v901_v23 = vpack.c.bf16 %v679_v21, %v678_v15  ;;  %v902_v45 = vpack.c.bf16 %v681_v22, %v680_v16 }
 0x11d   :  { %820 = vst [vmem:[%s1213_s3 + $0x90] sm:$0xff] %v901_v23  ;;  %821 = vst [vmem:[%s1213_s3 + $0x98] sm:$0xff] %v902_v45 }

</bundles_post_ra>
